<compile_context>
chip_gen: v6e
topology: v6e:2x2x1
jax: 0.10.0
libtpu: 0.0.40
codegen_flags: <defaults>
</compile_context>

<pallas_src>
import functools

import jax
import jax.numpy as jnp
import numpy as np
from jax.experimental import pallas as pl
from jax.experimental.pallas import tpu as pltpu


# ----------------------------------------------------------------------------
# Fused forward kernel (one grid step = one batch block)
# ----------------------------------------------------------------------------
def _fused_kernel(x_ref, w1_ref, b1_ref, w2_ref, b2_ref, w3_ref, b3_ref,
                  wf1_ref, bf1_ref, wf2_ref, bf2_ref, o_ref,
                  pad1_ref, pad2_ref, pad3_ref,
                  pat1_ref, pat2_ref, pat3_ref, fcin_ref,
                  *, bb, H, W, Cin):

    # Zero the conv halo buffers ONCE: scratch persists across grid iterations and
    # the interior is fully overwritten every step, so only step 0 needs a memset.
    @pl.when(pl.program_id(0) == 0)
    def _zero_halos():
        pad1_ref[...] = jnp.zeros_like(pad1_ref)
        pad2_ref[...] = jnp.zeros_like(pad2_ref)
        pad3_ref[...] = jnp.zeros_like(pad3_ref)

    def conv3x3_relu_pool(x, pad_ref, pat_ref, w_ref, b_ref, h, w, cin, cout):
        # conv padding=1: write the interior; the 1-wide halo stays zero.
        pad_ref[:, 1:h + 1, 1:w + 1, :] = x.astype(pad_ref.dtype)
        # im2col without a lane-axis concat: each of the 9 shifted taps is stored
        # directly into its own lane range of the bf16 patches scratch.
        for t in range(9):
            dy, dx = t // 3, t % 3
            pat_ref[:, :, :, t * cin:(t + 1) * cin] = (
                pad_ref[:, dy:dy + h, dx:dx + w, :].astype(pat_ref.dtype))
        patches = pat_ref[...].reshape(bb * h * w, 9 * cin)     # layout-preserving
        acc = jnp.dot(patches, w_ref[...],
                      preferred_element_type=jnp.float32)       # (bb*h*w, cout)
        acc = jnp.maximum(acc + b_ref[...], 0.0)                # bias + ReLU (f32)
        # 2x2 max-pool (stride 2): elementwise maximum of the four taps (VPU).
        p4 = acc.reshape(bb, h // 2, 2, w // 2, 2, cout)
        p2 = jnp.maximum(p4[:, :, 0], p4[:, :, 1])              # pool along H
        return jnp.maximum(p2[:, :, :, 0, :], p2[:, :, :, 1, :])  # pool along W

    y = conv3x3_relu_pool(x_ref[...], pad1_ref, pat1_ref, w1_ref, b1_ref,
                          H, W, Cin, 16)
    y = conv3x3_relu_pool(y, pad2_ref, pat2_ref, w2_ref, b2_ref,
                          H // 2, W // 2, 16, 32)
    y = conv3x3_relu_pool(y, pad3_ref, pat3_ref, w3_ref, b3_ref,
                          H // 4, W // 4, 32, 64)

    # dropout(p=0.4): identity in eval mode.
    # TODO(synk): training-mode dropout mask (pltpu.prng_*) not implemented.

    # MLP head.  Torch's (C,H,W) flatten is folded into wf1's row order in the
    # wrapper; the spatial positions of y are lane-scattered into a (bb, hp*wp*64)
    # bf16 scratch so fc1 is a single K = hp*wp*64 MXU matmul (no value reshape).
    hp, wp = H // 8, W // 8
    for p in range(hp * wp):
        fcin_ref[:, p * 64:(p + 1) * 64] = y[:, p // wp, p % wp, :].astype(jnp.bfloat16)
    h1 = jnp.dot(fcin_ref[...], wf1_ref[...], preferred_element_type=jnp.float32)
    h1 = jnp.maximum(h1 + bf1_ref[...], 0.0).astype(jnp.bfloat16)
    # Lane-dense (bb, 128·k) logits store (num_classes padded in the wrapper).
    o_ref[...] = jnp.dot(h1, wf2_ref[...],
                         preferred_element_type=jnp.float32) + bf2_ref[...]


# ----------------------------------------------------------------------------
# Pessimistic VMEM footprint (lane dim padded to 128, sublanes to a full tile)
# ----------------------------------------------------------------------------
def _ceil(a, b):
    return -(-a // b)


def _phys_bytes(shape, dtype_bytes):
    *major, sm, mn = shape
    n = 1
    for d in major:
        n *= d
    pack = max(1, 4 // dtype_bytes)
    return n * _ceil(sm, 8 * pack) * 8 * pack * _ceil(mn, 128) * 128 * dtype_bytes


# ----------------------------------------------------------------------------
# Wrapper: layout plumbing + pallas_call
# ----------------------------------------------------------------------------
def simple_classifier_forward(x_nchw, params, *, batch_block=32):
    B, Cin, H, W = x_nchw.shape
    assert H % 8 == 0 and W % 8 == 0, "H and W must be divisible by 8"
    hp, wp = H // 8, W // 8
    n_fc1 = params["b_fc1"].shape[0]                  # 128
    nc = params["b_fc2"].shape[0]                     # num_classes
    ncp = _ceil(nc, 128) * 128                        # lane-dense padded logits
    Cinp = max(8, _ceil(Cin, 8) * 8)                  # pad Cin (3 -> 8)

    # Batch blocking: big blocks amortize the ~0.35us/step overhead and fill MXU
    # rows, but keep >=2 grid steps when B > 1 so both v7x TensorCores get work.
    bb = max(1, min(batch_block, _ceil(B, 2)))
    n_blocks = _ceil(B, bb)
    bp = n_blocks * bb

    # NCHW (PyTorch) -> NHWC, pad channels, cast to bf16 (halves the recurring
    # input DMA; the MXU operand is bf16 anyway), pad batch, split into blocks.
    # TODO(synk): for non-toy shapes accept NHWC input directly to skip this
    # extra HBM transpose pass (or use allow_input_fusion).
    x = jnp.transpose(x_nchw, (0, 2, 3, 1))
    if Cinp != Cin:
        x = jnp.pad(x, ((0, 0), (0, 0), (0, 0), (0, Cinp - Cin)))
    x = x.astype(jnp.bfloat16)
    if bp != B:
        x = jnp.pad(x, ((0, bp - B), (0, 0), (0, 0), (0, 0)))
    x = x.reshape(n_blocks, bb, H, W, Cinp)

    # Conv weights: HWIO -> (9*Cin, Cout); conv1 input-channel rows zero-padded.
    w1 = params["w_conv1"]
    if Cinp != Cin:
        w1 = jnp.pad(w1, ((0, 0), (0, 0), (0, Cinp - Cin), (0, 0)))
    w1 = w1.reshape(9 * Cinp, 16).astype(jnp.bfloat16)
    w2 = params["w_conv2"].reshape(9 * 16, 32).astype(jnp.bfloat16)
    w3 = params["w_conv3"].reshape(9 * 32, 64).astype(jnp.bfloat16)
    b1 = params["b_conv1"].reshape(1, 16).astype(jnp.float32)
    b2 = params["b_conv2"].reshape(1, 32).astype(jnp.float32)
    b3 = params["b_conv3"].reshape(1, 64).astype(jnp.float32)

    # fc1 rows are in torch's (C, H, W) flatten order; permute to the kernel's
    # (H, W, C) order -> ONE (hp*wp*64, n_fc1) matmul operand.
    wf1 = params["w_fc1"].reshape(64, hp, wp, n_fc1)
    wf1 = wf1.transpose(1, 2, 0, 3).reshape(hp * wp * 64, n_fc1).astype(jnp.bfloat16)
    bf1 = params["b_fc1"].reshape(1, n_fc1).astype(jnp.float32)

    # fc2: pad num_classes to a multiple of 128 so the final store is lane-dense.
    wf2 = jnp.pad(params["w_fc2"], ((0, 0), (0, ncp - nc))).astype(jnp.bfloat16)
    bf2 = jnp.pad(params["b_fc2"], ((0, ncp - nc),)).reshape(1, ncp).astype(jnp.float32)

    # Scoped-VMEM budget (pessimistic, lane-padded) so larger batch blocks also
    # compile on v5e's 16 MiB default; capped at v7x's 64 MiB physical VMEM.
    est = (2 * _phys_bytes((bb, H, W, Cinp), 2)                       # input (2 bufs)
           + _phys_bytes((bb, H + 2, W + 2, Cinp), 4)                 # pad scratches
           + _phys_bytes((bb, H // 2 + 2, W // 2 + 2, 16), 4)
           + _phys_bytes((bb, H // 4 + 2, W // 4 + 2, 32), 4)
           + _phys_bytes((bb, H, W, 9 * Cinp), 2)                     # patch scratches
           + _phys_bytes((bb, H // 2, W // 2, 9 * 16), 2)
           + _phys_bytes((bb, H // 4, W // 4, 9 * 32), 2)
           + _phys_bytes((bb * H * W, 16), 4)                         # f32 act temps
           + _phys_bytes((bb * (H // 2) * (W // 2), 32), 4)
           + _phys_bytes((bb * (H // 4) * (W // 4), 64), 4)
           + _phys_bytes((bb, hp * wp * 64), 2)                       # fcin scratch
           + 2 * _phys_bytes((bb, ncp), 4)                            # logits (2 bufs)
           + _phys_bytes((9 * Cinp, 16), 2) + _phys_bytes((9 * 16, 32), 2)
           + _phys_bytes((9 * 32, 64), 2)
           + _phys_bytes((hp * wp * 64, n_fc1), 2) + _phys_bytes((n_fc1, ncp), 2))
    vmem_limit = int(min(64 * 1024 * 1024, max(32 * 1024 * 1024, 2 * est)))

    kern = functools.partial(_fused_kernel, bb=bb, H=H, W=W, Cin=Cinp)
    out = pl.pallas_call(
        kern,
        out_shape=jax.ShapeDtypeStruct((n_blocks, bb, ncp), jnp.float32),
        grid=(n_blocks,),
        in_specs=[
            pl.BlockSpec((None, bb, H, W, Cinp), lambda i: (i, 0, 0, 0, 0)),
            pl.BlockSpec((9 * Cinp, 16), lambda i: (0, 0)),
            pl.BlockSpec((1, 16), lambda i: (0, 0)),
            pl.BlockSpec((9 * 16, 32), lambda i: (0, 0)),
            pl.BlockSpec((1, 32), lambda i: (0, 0)),
            pl.BlockSpec((9 * 32, 64), lambda i: (0, 0)),
            pl.BlockSpec((1, 64), lambda i: (0, 0)),
            pl.BlockSpec((hp * wp * 64, n_fc1), lambda i: (0, 0)),
            pl.BlockSpec((1, n_fc1), lambda i: (0, 0)),
            pl.BlockSpec((n_fc1, ncp), lambda i: (0, 0)),
            pl.BlockSpec((1, ncp), lambda i: (0, 0)),
        ],
        out_specs=pl.BlockSpec((None, bb, ncp), lambda i: (i, 0, 0)),
        scratch_shapes=[
            pltpu.VMEM((bb, H + 2, W + 2, Cinp), jnp.float32),            # pad1
            pltpu.VMEM((bb, H // 2 + 2, W // 2 + 2, 16), jnp.float32),    # pad2
            pltpu.VMEM((bb, H // 4 + 2, W // 4 + 2, 32), jnp.float32),    # pad3
            pltpu.VMEM((bb, H, W, 9 * Cinp), jnp.bfloat16),               # patches1
            pltpu.VMEM((bb, H // 2, W // 2, 9 * 16), jnp.bfloat16),       # patches2
            pltpu.VMEM((bb, H // 4, W // 4, 9 * 32), jnp.bfloat16),       # patches3
            pltpu.VMEM((bb, hp * wp * 64), jnp.bfloat16),                 # fc1 input
        ],
        compiler_params=pltpu.CompilerParams(
            dimension_semantics=("parallel",),       # batch blocks shard across v7x TCs
            vmem_limit_bytes=vmem_limit),
    )(x, w1, b1, w2, b2, w3, b3, wf1, bf1, wf2, bf2)
    return out.reshape(bp, ncp)[:B, :nc]


# ----------------------------------------------------------------------------
# Pure-JAX (XLA) reference, f32 end-to-end, mirroring the PyTorch module.
# ----------------------------------------------------------------------------
def reference_forward(x_nchw, params):
    x = jnp.transpose(x_nchw, (0, 2, 3, 1)).astype(jnp.float32)   # NHWC

    def conv_pool(x, w_hwio, b):
        y = jax.lax.conv_general_dilated(
            x, w_hwio, window_strides=(1, 1), padding="SAME",
            dimension_numbers=("NHWC", "HWIO", "NHWC"))
        y = jnp.maximum(y + b, 0.0)
        B, H, W, C = y.shape
        return y.reshape(B, H // 2, 2, W // 2, 2, C).max(axis=(2, 4))

    x = conv_pool(x, params["w_conv1"], params["b_conv1"])
    x = conv_pool(x, params["w_conv2"], params["b_conv2"])
    x = conv_pool(x, params["w_conv3"], params["b_conv3"])
    B, Hp, Wp, C = x.shape
    x = jnp.transpose(x, (0, 3, 1, 2)).reshape(B, C * Hp * Wp)    # torch CHW flatten
    h = jnp.maximum(x @ params["w_fc1"] + params["b_fc1"], 0.0)
    return h @ params["w_fc2"] + params["b_fc2"]


def init_params(key, image_height, image_width, input_channels=3, num_classes=100):
    ks = jax.random.split(key, 10)

    def nrm(k, shape, scale=0.05):
        return (scale * jax.random.normal(k, shape)).astype(jnp.float32)

    fc1_in = 64 * (image_height // 8) * (image_width // 8)
    return {
        # Conv weights in HWIO; fc1 rows in torch's (C, H, W) flatten order.
        "w_conv1": nrm(ks[0], (3, 3, input_channels, 16)),
        "b_conv1": nrm(ks[1], (16,)),
        "w_conv2": nrm(ks[2], (3, 3, 16, 32)),
        "b_conv2": nrm(ks[3], (32,)),
        "w_conv3": nrm(ks[4], (3, 3, 32, 64)),
        "b_conv3": nrm(ks[5], (64,)),
        "w_fc1":   nrm(ks[6], (fc1_in, 128)),
        "b_fc1":   nrm(ks[7], (128,)),
        "w_fc2":   nrm(ks[8], (128, num_classes)),
        "b_fc2":   nrm(ks[9], (num_classes,)),
    }


if __name__ == "__main__":
    B, C, H, W = 2, 3, 16, 16
    num_classes = 100

    key = jax.random.PRNGKey(0)
    k_x, k_p = jax.random.split(key)
    x = jax.random.normal(k_x, (B, C, H, W), dtype=jnp.float32)   # NCHW, like PyTorch
    params = init_params(k_p, H, W, input_channels=C, num_classes=num_classes)

    out = jax.block_until_ready(jax.jit(simple_classifier_forward)(x, params))
    assert out.shape == (B, num_classes), out.shape
    assert out.dtype == jnp.float32

    # Correctness check vs. f32 XLA reference (kernel uses bf16 operands with f32
    # accumulation, hence the loose tolerance).
    ref = jax.block_until_ready(jax.jit(reference_forward)(x, params))
    np.testing.assert_allclose(np.asarray(out), np.asarray(ref), atol=1e-2, rtol=1e-1)

    print("KERNEL_OK")
</pallas_src>

<mosaic_0001>
module attributes {stable_mosaic.version = 11 : i64} {
  func.func @_fused_kernel(%arg0: i32, %arg1: memref<1x1x16x16x8xbf16, #tpu.memory_space<vmem>>, %arg2: memref<72x16xbf16, #tpu.memory_space<vmem>>, %arg3: memref<1x16xf32, #tpu.memory_space<vmem>>, %arg4: memref<144x32xbf16, #tpu.memory_space<vmem>>, %arg5: memref<1x32xf32, #tpu.memory_space<vmem>>, %arg6: memref<288x64xbf16, #tpu.memory_space<vmem>>, %arg7: memref<1x64xf32, #tpu.memory_space<vmem>>, %arg8: memref<256x128xbf16, #tpu.memory_space<vmem>>, %arg9: memref<1x128xf32, #tpu.memory_space<vmem>>, %arg10: memref<128x128xbf16, #tpu.memory_space<vmem>>, %arg11: memref<1x128xf32, #tpu.memory_space<vmem>>, %arg12: memref<1x1x128xf32, #tpu.memory_space<vmem>>, %arg13: memref<1x18x18x8xf32, #tpu.memory_space<vmem>>, %arg14: memref<1x10x10x16xf32, #tpu.memory_space<vmem>>, %arg15: memref<1x6x6x32xf32, #tpu.memory_space<vmem>>, %arg16: memref<1x16x16x72xbf16, #tpu.memory_space<vmem>>, %arg17: memref<1x8x8x144xbf16, #tpu.memory_space<vmem>>, %arg18: memref<1x4x4x288xbf16, #tpu.memory_space<vmem>>, %arg19: memref<1x256xbf16, #tpu.memory_space<vmem>>) attributes {dimension_semantics = [#tpu.dimension_semantics<parallel>], iteration_bounds = array<i64: 2>, scalar_prefetch = 0 : i64, scratch_operands = 7 : i64, tpu.core_type = #tpu.core_type<tc>, window_params = [{transform_indices = @transform_0, window_bounds = array<i64: 1, 1, 16, 16, 8>}, {pipeline_mode = #tpu.pipeline_mode<synchronous>, transform_indices = @transform_1, window_bounds = array<i64: 72, 16>}, {pipeline_mode = #tpu.pipeline_mode<synchronous>, transform_indices = @transform_2, window_bounds = array<i64: 1, 16>}, {pipeline_mode = #tpu.pipeline_mode<synchronous>, transform_indices = @transform_3, window_bounds = array<i64: 144, 32>}, {pipeline_mode = #tpu.pipeline_mode<synchronous>, transform_indices = @transform_4, window_bounds = array<i64: 1, 32>}, {pipeline_mode = #tpu.pipeline_mode<synchronous>, transform_indices = @transform_5, window_bounds = array<i64: 288, 64>}, {pipeline_mode = #tpu.pipeline_mode<synchronous>, transform_indices = @transform_6, window_bounds = array<i64: 1, 64>}, {pipeline_mode = #tpu.pipeline_mode<synchronous>, transform_indices = @transform_7, window_bounds = array<i64: 256, 128>}, {pipeline_mode = #tpu.pipeline_mode<synchronous>, transform_indices = @transform_8, window_bounds = array<i64: 1, 128>}, {pipeline_mode = #tpu.pipeline_mode<synchronous>, transform_indices = @transform_9, window_bounds = array<i64: 128, 128>}, {pipeline_mode = #tpu.pipeline_mode<synchronous>, transform_indices = @transform_10, window_bounds = array<i64: 1, 128>}, {transform_indices = @transform_11, window_bounds = array<i64: 1, 1, 128>}]} {
    %c0_i32 = arith.constant 0 : i32
    %0 = arith.cmpi eq, %arg0, %c0_i32 : i32
    %1 = arith.extui %0 : i1 to i32
    %c0_i32_0 = arith.constant 0 : i32
    %2 = arith.cmpi ne, %1, %c0_i32_0 : i32
    scf.if %2 {
      %cst_268 = arith.constant 0.000000e+00 : f32
      %181 = vector.broadcast %cst_268 : f32 to vector<1x18x18x8xf32>
      %c0_269 = arith.constant 0 : index
      %c0_270 = arith.constant 0 : index
      %c0_271 = arith.constant 0 : index
      %c0_272 = arith.constant 0 : index
      %182 = vector.load %arg13[%c0_269, %c0_270, %c0_271, %c0_272] : memref<1x18x18x8xf32, #tpu.memory_space<vmem>>, vector<1x18x18x8xf32>
      tpu.vector_store %arg13[%c0_269, %c0_270, %c0_271, %c0_272], %181 {strides = array<i32>} : memref<1x18x18x8xf32, #tpu.memory_space<vmem>>, vector<1x18x18x8xf32>,
      %cst_273 = arith.constant 0.000000e+00 : f32
      %183 = vector.broadcast %cst_273 : f32 to vector<1x10x10x16xf32>
      %c0_274 = arith.constant 0 : index
      %c0_275 = arith.constant 0 : index
      %c0_276 = arith.constant 0 : index
      %c0_277 = arith.constant 0 : index
      %184 = vector.load %arg14[%c0_274, %c0_275, %c0_276, %c0_277] : memref<1x10x10x16xf32, #tpu.memory_space<vmem>>, vector<1x10x10x16xf32>
      tpu.vector_store %arg14[%c0_274, %c0_275, %c0_276, %c0_277], %183 {strides = array<i32>} : memref<1x10x10x16xf32, #tpu.memory_space<vmem>>, vector<1x10x10x16xf32>,
      %cst_278 = arith.constant 0.000000e+00 : f32
      %185 = vector.broadcast %cst_278 : f32 to vector<1x6x6x32xf32>
      %c0_279 = arith.constant 0 : index
      %c0_280 = arith.constant 0 : index
      %c0_281 = arith.constant 0 : index
      %c0_282 = arith.constant 0 : index
      %186 = vector.load %arg15[%c0_279, %c0_280, %c0_281, %c0_282] : memref<1x6x6x32xf32, #tpu.memory_space<vmem>>, vector<1x6x6x32xf32>
      tpu.vector_store %arg15[%c0_279, %c0_280, %c0_281, %c0_282], %185 {strides = array<i32>} : memref<1x6x6x32xf32, #tpu.memory_space<vmem>>, vector<1x6x6x32xf32>,
    } else {
    }
    %c0 = arith.constant 0 : index
    %c0_1 = arith.constant 0 : index
    %c0_2 = arith.constant 0 : index
    %c0_3 = arith.constant 0 : index
    %c0_4 = arith.constant 0 : index
    %3 = vector.load %arg1[%c0, %c0_1, %c0_2, %c0_3, %c0_4] : memref<1x1x16x16x8xbf16, #tpu.memory_space<vmem>>, vector<1x1x16x16x8xbf16>
    %4 = vector.shape_cast %3 : vector<1x1x16x16x8xbf16> to vector<1x16x16x8xbf16>
    %5 = arith.extf %4 : vector<1x16x16x8xbf16> to vector<1x16x16x8xf32>
    %c0_5 = arith.constant 0 : index
    %c1 = arith.constant 1 : index
    %c1_6 = arith.constant 1 : index
    %c0_7 = arith.constant 0 : index
    %6 = vector.load %arg13[%c0_5, %c1, %c1_6, %c0_7] : memref<1x18x18x8xf32, #tpu.memory_space<vmem>>, vector<1x16x16x8xf32>
    tpu.vector_store %arg13[%c0_5, %c1, %c1_6, %c0_7], %5 {strides = array<i32>} : memref<1x18x18x8xf32, #tpu.memory_space<vmem>>, vector<1x16x16x8xf32>,
    %c0_8 = arith.constant 0 : index
    %c0_9 = arith.constant 0 : index
    %c0_10 = arith.constant 0 : index
    %c0_11 = arith.constant 0 : index
    %7 = vector.load %arg13[%c0_8, %c0_9, %c0_10, %c0_11] : memref<1x18x18x8xf32, #tpu.memory_space<vmem>>, vector<1x16x16x8xf32>
    %8 = arith.truncf %7 : vector<1x16x16x8xf32> to vector<1x16x16x8xbf16>
    %c0_12 = arith.constant 0 : index
    %c0_13 = arith.constant 0 : index
    %c0_14 = arith.constant 0 : index
    %c0_15 = arith.constant 0 : index
    %9 = vector.load %arg16[%c0_12, %c0_13, %c0_14, %c0_15] : memref<1x16x16x72xbf16, #tpu.memory_space<vmem>>, vector<1x16x16x8xbf16>
    tpu.vector_store %arg16[%c0_12, %c0_13, %c0_14, %c0_15], %8 {strides = array<i32>} : memref<1x16x16x72xbf16, #tpu.memory_space<vmem>>, vector<1x16x16x8xbf16>,
    %c0_16 = arith.constant 0 : index
    %c0_17 = arith.constant 0 : index
    %c1_18 = arith.constant 1 : index
    %c0_19 = arith.constant 0 : index
    %10 = vector.load %arg13[%c0_16, %c0_17, %c1_18, %c0_19] : memref<1x18x18x8xf32, #tpu.memory_space<vmem>>, vector<1x16x16x8xf32>
    %11 = arith.truncf %10 : vector<1x16x16x8xf32> to vector<1x16x16x8xbf16>
    %c0_20 = arith.constant 0 : index
    %c0_21 = arith.constant 0 : index
    %c0_22 = arith.constant 0 : index
    %c8 = arith.constant 8 : index
    %12 = vector.load %arg16[%c0_20, %c0_21, %c0_22, %c8] : memref<1x16x16x72xbf16, #tpu.memory_space<vmem>>, vector<1x16x16x8xbf16>
    tpu.vector_store %arg16[%c0_20, %c0_21, %c0_22, %c8], %11 {strides = array<i32>} : memref<1x16x16x72xbf16, #tpu.memory_space<vmem>>, vector<1x16x16x8xbf16>,
    %c0_23 = arith.constant 0 : index
    %c0_24 = arith.constant 0 : index
    %c2 = arith.constant 2 : index
    %c0_25 = arith.constant 0 : index
    %13 = vector.load %arg13[%c0_23, %c0_24, %c2, %c0_25] : memref<1x18x18x8xf32, #tpu.memory_space<vmem>>, vector<1x16x16x8xf32>
    %14 = arith.truncf %13 : vector<1x16x16x8xf32> to vector<1x16x16x8xbf16>
    %c0_26 = arith.constant 0 : index
    %c0_27 = arith.constant 0 : index
    %c0_28 = arith.constant 0 : index
    %c16 = arith.constant 16 : index
    %15 = vector.load %arg16[%c0_26, %c0_27, %c0_28, %c16] : memref<1x16x16x72xbf16, #tpu.memory_space<vmem>>, vector<1x16x16x8xbf16>
    tpu.vector_store %arg16[%c0_26, %c0_27, %c0_28, %c16], %14 {strides = array<i32>} : memref<1x16x16x72xbf16, #tpu.memory_space<vmem>>, vector<1x16x16x8xbf16>,
    %c0_29 = arith.constant 0 : index
    %c1_30 = arith.constant 1 : index
    %c0_31 = arith.constant 0 : index
    %c0_32 = arith.constant 0 : index
    %16 = vector.load %arg13[%c0_29, %c1_30, %c0_31, %c0_32] : memref<1x18x18x8xf32, #tpu.memory_space<vmem>>, vector<1x16x16x8xf32>
    %17 = arith.truncf %16 : vector<1x16x16x8xf32> to vector<1x16x16x8xbf16>
    %c0_33 = arith.constant 0 : index
    %c0_34 = arith.constant 0 : index
    %c0_35 = arith.constant 0 : index
    %c24 = arith.constant 24 : index
    %18 = vector.load %arg16[%c0_33, %c0_34, %c0_35, %c24] : memref<1x16x16x72xbf16, #tpu.memory_space<vmem>>, vector<1x16x16x8xbf16>
    tpu.vector_store %arg16[%c0_33, %c0_34, %c0_35, %c24], %17 {strides = array<i32>} : memref<1x16x16x72xbf16, #tpu.memory_space<vmem>>, vector<1x16x16x8xbf16>,
    %c0_36 = arith.constant 0 : index
    %c1_37 = arith.constant 1 : index
    %c1_38 = arith.constant 1 : index
    %c0_39 = arith.constant 0 : index
    %19 = vector.load %arg13[%c0_36, %c1_37, %c1_38, %c0_39] : memref<1x18x18x8xf32, #tpu.memory_space<vmem>>, vector<1x16x16x8xf32>
    %20 = arith.truncf %19 : vector<1x16x16x8xf32> to vector<1x16x16x8xbf16>
    %c0_40 = arith.constant 0 : index
    %c0_41 = arith.constant 0 : index
    %c0_42 = arith.constant 0 : index
    %c32 = arith.constant 32 : index
    %21 = vector.load %arg16[%c0_40, %c0_41, %c0_42, %c32] : memref<1x16x16x72xbf16, #tpu.memory_space<vmem>>, vector<1x16x16x8xbf16>
    tpu.vector_store %arg16[%c0_40, %c0_41, %c0_42, %c32], %20 {strides = array<i32>} : memref<1x16x16x72xbf16, #tpu.memory_space<vmem>>, vector<1x16x16x8xbf16>,
    %c0_43 = arith.constant 0 : index
    %c1_44 = arith.constant 1 : index
    %c2_45 = arith.constant 2 : index
    %c0_46 = arith.constant 0 : index
    %22 = vector.load %arg13[%c0_43, %c1_44, %c2_45, %c0_46] : memref<1x18x18x8xf32, #tpu.memory_space<vmem>>, vector<1x16x16x8xf32>
    %23 = arith.truncf %22 : vector<1x16x16x8xf32> to vector<1x16x16x8xbf16>
    %c0_47 = arith.constant 0 : index
    %c0_48 = arith.constant 0 : index
    %c0_49 = arith.constant 0 : index
    %c40 = arith.constant 40 : index
    %24 = vector.load %arg16[%c0_47, %c0_48, %c0_49, %c40] : memref<1x16x16x72xbf16, #tpu.memory_space<vmem>>, vector<1x16x16x8xbf16>
    tpu.vector_store %arg16[%c0_47, %c0_48, %c0_49, %c40], %23 {strides = array<i32>} : memref<1x16x16x72xbf16, #tpu.memory_space<vmem>>, vector<1x16x16x8xbf16>,
    %c0_50 = arith.constant 0 : index
    %c2_51 = arith.constant 2 : index
    %c0_52 = arith.constant 0 : index
    %c0_53 = arith.constant 0 : index
    %25 = vector.load %arg13[%c0_50, %c2_51, %c0_52, %c0_53] : memref<1x18x18x8xf32, #tpu.memory_space<vmem>>, vector<1x16x16x8xf32>
    %26 = arith.truncf %25 : vector<1x16x16x8xf32> to vector<1x16x16x8xbf16>
    %c0_54 = arith.constant 0 : index
    %c0_55 = arith.constant 0 : index
    %c0_56 = arith.constant 0 : index
    %c48 = arith.constant 48 : index
    %27 = vector.load %arg16[%c0_54, %c0_55, %c0_56, %c48] : memref<1x16x16x72xbf16, #tpu.memory_space<vmem>>, vector<1x16x16x8xbf16>
    tpu.vector_store %arg16[%c0_54, %c0_55, %c0_56, %c48], %26 {strides = array<i32>} : memref<1x16x16x72xbf16, #tpu.memory_space<vmem>>, vector<1x16x16x8xbf16>,
    %c0_57 = arith.constant 0 : index
    %c2_58 = arith.constant 2 : index
    %c1_59 = arith.constant 1 : index
    %c0_60 = arith.constant 0 : index
    %28 = vector.load %arg13[%c0_57, %c2_58, %c1_59, %c0_60] : memref<1x18x18x8xf32, #tpu.memory_space<vmem>>, vector<1x16x16x8xf32>
    %29 = arith.truncf %28 : vector<1x16x16x8xf32> to vector<1x16x16x8xbf16>
    %c0_61 = arith.constant 0 : index
    %c0_62 = arith.constant 0 : index
    %c0_63 = arith.constant 0 : index
    %c56 = arith.constant 56 : index
    %30 = vector.load %arg16[%c0_61, %c0_62, %c0_63, %c56] : memref<1x16x16x72xbf16, #tpu.memory_space<vmem>>, vector<1x16x16x8xbf16>
    tpu.vector_store %arg16[%c0_61, %c0_62, %c0_63, %c56], %29 {strides = array<i32>} : memref<1x16x16x72xbf16, #tpu.memory_space<vmem>>, vector<1x16x16x8xbf16>,
    %c0_64 = arith.constant 0 : index
    %c2_65 = arith.constant 2 : index
    %c2_66 = arith.constant 2 : index
    %c0_67 = arith.constant 0 : index
    %31 = vector.load %arg13[%c0_64, %c2_65, %c2_66, %c0_67] : memref<1x18x18x8xf32, #tpu.memory_space<vmem>>, vector<1x16x16x8xf32>
    %32 = arith.truncf %31 : vector<1x16x16x8xf32> to vector<1x16x16x8xbf16>
    %c0_68 = arith.constant 0 : index
    %c0_69 = arith.constant 0 : index
    %c0_70 = arith.constant 0 : index
    %c64 = arith.constant 64 : index
    %33 = vector.load %arg16[%c0_68, %c0_69, %c0_70, %c64] : memref<1x16x16x72xbf16, #tpu.memory_space<vmem>>, vector<1x16x16x8xbf16>
    tpu.vector_store %arg16[%c0_68, %c0_69, %c0_70, %c64], %32 {strides = array<i32>} : memref<1x16x16x72xbf16, #tpu.memory_space<vmem>>, vector<1x16x16x8xbf16>,
    %c0_71 = arith.constant 0 : index
    %c0_72 = arith.constant 0 : index
    %c0_73 = arith.constant 0 : index
    %c0_74 = arith.constant 0 : index
    %34 = vector.load %arg16[%c0_71, %c0_72, %c0_73, %c0_74] : memref<1x16x16x72xbf16, #tpu.memory_space<vmem>>, vector<1x16x16x72xbf16>
    %35 = vector.shape_cast %34 : vector<1x16x16x72xbf16> to vector<256x72xbf16>
    %c0_75 = arith.constant 0 : index
    %c0_76 = arith.constant 0 : index
    %36 = vector.load %arg2[%c0_75, %c0_76] : memref<72x16xbf16, #tpu.memory_space<vmem>>, vector<72x16xbf16>
    %cst = arith.constant dense<0.000000e+00> : vector<256x16xf32>
    %37 = tpu.matmul %35, %36, %cst {dimension_numbers = #tpu.dot_dimension_numbers<[1], [0], [0], [1], [0, 0, 1, 1], [], []>} : vector<256x72xbf16>, vector<72x16xbf16>, vector<256x16xf32> -> vector<256x16xf32>
    %c0_77 = arith.constant 0 : index
    %c0_78 = arith.constant 0 : index
    %38 = vector.load %arg3[%c0_77, %c0_78] : memref<1x16xf32, #tpu.memory_space<vmem>>, vector<1x16xf32>
    %39 = vector.broadcast %38 : vector<1x16xf32> to vector<256x16xf32>
    %40 = arith.addf %37, %39 : vector<256x16xf32>
    %cst_79 = arith.constant 0.000000e+00 : f32
    %41 = vector.broadcast %cst_79 : f32 to vector<256x16xf32>
    %42 = arith.maximumf %40, %41 : vector<256x16xf32>
    %43 = vector.shape_cast %42 : vector<256x16xf32> to vector<1x8x2x8x2x16xf32>
    %44 = vector.extract_strided_slice %43 {offsets = [0, 0, 0, 0, 0, 0], sizes = [1, 8, 1, 8, 2, 16], strides = [1, 1, 1, 1, 1, 1]} : vector<1x8x2x8x2x16xf32> to vector<1x8x1x8x2x16xf32>
    %45 = vector.shape_cast %44 : vector<1x8x1x8x2x16xf32> to vector<1x8x8x2x16xf32>
    %46 = vector.extract_strided_slice %43 {offsets = [0, 0, 1, 0, 0, 0], sizes = [1, 8, 1, 8, 2, 16], strides = [1, 1, 1, 1, 1, 1]} : vector<1x8x2x8x2x16xf32> to vector<1x8x1x8x2x16xf32>
    %47 = vector.shape_cast %46 : vector<1x8x1x8x2x16xf32> to vector<1x8x8x2x16xf32>
    %48 = arith.maximumf %45, %47 : vector<1x8x8x2x16xf32>
    %49 = vector.extract_strided_slice %48 {offsets = [0, 0, 0, 0, 0], sizes = [1, 8, 8, 1, 16], strides = [1, 1, 1, 1, 1]} : vector<1x8x8x2x16xf32> to vector<1x8x8x1x16xf32>
    %50 = vector.shape_cast %49 : vector<1x8x8x1x16xf32> to vector<1x8x8x16xf32>
    %51 = vector.extract_strided_slice %48 {offsets = [0, 0, 0, 1, 0], sizes = [1, 8, 8, 1, 16], strides = [1, 1, 1, 1, 1]} : vector<1x8x8x2x16xf32> to vector<1x8x8x1x16xf32>
    %52 = vector.shape_cast %51 : vector<1x8x8x1x16xf32> to vector<1x8x8x16xf32>
    %53 = arith.maximumf %50, %52 : vector<1x8x8x16xf32>
    %c0_80 = arith.constant 0 : index
    %c1_81 = arith.constant 1 : index
    %c1_82 = arith.constant 1 : index
    %c0_83 = arith.constant 0 : index
    %54 = vector.load %arg14[%c0_80, %c1_81, %c1_82, %c0_83] : memref<1x10x10x16xf32, #tpu.memory_space<vmem>>, vector<1x8x8x16xf32>
    tpu.vector_store %arg14[%c0_80, %c1_81, %c1_82, %c0_83], %53 {strides = array<i32>} : memref<1x10x10x16xf32, #tpu.memory_space<vmem>>, vector<1x8x8x16xf32>,
    %c0_84 = arith.constant 0 : index
    %c0_85 = arith.constant 0 : index
    %c0_86 = arith.constant 0 : index
    %c0_87 = arith.constant 0 : index
    %55 = vector.load %arg14[%c0_84, %c0_85, %c0_86, %c0_87] : memref<1x10x10x16xf32, #tpu.memory_space<vmem>>, vector<1x8x8x16xf32>
    %56 = arith.truncf %55 : vector<1x8x8x16xf32> to vector<1x8x8x16xbf16>
    %c0_88 = arith.constant 0 : index
    %c0_89 = arith.constant 0 : index
    %c0_90 = arith.constant 0 : index
    %c0_91 = arith.constant 0 : index
    %57 = vector.load %arg17[%c0_88, %c0_89, %c0_90, %c0_91] : memref<1x8x8x144xbf16, #tpu.memory_space<vmem>>, vector<1x8x8x16xbf16>
    tpu.vector_store %arg17[%c0_88, %c0_89, %c0_90, %c0_91], %56 {strides = array<i32>} : memref<1x8x8x144xbf16, #tpu.memory_space<vmem>>, vector<1x8x8x16xbf16>,
    %c0_92 = arith.constant 0 : index
    %c0_93 = arith.constant 0 : index
    %c1_94 = arith.constant 1 : index
    %c0_95 = arith.constant 0 : index
    %58 = vector.load %arg14[%c0_92, %c0_93, %c1_94, %c0_95] : memref<1x10x10x16xf32, #tpu.memory_space<vmem>>, vector<1x8x8x16xf32>
    %59 = arith.truncf %58 : vector<1x8x8x16xf32> to vector<1x8x8x16xbf16>
    %c0_96 = arith.constant 0 : index
    %c0_97 = arith.constant 0 : index
    %c0_98 = arith.constant 0 : index
    %c16_99 = arith.constant 16 : index
    %60 = vector.load %arg17[%c0_96, %c0_97, %c0_98, %c16_99] : memref<1x8x8x144xbf16, #tpu.memory_space<vmem>>, vector<1x8x8x16xbf16>
    tpu.vector_store %arg17[%c0_96, %c0_97, %c0_98, %c16_99], %59 {strides = array<i32>} : memref<1x8x8x144xbf16, #tpu.memory_space<vmem>>, vector<1x8x8x16xbf16>,
    %c0_100 = arith.constant 0 : index
    %c0_101 = arith.constant 0 : index
    %c2_102 = arith.constant 2 : index
    %c0_103 = arith.constant 0 : index
    %61 = vector.load %arg14[%c0_100, %c0_101, %c2_102, %c0_103] : memref<1x10x10x16xf32, #tpu.memory_space<vmem>>, vector<1x8x8x16xf32>
    %62 = arith.truncf %61 : vector<1x8x8x16xf32> to vector<1x8x8x16xbf16>
    %c0_104 = arith.constant 0 : index
    %c0_105 = arith.constant 0 : index
    %c0_106 = arith.constant 0 : index
    %c32_107 = arith.constant 32 : index
    %63 = vector.load %arg17[%c0_104, %c0_105, %c0_106, %c32_107] : memref<1x8x8x144xbf16, #tpu.memory_space<vmem>>, vector<1x8x8x16xbf16>
    tpu.vector_store %arg17[%c0_104, %c0_105, %c0_106, %c32_107], %62 {strides = array<i32>} : memref<1x8x8x144xbf16, #tpu.memory_space<vmem>>, vector<1x8x8x16xbf16>,
    %c0_108 = arith.constant 0 : index
    %c1_109 = arith.constant 1 : index
    %c0_110 = arith.constant 0 : index
    %c0_111 = arith.constant 0 : index
    %64 = vector.load %arg14[%c0_108, %c1_109, %c0_110, %c0_111] : memref<1x10x10x16xf32, #tpu.memory_space<vmem>>, vector<1x8x8x16xf32>
    %65 = arith.truncf %64 : vector<1x8x8x16xf32> to vector<1x8x8x16xbf16>
    %c0_112 = arith.constant 0 : index
    %c0_113 = arith.constant 0 : index
    %c0_114 = arith.constant 0 : index
    %c48_115 = arith.constant 48 : index
    %66 = vector.load %arg17[%c0_112, %c0_113, %c0_114, %c48_115] : memref<1x8x8x144xbf16, #tpu.memory_space<vmem>>, vector<1x8x8x16xbf16>
    tpu.vector_store %arg17[%c0_112, %c0_113, %c0_114, %c48_115], %65 {strides = array<i32>} : memref<1x8x8x144xbf16, #tpu.memory_space<vmem>>, vector<1x8x8x16xbf16>,
    %c0_116 = arith.constant 0 : index
    %c1_117 = arith.constant 1 : index
    %c1_118 = arith.constant 1 : index
    %c0_119 = arith.constant 0 : index
    %67 = vector.load %arg14[%c0_116, %c1_117, %c1_118, %c0_119] : memref<1x10x10x16xf32, #tpu.memory_space<vmem>>, vector<1x8x8x16xf32>
    %68 = arith.truncf %67 : vector<1x8x8x16xf32> to vector<1x8x8x16xbf16>
    %c0_120 = arith.constant 0 : index
    %c0_121 = arith.constant 0 : index
    %c0_122 = arith.constant 0 : index
    %c64_123 = arith.constant 64 : index
    %69 = vector.load %arg17[%c0_120, %c0_121, %c0_122, %c64_123] : memref<1x8x8x144xbf16, #tpu.memory_space<vmem>>, vector<1x8x8x16xbf16>
    tpu.vector_store %arg17[%c0_120, %c0_121, %c0_122, %c64_123], %68 {strides = array<i32>} : memref<1x8x8x144xbf16, #tpu.memory_space<vmem>>, vector<1x8x8x16xbf16>,
    %c0_124 = arith.constant 0 : index
    %c1_125 = arith.constant 1 : index
    %c2_126 = arith.constant 2 : index
    %c0_127 = arith.constant 0 : index
    %70 = vector.load %arg14[%c0_124, %c1_125, %c2_126, %c0_127] : memref<1x10x10x16xf32, #tpu.memory_space<vmem>>, vector<1x8x8x16xf32>
    %71 = arith.truncf %70 : vector<1x8x8x16xf32> to vector<1x8x8x16xbf16>
    %c0_128 = arith.constant 0 : index
    %c0_129 = arith.constant 0 : index
    %c0_130 = arith.constant 0 : index
    %c80 = arith.constant 80 : index
    %72 = vector.load %arg17[%c0_128, %c0_129, %c0_130, %c80] : memref<1x8x8x144xbf16, #tpu.memory_space<vmem>>, vector<1x8x8x16xbf16>
    tpu.vector_store %arg17[%c0_128, %c0_129, %c0_130, %c80], %71 {strides = array<i32>} : memref<1x8x8x144xbf16, #tpu.memory_space<vmem>>, vector<1x8x8x16xbf16>,
    %c0_131 = arith.constant 0 : index
    %c2_132 = arith.constant 2 : index
    %c0_133 = arith.constant 0 : index
    %c0_134 = arith.constant 0 : index
    %73 = vector.load %arg14[%c0_131, %c2_132, %c0_133, %c0_134] : memref<1x10x10x16xf32, #tpu.memory_space<vmem>>, vector<1x8x8x16xf32>
    %74 = arith.truncf %73 : vector<1x8x8x16xf32> to vector<1x8x8x16xbf16>
    %c0_135 = arith.constant 0 : index
    %c0_136 = arith.constant 0 : index
    %c0_137 = arith.constant 0 : index
    %c96 = arith.constant 96 : index
    %75 = vector.load %arg17[%c0_135, %c0_136, %c0_137, %c96] : memref<1x8x8x144xbf16, #tpu.memory_space<vmem>>, vector<1x8x8x16xbf16>
    tpu.vector_store %arg17[%c0_135, %c0_136, %c0_137, %c96], %74 {strides = array<i32>} : memref<1x8x8x144xbf16, #tpu.memory_space<vmem>>, vector<1x8x8x16xbf16>,
    %c0_138 = arith.constant 0 : index
    %c2_139 = arith.constant 2 : index
    %c1_140 = arith.constant 1 : index
    %c0_141 = arith.constant 0 : index
    %76 = vector.load %arg14[%c0_138, %c2_139, %c1_140, %c0_141] : memref<1x10x10x16xf32, #tpu.memory_space<vmem>>, vector<1x8x8x16xf32>
    %77 = arith.truncf %76 : vector<1x8x8x16xf32> to vector<1x8x8x16xbf16>
    %c0_142 = arith.constant 0 : index
    %c0_143 = arith.constant 0 : index
    %c0_144 = arith.constant 0 : index
    %c112 = arith.constant 112 : index
    %78 = vector.load %arg17[%c0_142, %c0_143, %c0_144, %c112] : memref<1x8x8x144xbf16, #tpu.memory_space<vmem>>, vector<1x8x8x16xbf16>
    tpu.vector_store %arg17[%c0_142, %c0_143, %c0_144, %c112], %77 {strides = array<i32>} : memref<1x8x8x144xbf16, #tpu.memory_space<vmem>>, vector<1x8x8x16xbf16>,
    %c0_145 = arith.constant 0 : index
    %c2_146 = arith.constant 2 : index
    %c2_147 = arith.constant 2 : index
    %c0_148 = arith.constant 0 : index
    %79 = vector.load %arg14[%c0_145, %c2_146, %c2_147, %c0_148] : memref<1x10x10x16xf32, #tpu.memory_space<vmem>>, vector<1x8x8x16xf32>
    %80 = arith.truncf %79 : vector<1x8x8x16xf32> to vector<1x8x8x16xbf16>
    %c0_149 = arith.constant 0 : index
    %c0_150 = arith.constant 0 : index
    %c0_151 = arith.constant 0 : index
    %c128 = arith.constant 128 : index
    %81 = vector.load %arg17[%c0_149, %c0_150, %c0_151, %c128] : memref<1x8x8x144xbf16, #tpu.memory_space<vmem>>, vector<1x8x8x16xbf16>
    tpu.vector_store %arg17[%c0_149, %c0_150, %c0_151, %c128], %80 {strides = array<i32>} : memref<1x8x8x144xbf16, #tpu.memory_space<vmem>>, vector<1x8x8x16xbf16>,
    %c0_152 = arith.constant 0 : index
    %c0_153 = arith.constant 0 : index
    %c0_154 = arith.constant 0 : index
    %c0_155 = arith.constant 0 : index
    %82 = vector.load %arg17[%c0_152, %c0_153, %c0_154, %c0_155] : memref<1x8x8x144xbf16, #tpu.memory_space<vmem>>, vector<1x8x8x144xbf16>
    %83 = vector.shape_cast %82 : vector<1x8x8x144xbf16> to vector<64x144xbf16>
    %c0_156 = arith.constant 0 : index
    %c0_157 = arith.constant 0 : index
    %84 = vector.load %arg4[%c0_156, %c0_157] : memref<144x32xbf16, #tpu.memory_space<vmem>>, vector<144x32xbf16>
    %cst_158 = arith.constant dense<0.000000e+00> : vector<64x32xf32>
    %85 = tpu.matmul %83, %84, %cst_158 {dimension_numbers = #tpu.dot_dimension_numbers<[1], [0], [0], [1], [0, 0, 1, 1], [], []>} : vector<64x144xbf16>, vector<144x32xbf16>, vector<64x32xf32> -> vector<64x32xf32>
    %c0_159 = arith.constant 0 : index
    %c0_160 = arith.constant 0 : index
    %86 = vector.load %arg5[%c0_159, %c0_160] : memref<1x32xf32, #tpu.memory_space<vmem>>, vector<1x32xf32>
    %87 = vector.broadcast %86 : vector<1x32xf32> to vector<64x32xf32>
    %88 = arith.addf %85, %87 : vector<64x32xf32>
    %cst_161 = arith.constant 0.000000e+00 : f32
    %89 = vector.broadcast %cst_161 : f32 to vector<64x32xf32>
    %90 = arith.maximumf %88, %89 : vector<64x32xf32>
    %91 = vector.shape_cast %90 : vector<64x32xf32> to vector<1x4x2x4x2x32xf32>
    %92 = vector.extract_strided_slice %91 {offsets = [0, 0, 0, 0, 0, 0], sizes = [1, 4, 1, 4, 2, 32], strides = [1, 1, 1, 1, 1, 1]} : vector<1x4x2x4x2x32xf32> to vector<1x4x1x4x2x32xf32>
    %93 = vector.shape_cast %92 : vector<1x4x1x4x2x32xf32> to vector<1x4x4x2x32xf32>
    %94 = vector.extract_strided_slice %91 {offsets = [0, 0, 1, 0, 0, 0], sizes = [1, 4, 1, 4, 2, 32], strides = [1, 1, 1, 1, 1, 1]} : vector<1x4x2x4x2x32xf32> to vector<1x4x1x4x2x32xf32>
    %95 = vector.shape_cast %94 : vector<1x4x1x4x2x32xf32> to vector<1x4x4x2x32xf32>
    %96 = arith.maximumf %93, %95 : vector<1x4x4x2x32xf32>
    %97 = vector.extract_strided_slice %96 {offsets = [0, 0, 0, 0, 0], sizes = [1, 4, 4, 1, 32], strides = [1, 1, 1, 1, 1]} : vector<1x4x4x2x32xf32> to vector<1x4x4x1x32xf32>
    %98 = vector.shape_cast %97 : vector<1x4x4x1x32xf32> to vector<1x4x4x32xf32>
    %99 = vector.extract_strided_slice %96 {offsets = [0, 0, 0, 1, 0], sizes = [1, 4, 4, 1, 32], strides = [1, 1, 1, 1, 1]} : vector<1x4x4x2x32xf32> to vector<1x4x4x1x32xf32>
    %100 = vector.shape_cast %99 : vector<1x4x4x1x32xf32> to vector<1x4x4x32xf32>
    %101 = arith.maximumf %98, %100 : vector<1x4x4x32xf32>
    %c0_162 = arith.constant 0 : index
    %c1_163 = arith.constant 1 : index
    %c1_164 = arith.constant 1 : index
    %c0_165 = arith.constant 0 : index
    %102 = vector.load %arg15[%c0_162, %c1_163, %c1_164, %c0_165] : memref<1x6x6x32xf32, #tpu.memory_space<vmem>>, vector<1x4x4x32xf32>
    tpu.vector_store %arg15[%c0_162, %c1_163, %c1_164, %c0_165], %101 {strides = array<i32>} : memref<1x6x6x32xf32, #tpu.memory_space<vmem>>, vector<1x4x4x32xf32>,
    %c0_166 = arith.constant 0 : index
    %c0_167 = arith.constant 0 : index
    %c0_168 = arith.constant 0 : index
    %c0_169 = arith.constant 0 : index
    %103 = vector.load %arg15[%c0_166, %c0_167, %c0_168, %c0_169] : memref<1x6x6x32xf32, #tpu.memory_space<vmem>>, vector<1x4x4x32xf32>
    %104 = arith.truncf %103 : vector<1x4x4x32xf32> to vector<1x4x4x32xbf16>
    %c0_170 = arith.constant 0 : index
    %c0_171 = arith.constant 0 : index
    %c0_172 = arith.constant 0 : index
    %c0_173 = arith.constant 0 : index
    %105 = vector.load %arg18[%c0_170, %c0_171, %c0_172, %c0_173] : memref<1x4x4x288xbf16, #tpu.memory_space<vmem>>, vector<1x4x4x32xbf16>
    tpu.vector_store %arg18[%c0_170, %c0_171, %c0_172, %c0_173], %104 {strides = array<i32>} : memref<1x4x4x288xbf16, #tpu.memory_space<vmem>>, vector<1x4x4x32xbf16>,
    %c0_174 = arith.constant 0 : index
    %c0_175 = arith.constant 0 : index
    %c1_176 = arith.constant 1 : index
    %c0_177 = arith.constant 0 : index
    %106 = vector.load %arg15[%c0_174, %c0_175, %c1_176, %c0_177] : memref<1x6x6x32xf32, #tpu.memory_space<vmem>>, vector<1x4x4x32xf32>
    %107 = arith.truncf %106 : vector<1x4x4x32xf32> to vector<1x4x4x32xbf16>
    %c0_178 = arith.constant 0 : index
    %c0_179 = arith.constant 0 : index
    %c0_180 = arith.constant 0 : index
    %c32_181 = arith.constant 32 : index
    %108 = vector.load %arg18[%c0_178, %c0_179, %c0_180, %c32_181] : memref<1x4x4x288xbf16, #tpu.memory_space<vmem>>, vector<1x4x4x32xbf16>
    tpu.vector_store %arg18[%c0_178, %c0_179, %c0_180, %c32_181], %107 {strides = array<i32>} : memref<1x4x4x288xbf16, #tpu.memory_space<vmem>>, vector<1x4x4x32xbf16>,
    %c0_182 = arith.constant 0 : index
    %c0_183 = arith.constant 0 : index
    %c2_184 = arith.constant 2 : index
    %c0_185 = arith.constant 0 : index
    %109 = vector.load %arg15[%c0_182, %c0_183, %c2_184, %c0_185] : memref<1x6x6x32xf32, #tpu.memory_space<vmem>>, vector<1x4x4x32xf32>
    %110 = arith.truncf %109 : vector<1x4x4x32xf32> to vector<1x4x4x32xbf16>
    %c0_186 = arith.constant 0 : index
    %c0_187 = arith.constant 0 : index
    %c0_188 = arith.constant 0 : index
    %c64_189 = arith.constant 64 : index
    %111 = vector.load %arg18[%c0_186, %c0_187, %c0_188, %c64_189] : memref<1x4x4x288xbf16, #tpu.memory_space<vmem>>, vector<1x4x4x32xbf16>
    tpu.vector_store %arg18[%c0_186, %c0_187, %c0_188, %c64_189], %110 {strides = array<i32>} : memref<1x4x4x288xbf16, #tpu.memory_space<vmem>>, vector<1x4x4x32xbf16>,
    %c0_190 = arith.constant 0 : index
    %c1_191 = arith.constant 1 : index
    %c0_192 = arith.constant 0 : index
    %c0_193 = arith.constant 0 : index
    %112 = vector.load %arg15[%c0_190, %c1_191, %c0_192, %c0_193] : memref<1x6x6x32xf32, #tpu.memory_space<vmem>>, vector<1x4x4x32xf32>
    %113 = arith.truncf %112 : vector<1x4x4x32xf32> to vector<1x4x4x32xbf16>
    %c0_194 = arith.constant 0 : index
    %c0_195 = arith.constant 0 : index
    %c0_196 = arith.constant 0 : index
    %c96_197 = arith.constant 96 : index
    %114 = vector.load %arg18[%c0_194, %c0_195, %c0_196, %c96_197] : memref<1x4x4x288xbf16, #tpu.memory_space<vmem>>, vector<1x4x4x32xbf16>
    tpu.vector_store %arg18[%c0_194, %c0_195, %c0_196, %c96_197], %113 {strides = array<i32>} : memref<1x4x4x288xbf16, #tpu.memory_space<vmem>>, vector<1x4x4x32xbf16>,
    %c0_198 = arith.constant 0 : index
    %c1_199 = arith.constant 1 : index
    %c1_200 = arith.constant 1 : index
    %c0_201 = arith.constant 0 : index
    %115 = vector.load %arg15[%c0_198, %c1_199, %c1_200, %c0_201] : memref<1x6x6x32xf32, #tpu.memory_space<vmem>>, vector<1x4x4x32xf32>
    %116 = arith.truncf %115 : vector<1x4x4x32xf32> to vector<1x4x4x32xbf16>
    %c0_202 = arith.constant 0 : index
    %c0_203 = arith.constant 0 : index
    %c0_204 = arith.constant 0 : index
    %c128_205 = arith.constant 128 : index
    %117 = vector.load %arg18[%c0_202, %c0_203, %c0_204, %c128_205] : memref<1x4x4x288xbf16, #tpu.memory_space<vmem>>, vector<1x4x4x32xbf16>
    tpu.vector_store %arg18[%c0_202, %c0_203, %c0_204, %c128_205], %116 {strides = array<i32>} : memref<1x4x4x288xbf16, #tpu.memory_space<vmem>>, vector<1x4x4x32xbf16>,
    %c0_206 = arith.constant 0 : index
    %c1_207 = arith.constant 1 : index
    %c2_208 = arith.constant 2 : index
    %c0_209 = arith.constant 0 : index
    %118 = vector.load %arg15[%c0_206, %c1_207, %c2_208, %c0_209] : memref<1x6x6x32xf32, #tpu.memory_space<vmem>>, vector<1x4x4x32xf32>
    %119 = arith.truncf %118 : vector<1x4x4x32xf32> to vector<1x4x4x32xbf16>
    %c0_210 = arith.constant 0 : index
    %c0_211 = arith.constant 0 : index
    %c0_212 = arith.constant 0 : index
    %c160 = arith.constant 160 : index
    %120 = vector.load %arg18[%c0_210, %c0_211, %c0_212, %c160] : memref<1x4x4x288xbf16, #tpu.memory_space<vmem>>, vector<1x4x4x32xbf16>
    tpu.vector_store %arg18[%c0_210, %c0_211, %c0_212, %c160], %119 {strides = array<i32>} : memref<1x4x4x288xbf16, #tpu.memory_space<vmem>>, vector<1x4x4x32xbf16>,
    %c0_213 = arith.constant 0 : index
    %c2_214 = arith.constant 2 : index
    %c0_215 = arith.constant 0 : index
    %c0_216 = arith.constant 0 : index
    %121 = vector.load %arg15[%c0_213, %c2_214, %c0_215, %c0_216] : memref<1x6x6x32xf32, #tpu.memory_space<vmem>>, vector<1x4x4x32xf32>
    %122 = arith.truncf %121 : vector<1x4x4x32xf32> to vector<1x4x4x32xbf16>
    %c0_217 = arith.constant 0 : index
    %c0_218 = arith.constant 0 : index
    %c0_219 = arith.constant 0 : index
    %c192 = arith.constant 192 : index
    %123 = vector.load %arg18[%c0_217, %c0_218, %c0_219, %c192] : memref<1x4x4x288xbf16, #tpu.memory_space<vmem>>, vector<1x4x4x32xbf16>
    tpu.vector_store %arg18[%c0_217, %c0_218, %c0_219, %c192], %122 {strides = array<i32>} : memref<1x4x4x288xbf16, #tpu.memory_space<vmem>>, vector<1x4x4x32xbf16>,
    %c0_220 = arith.constant 0 : index
    %c2_221 = arith.constant 2 : index
    %c1_222 = arith.constant 1 : index
    %c0_223 = arith.constant 0 : index
    %124 = vector.load %arg15[%c0_220, %c2_221, %c1_222, %c0_223] : memref<1x6x6x32xf32, #tpu.memory_space<vmem>>, vector<1x4x4x32xf32>
    %125 = arith.truncf %124 : vector<1x4x4x32xf32> to vector<1x4x4x32xbf16>
    %c0_224 = arith.constant 0 : index
    %c0_225 = arith.constant 0 : index
    %c0_226 = arith.constant 0 : index
    %c224 = arith.constant 224 : index
    %126 = vector.load %arg18[%c0_224, %c0_225, %c0_226, %c224] : memref<1x4x4x288xbf16, #tpu.memory_space<vmem>>, vector<1x4x4x32xbf16>
    tpu.vector_store %arg18[%c0_224, %c0_225, %c0_226, %c224], %125 {strides = array<i32>} : memref<1x4x4x288xbf16, #tpu.memory_space<vmem>>, vector<1x4x4x32xbf16>,
    %c0_227 = arith.constant 0 : index
    %c2_228 = arith.constant 2 : index
    %c2_229 = arith.constant 2 : index
    %c0_230 = arith.constant 0 : index
    %127 = vector.load %arg15[%c0_227, %c2_228, %c2_229, %c0_230] : memref<1x6x6x32xf32, #tpu.memory_space<vmem>>, vector<1x4x4x32xf32>
    %128 = arith.truncf %127 : vector<1x4x4x32xf32> to vector<1x4x4x32xbf16>
    %c0_231 = arith.constant 0 : index
    %c0_232 = arith.constant 0 : index
    %c0_233 = arith.constant 0 : index
    %c256 = arith.constant 256 : index
    %129 = vector.load %arg18[%c0_231, %c0_232, %c0_233, %c256] : memref<1x4x4x288xbf16, #tpu.memory_space<vmem>>, vector<1x4x4x32xbf16>
    tpu.vector_store %arg18[%c0_231, %c0_232, %c0_233, %c256], %128 {strides = array<i32>} : memref<1x4x4x288xbf16, #tpu.memory_space<vmem>>, vector<1x4x4x32xbf16>,
    %c0_234 = arith.constant 0 : index
    %c0_235 = arith.constant 0 : index
    %c0_236 = arith.constant 0 : index
    %c0_237 = arith.constant 0 : index
    %130 = vector.load %arg18[%c0_234, %c0_235, %c0_236, %c0_237] : memref<1x4x4x288xbf16, #tpu.memory_space<vmem>>, vector<1x4x4x288xbf16>
    %131 = vector.shape_cast %130 : vector<1x4x4x288xbf16> to vector<16x288xbf16>
    %c0_238 = arith.constant 0 : index
    %c0_239 = arith.constant 0 : index
    %132 = vector.load %arg6[%c0_238, %c0_239] : memref<288x64xbf16, #tpu.memory_space<vmem>>, vector<288x64xbf16>
    %cst_240 = arith.constant dense<0.000000e+00> : vector<16x64xf32>
    %133 = tpu.matmul %131, %132, %cst_240 {dimension_numbers = #tpu.dot_dimension_numbers<[1], [0], [0], [1], [0, 0, 1, 1], [], []>} : vector<16x288xbf16>, vector<288x64xbf16>, vector<16x64xf32> -> vector<16x64xf32>
    %c0_241 = arith.constant 0 : index
    %c0_242 = arith.constant 0 : index
    %134 = vector.load %arg7[%c0_241, %c0_242] : memref<1x64xf32, #tpu.memory_space<vmem>>, vector<1x64xf32>
    %135 = vector.broadcast %134 : vector<1x64xf32> to vector<16x64xf32>
    %136 = arith.addf %133, %135 : vector<16x64xf32>
    %cst_243 = arith.constant 0.000000e+00 : f32
    %137 = vector.broadcast %cst_243 : f32 to vector<16x64xf32>
    %138 = arith.maximumf %136, %137 : vector<16x64xf32>
    %139 = vector.shape_cast %138 : vector<16x64xf32> to vector<1x2x2x2x2x64xf32>
    %140 = vector.extract_strided_slice %139 {offsets = [0, 0, 0, 0, 0, 0], sizes = [1, 2, 1, 2, 2, 64], strides = [1, 1, 1, 1, 1, 1]} : vector<1x2x2x2x2x64xf32> to vector<1x2x1x2x2x64xf32>
    %141 = vector.shape_cast %140 : vector<1x2x1x2x2x64xf32> to vector<1x2x2x2x64xf32>
    %142 = vector.extract_strided_slice %139 {offsets = [0, 0, 1, 0, 0, 0], sizes = [1, 2, 1, 2, 2, 64], strides = [1, 1, 1, 1, 1, 1]} : vector<1x2x2x2x2x64xf32> to vector<1x2x1x2x2x64xf32>
    %143 = vector.shape_cast %142 : vector<1x2x1x2x2x64xf32> to vector<1x2x2x2x64xf32>
    %144 = arith.maximumf %141, %143 : vector<1x2x2x2x64xf32>
    %145 = vector.extract_strided_slice %144 {offsets = [0, 0, 0, 0, 0], sizes = [1, 2, 2, 1, 64], strides = [1, 1, 1, 1, 1]} : vector<1x2x2x2x64xf32> to vector<1x2x2x1x64xf32>
    %146 = vector.shape_cast %145 : vector<1x2x2x1x64xf32> to vector<1x2x2x64xf32>
    %147 = vector.extract_strided_slice %144 {offsets = [0, 0, 0, 1, 0], sizes = [1, 2, 2, 1, 64], strides = [1, 1, 1, 1, 1]} : vector<1x2x2x2x64xf32> to vector<1x2x2x1x64xf32>
    %148 = vector.shape_cast %147 : vector<1x2x2x1x64xf32> to vector<1x2x2x64xf32>
    %149 = arith.maximumf %146, %148 : vector<1x2x2x64xf32>
    %150 = vector.extract_strided_slice %149 {offsets = [0, 0, 0, 0], sizes = [1, 1, 1, 64], strides = [1, 1, 1, 1]} : vector<1x2x2x64xf32> to vector<1x1x1x64xf32>
    %151 = vector.shape_cast %150 : vector<1x1x1x64xf32> to vector<1x64xf32>
    %152 = arith.truncf %151 : vector<1x64xf32> to vector<1x64xbf16>
    %c0_244 = arith.constant 0 : index
    %c0_245 = arith.constant 0 : index
    %153 = vector.load %arg19[%c0_244, %c0_245] : memref<1x256xbf16, #tpu.memory_space<vmem>>, vector<1x64xbf16>
    tpu.vector_store %arg19[%c0_244, %c0_245], %152 {strides = array<i32>} : memref<1x256xbf16, #tpu.memory_space<vmem>>, vector<1x64xbf16>,
    %154 = vector.extract_strided_slice %149 {offsets = [0, 0, 1, 0], sizes = [1, 1, 1, 64], strides = [1, 1, 1, 1]} : vector<1x2x2x64xf32> to vector<1x1x1x64xf32>
    %155 = vector.shape_cast %154 : vector<1x1x1x64xf32> to vector<1x64xf32>
    %156 = arith.truncf %155 : vector<1x64xf32> to vector<1x64xbf16>
    %c0_246 = arith.constant 0 : index
    %c64_247 = arith.constant 64 : index
    %157 = vector.load %arg19[%c0_246, %c64_247] : memref<1x256xbf16, #tpu.memory_space<vmem>>, vector<1x64xbf16>
    tpu.vector_store %arg19[%c0_246, %c64_247], %156 {strides = array<i32>} : memref<1x256xbf16, #tpu.memory_space<vmem>>, vector<1x64xbf16>,
    %158 = vector.extract_strided_slice %149 {offsets = [0, 1, 0, 0], sizes = [1, 1, 1, 64], strides = [1, 1, 1, 1]} : vector<1x2x2x64xf32> to vector<1x1x1x64xf32>
    %159 = vector.shape_cast %158 : vector<1x1x1x64xf32> to vector<1x64xf32>
    %160 = arith.truncf %159 : vector<1x64xf32> to vector<1x64xbf16>
    %c0_248 = arith.constant 0 : index
    %c128_249 = arith.constant 128 : index
    %161 = vector.load %arg19[%c0_248, %c128_249] : memref<1x256xbf16, #tpu.memory_space<vmem>>, vector<1x64xbf16>
    tpu.vector_store %arg19[%c0_248, %c128_249], %160 {strides = array<i32>} : memref<1x256xbf16, #tpu.memory_space<vmem>>, vector<1x64xbf16>,
    %162 = vector.extract_strided_slice %149 {offsets = [0, 1, 1, 0], sizes = [1, 1, 1, 64], strides = [1, 1, 1, 1]} : vector<1x2x2x64xf32> to vector<1x1x1x64xf32>
    %163 = vector.shape_cast %162 : vector<1x1x1x64xf32> to vector<1x64xf32>
    %164 = arith.truncf %163 : vector<1x64xf32> to vector<1x64xbf16>
    %c0_250 = arith.constant 0 : index
    %c192_251 = arith.constant 192 : index
    %165 = vector.load %arg19[%c0_250, %c192_251] : memref<1x256xbf16, #tpu.memory_space<vmem>>, vector<1x64xbf16>
    tpu.vector_store %arg19[%c0_250, %c192_251], %164 {strides = array<i32>} : memref<1x256xbf16, #tpu.memory_space<vmem>>, vector<1x64xbf16>,
    %c0_252 = arith.constant 0 : index
    %c0_253 = arith.constant 0 : index
    %166 = vector.load %arg19[%c0_252, %c0_253] : memref<1x256xbf16, #tpu.memory_space<vmem>>, vector<1x256xbf16>
    %c0_254 = arith.constant 0 : index
    %c0_255 = arith.constant 0 : index
    %167 = vector.load %arg8[%c0_254, %c0_255] : memref<256x128xbf16, #tpu.memory_space<vmem>>, vector<256x128xbf16>
    %cst_256 = arith.constant dense<0.000000e+00> : vector<1x128xf32>
    %168 = tpu.matmul %166, %167, %cst_256 {dimension_numbers = #tpu.dot_dimension_numbers<[1], [0], [0], [1], [0, 0, 1, 1], [], []>} : vector<1x256xbf16>, vector<256x128xbf16>, vector<1x128xf32> -> vector<1x128xf32>
    %c0_257 = arith.constant 0 : index
    %c0_258 = arith.constant 0 : index
    %169 = vector.load %arg9[%c0_257, %c0_258] : memref<1x128xf32, #tpu.memory_space<vmem>>, vector<1x128xf32>
    %170 = arith.addf %168, %169 : vector<1x128xf32>
    %cst_259 = arith.constant 0.000000e+00 : f32
    %171 = vector.broadcast %cst_259 : f32 to vector<1x128xf32>
    %172 = arith.maximumf %170, %171 : vector<1x128xf32>
    %173 = arith.truncf %172 : vector<1x128xf32> to vector<1x128xbf16>
    %c0_260 = arith.constant 0 : index
    %c0_261 = arith.constant 0 : index
    %174 = vector.load %arg10[%c0_260, %c0_261] : memref<128x128xbf16, #tpu.memory_space<vmem>>, vector<128x128xbf16>
    %cst_262 = arith.constant dense<0.000000e+00> : vector<1x128xf32>
    %175 = tpu.matmul %173, %174, %cst_262 {dimension_numbers = #tpu.dot_dimension_numbers<[1], [0], [0], [1], [0, 0, 1, 1], [], []>} : vector<1x128xbf16>, vector<128x128xbf16>, vector<1x128xf32> -> vector<1x128xf32>
    %c0_263 = arith.constant 0 : index
    %c0_264 = arith.constant 0 : index
    %176 = vector.load %arg11[%c0_263, %c0_264] : memref<1x128xf32, #tpu.memory_space<vmem>>, vector<1x128xf32>
    %177 = arith.addf %175, %176 : vector<1x128xf32>
    %c0_265 = arith.constant 0 : index
    %c0_266 = arith.constant 0 : index
    %c0_267 = arith.constant 0 : index
    %178 = vector.load %arg12[%c0_265, %c0_266, %c0_267] : memref<1x1x128xf32, #tpu.memory_space<vmem>>, vector<1x1x128xf32>
    %179 = vector.shape_cast %178 : vector<1x1x128xf32> to vector<1x128xf32>
    %180 = vector.shape_cast %177 : vector<1x128xf32> to vector<1x1x128xf32>
    tpu.vector_store %arg12[%c0_265, %c0_266, %c0_267], %180 {strides = array<i32>} : memref<1x1x128xf32, #tpu.memory_space<vmem>>, vector<1x1x128xf32>,
    return
  }
  func.func @transform_0(%arg0: i32) -> (i32, i32, i32, i32, i32) {
    %c0_i32 = arith.constant 0 : i32
    %c0_i32_0 = arith.constant 0 : i32
    %c0_i32_1 = arith.constant 0 : i32
    %c0_i32_2 = arith.constant 0 : i32
    %c0_i32_3 = arith.constant 0 : i32
    return %arg0, %c0_i32, %c0_i32_0, %c0_i32_1, %c0_i32_2 : i32, i32, i32, i32, i32
  }
  func.func @transform_1(%arg0: i32) -> (i32, i32) {
    %c0_i32 = arith.constant 0 : i32
    %c0_i32_0 = arith.constant 0 : i32
    %c0_i32_1 = arith.constant 0 : i32
    return %c0_i32, %c0_i32_0 : i32, i32
  }
  func.func @transform_2(%arg0: i32) -> (i32, i32) {
    %c0_i32 = arith.constant 0 : i32
    %c0_i32_0 = arith.constant 0 : i32
    %c0_i32_1 = arith.constant 0 : i32
    return %c0_i32, %c0_i32_0 : i32, i32
  }
  func.func @transform_3(%arg0: i32) -> (i32, i32) {
    %c0_i32 = arith.constant 0 : i32
    %c0_i32_0 = arith.constant 0 : i32
    %c0_i32_1 = arith.constant 0 : i32
    return %c0_i32, %c0_i32_0 : i32, i32
  }
  func.func @transform_4(%arg0: i32) -> (i32, i32) {
    %c0_i32 = arith.constant 0 : i32
    %c0_i32_0 = arith.constant 0 : i32
    %c0_i32_1 = arith.constant 0 : i32
    return %c0_i32, %c0_i32_0 : i32, i32
  }
  func.func @transform_5(%arg0: i32) -> (i32, i32) {
    %c0_i32 = arith.constant 0 : i32
    %c0_i32_0 = arith.constant 0 : i32
    %c0_i32_1 = arith.constant 0 : i32
    return %c0_i32, %c0_i32_0 : i32, i32
  }
  func.func @transform_6(%arg0: i32) -> (i32, i32) {
    %c0_i32 = arith.constant 0 : i32
    %c0_i32_0 = arith.constant 0 : i32
    %c0_i32_1 = arith.constant 0 : i32
    return %c0_i32, %c0_i32_0 : i32, i32
  }
  func.func @transform_7(%arg0: i32) -> (i32, i32) {
    %c0_i32 = arith.constant 0 : i32
    %c0_i32_0 = arith.constant 0 : i32
    %c0_i32_1 = arith.constant 0 : i32
    return %c0_i32, %c0_i32_0 : i32, i32
  }
  func.func @transform_8(%arg0: i32) -> (i32, i32) {
    %c0_i32 = arith.constant 0 : i32
    %c0_i32_0 = arith.constant 0 : i32
    %c0_i32_1 = arith.constant 0 : i32
    return %c0_i32, %c0_i32_0 : i32, i32
  }
  func.func @transform_9(%arg0: i32) -> (i32, i32) {
    %c0_i32 = arith.constant 0 : i32
    %c0_i32_0 = arith.constant 0 : i32
    %c0_i32_1 = arith.constant 0 : i32
    return %c0_i32, %c0_i32_0 : i32, i32
  }
  func.func @transform_10(%arg0: i32) -> (i32, i32) {
    %c0_i32 = arith.constant 0 : i32
    %c0_i32_0 = arith.constant 0 : i32
    %c0_i32_1 = arith.constant 0 : i32
    return %c0_i32, %c0_i32_0 : i32, i32
  }
  func.func @transform_11(%arg0: i32) -> (i32, i32, i32) {
    %c0_i32 = arith.constant 0 : i32
    %c0_i32_0 = arith.constant 0 : i32
    %c0_i32_1 = arith.constant 0 : i32
    return %arg0, %c0_i32, %c0_i32_0 : i32, i32, i32
  }
}

</mosaic_0001>

<bundles_post_ra>
// kernel: simple_classifier_forward.1
= control target key start
LH: loop header
LB: loop body
LE: loop exit
PB: predicated region body
PF: predicated region fallthrough
CT: control target
= control target key end

     0   :  { %s10398_s0 = inlined_call_operand.vmem [shape: bf16[2,1,16,16,8], index: 0, kind: input, shape index: {}]   ;;  %s10399_s1 = inlined_call_operand.vmem [shape: bf16[72,16], index: 1, kind: input, shape index: {}]   ;;  %s10400_s2 = inlined_call_operand.vmem [shape: f32[1,16], index: 2, kind: input, shape index: {}]   ;;  %s10401_s3 = inlined_call_operand.vmem [shape: bf16[144,32], index: 3, kind: input, shape index: {}]   ;;  %s10402_s4 = inlined_call_operand.vmem [shape: f32[1,32], index: 4, kind: input, shape index: {}]   ;;  %s10403_s5 = inlined_call_operand.vmem [shape: bf16[288,64], index: 5, kind: input, shape index: {}]   ;;  %s10404_s6 = inlined_call_operand.vmem [shape: f32[1,64], index: 6, kind: input, shape index: {}]   ;;  %s10405_s7 = inlined_call_operand.vmem [shape: bf16[256,128], index: 7, kind: input, shape index: {}]   ;;  %s10406_s8 = inlined_call_operand.vmem [shape: f32[1,128], index: 8, kind: input, shape index: {}]   ;;  %s10407_s9 = inlined_call_operand.vmem [shape: bf16[128,128], index: 9, kind: input, shape index: {}]   ;;  %s10408_s10 = inlined_call_operand.vmem [shape: f32[1,128], index: 10, kind: input, shape index: {}]   ;;  %s10409_s11 = inlined_call_operand.hbm [shape: f32[2,1,128], index: 11, kind: output, shape index: {}]  }
   0x1   :  { %10433 = sst [smem:[#allocation12_spill]] %s10398_s0 }
   0x2   :  { %10434 = sst [smem:[#allocation13_spill]] %s10399_s1 }
   0x3   :  { %16 = vsyncpa [#allocation10], 0 }
   0x4   :  { %18 = vsyncpa [#allocation10 + $0x1], 0  ;;  %s8414_s17 = smov 0   ;;  %s8416_s18 = smov 0  }
   0x5   :  { %s8418_s19 = smov 0   ;;  %s8420_s20 = smov 0  }
   0x6 LB: > { %s8435_s21 = sadd.s32 4294967295, %s8334_s20   ;;  %s7012_s22 = sadd.s32 4294967294, %s8334_s20   ;;  %s8334_s20 = sphi %s8420_s20, %s10486_s20   ;;  %s8330_s19 = sphi %s8418_s19, %s10485_s19   ;;  %s8326_s18 = sphi %s8416_s18, %s10484_s18   ;;  %s8322_s17 = sphi %s8414_s17, %s10483_s17  }
   0x7   : > { %s8439_s23 = sadd.s32 1, %s8334_s20   ;;  %s267_s24 = sadd.s32 1, %s8330_s19 }
   0x8   : > { %s264_s25 = ssub.s32 %s8334_s20, %s8439_s23  ;;  %p277_p0 = scmp.ne.s32.totalorder %s8330_s19, %s8326_s18 }
   0x9   : > { %p265_p1 = scmp.eq.s32.totalorder %s264_s25, 0  ;;  %p278_p2 = scmp.eq.s32.totalorder %s8435_s21, 1 }
   0xa   : > { %p283_p3 = scmp.ne.s32.totalorder %s8326_s18, %s8322_s17  ;;  %p284_p4 = scmp.eq.s32.totalorder %s7012_s22, 1 }
   0xb   : > { %s8450_s26 = scalar_select %p265_p1, %s8330_s19, %s267_s24  }
   0xc   : > { %p8452_p5 = por %p278_p2, %p277_p0  ;;  %p8456_p6 = por %p284_p4, %p283_p3 }
   0xd   : > { %p7015_p7 = scmp.ge.s32.totalorder %s8334_s20, 1  ;;  %p340_p8 = scmp.lt.s32.totalorder %s8334_s20, 3 }
   0xf   : > { %p341_p9 = pnand %p7015_p7, %p340_p8 }
  0x10   : > { %s10410_s29 = sand.u32 (!%p341_p9), 1, %s8326_s18   ;;  %p379_p10 = scmp.lt.s32.totalorder (!%p341_p9), %s8435_s21, 1 }
  0x11   : > { %344 = sbr.rel (%p341_p9) target bundleno = 2211 (0x8a3), region = 64  ;;  %s10437_s0 = sld [smem:[#allocation12_spill]] (!%p341_p9) }
  0x12   : > { %s8472_s16 = scalar_lea.vmem (!%p341_p9), [#allocation9], %s10410_s29  ;;  %p7018_p11 = scmp.ne.s32.totalorder (!%p341_p9), %s8435_s21, 0 }
  0x16   : > { %s380_s30 = scalar_select %p379_p10, %s8435_s21, 1 }
  0x17   : > { %388 = sbr.rel (%p7018_p11) target bundleno = 69 (0x45), region = 68 }
  0x18   : > { %s7555_s12 = sshll.u32 %s380_s30, 7 }
  0x19   : > { %s8468_s15 = scalar_lea.vmem %s10437_s0, %s7555_s12 }
  0x1c   : > { %vm389_vm0 = vcmask 64512   ;;  %vm392_vm1 = vcmask 58368   ;;  %vm445_vm2 = vcmask 130048   ;;  %v8336_v0 = vmov 0.0  }
  0x1d   : > { %390 = vst.msk [vmem:[#allocation2] sm:$0xff] %vm389_vm0, %v8336_v0  ;;  %391 = vst.msk [vmem:[#allocation2 + $0x8] sm:$0xff] %vm389_vm0, %v8336_v0  ;;  %vm447_vm3 = vcmask 123904   ;;  %vm467_vm4 = vcmask 259072  }
  0x1e   : > { %394 = vst.msk [vmem:[#allocation2 + $0x18] sm:$0xff] %vm389_vm0, %v8336_v0  ;;  %395 = vst.msk [vmem:[#allocation2 + $0x20] sm:$0xff] %vm389_vm0, %v8336_v0 }
  0x1f   : > { %397 = vst.msk [vmem:[#allocation2 + $0x30] sm:$0xff] %vm389_vm0, %v8336_v0  ;;  %398 = vst.msk [vmem:[#allocation2 + $0x38] sm:$0xff] %vm389_vm0, %v8336_v0 }
  0x20   : > { %400 = vst.msk [vmem:[#allocation2 + $0x48] sm:$0xff] %vm389_vm0, %v8336_v0  ;;  %401 = vst.msk [vmem:[#allocation2 + $0x50] sm:$0xff] %vm389_vm0, %v8336_v0 }
  0x21   : > { %403 = vst.msk [vmem:[#allocation2 + $0x60] sm:$0xff] %vm389_vm0, %v8336_v0  ;;  %404 = vst.msk [vmem:[#allocation2 + $0x68] sm:$0xff] %vm389_vm0, %v8336_v0 }
  0x22   : > { %406 = vst.msk [vmem:[#allocation2 + $0x78] sm:$0xff] %vm389_vm0, %v8336_v0  ;;  %407 = vst.msk [vmem:[#allocation2 + $0x80] sm:$0xff] %vm389_vm0, %v8336_v0 }
  0x23   : > { %409 = vst.msk [vmem:[#allocation2 + $0x90] sm:$0xff] %vm389_vm0, %v8336_v0  ;;  %410 = vst.msk [vmem:[#allocation2 + $0x98] sm:$0xff] %vm389_vm0, %v8336_v0 }
  0x24   : > { %412 = vst.msk [vmem:[#allocation2 + $0xa8] sm:$0xff] %vm389_vm0, %v8336_v0  ;;  %413 = vst.msk [vmem:[#allocation2 + $0xb0] sm:$0xff] %vm389_vm0, %v8336_v0 }
  0x25   : > { %415 = vst.msk [vmem:[#allocation2 + $0xc0] sm:$0xff] %vm389_vm0, %v8336_v0  ;;  %416 = vst.msk [vmem:[#allocation2 + $0xc8] sm:$0xff] %vm389_vm0, %v8336_v0 }
  0x26   : > { %418 = vst.msk [vmem:[#allocation2 + $0xd8] sm:$0xff] %vm389_vm0, %v8336_v0  ;;  %419 = vst.msk [vmem:[#allocation2 + $0xe0] sm:$0xff] %vm389_vm0, %v8336_v0 }
  0x27   : > { %421 = vst.msk [vmem:[#allocation2 + $0xf0] sm:$0xff] %vm389_vm0, %v8336_v0  ;;  %422 = vst.msk [vmem:[#allocation2 + $0xf8] sm:$0xff] %vm389_vm0, %v8336_v0 }
  0x28   : > { %424 = vst.msk [vmem:[#allocation2 + $0x108] sm:$0xff] %vm389_vm0, %v8336_v0  ;;  %425 = vst.msk [vmem:[#allocation2 + $0x110] sm:$0xff] %vm389_vm0, %v8336_v0 }
  0x29   : > { %427 = vst.msk [vmem:[#allocation2 + $0x120] sm:$0xff] %vm389_vm0, %v8336_v0  ;;  %428 = vst.msk [vmem:[#allocation2 + $0x128] sm:$0xff] %vm389_vm0, %v8336_v0 }
  0x2a   : > { %430 = vst.msk [vmem:[#allocation2 + $0x138] sm:$0xff] %vm389_vm0, %v8336_v0  ;;  %431 = vst.msk [vmem:[#allocation2 + $0x140] sm:$0xff] %vm389_vm0, %v8336_v0 }
  0x2b   : > { %433 = vst.msk [vmem:[#allocation2 + $0x150] sm:$0xff] %vm389_vm0, %v8336_v0  ;;  %434 = vst.msk [vmem:[#allocation2 + $0x158] sm:$0xff] %vm389_vm0, %v8336_v0 }
  0x2c   : > { %436 = vst.msk [vmem:[#allocation2 + $0x168] sm:$0xff] %vm389_vm0, %v8336_v0  ;;  %437 = vst.msk [vmem:[#allocation2 + $0x170] sm:$0xff] %vm389_vm0, %v8336_v0 }
  0x2d   : > { %439 = vst.msk [vmem:[#allocation2 + $0x180] sm:$0xff] %vm389_vm0, %v8336_v0  ;;  %440 = vst.msk [vmem:[#allocation2 + $0x188] sm:$0xff] %vm389_vm0, %v8336_v0 }
  0x2e   : > { %442 = vst.msk [vmem:[#allocation2 + $0x198] sm:$0xff] %vm389_vm0, %v8336_v0  ;;  %443 = vst.msk [vmem:[#allocation2 + $0x1a0] sm:$0xff] %vm389_vm0, %v8336_v0 }
  0x2f   : > { %393 = vst.msk [vmem:[#allocation2 + $0x10] sm:$0x3] %vm392_vm1, %v8336_v0  ;;  %396 = vst.msk [vmem:[#allocation2 + $0x28] sm:$0x3] %vm392_vm1, %v8336_v0 }
  0x30   : > { %399 = vst.msk [vmem:[#allocation2 + $0x40] sm:$0x3] %vm392_vm1, %v8336_v0  ;;  %402 = vst.msk [vmem:[#allocation2 + $0x58] sm:$0x3] %vm392_vm1, %v8336_v0 }
  0x31   : > { %405 = vst.msk [vmem:[#allocation2 + $0x70] sm:$0x3] %vm392_vm1, %v8336_v0  ;;  %408 = vst.msk [vmem:[#allocation2 + $0x88] sm:$0x3] %vm392_vm1, %v8336_v0 }
  0x32   : > { %411 = vst.msk [vmem:[#allocation2 + $0xa0] sm:$0x3] %vm392_vm1, %v8336_v0  ;;  %414 = vst.msk [vmem:[#allocation2 + $0xb8] sm:$0x3] %vm392_vm1, %v8336_v0 }
  0x33   : > { %417 = vst.msk [vmem:[#allocation2 + $0xd0] sm:$0x3] %vm392_vm1, %v8336_v0  ;;  %420 = vst.msk [vmem:[#allocation2 + $0xe8] sm:$0x3] %vm392_vm1, %v8336_v0 }
  0x34   : > { %423 = vst.msk [vmem:[#allocation2 + $0x100] sm:$0x3] %vm392_vm1, %v8336_v0  ;;  %426 = vst.msk [vmem:[#allocation2 + $0x118] sm:$0x3] %vm392_vm1, %v8336_v0 }
  0x35   : > { %429 = vst.msk [vmem:[#allocation2 + $0x130] sm:$0x3] %vm392_vm1, %v8336_v0  ;;  %432 = vst.msk [vmem:[#allocation2 + $0x148] sm:$0x3] %vm392_vm1, %v8336_v0 }
  0x36   : > { %435 = vst.msk [vmem:[#allocation2 + $0x160] sm:$0x3] %vm392_vm1, %v8336_v0  ;;  %438 = vst.msk [vmem:[#allocation2 + $0x178] sm:$0x3] %vm392_vm1, %v8336_v0 }
  0x37   : > { %441 = vst.msk [vmem:[#allocation2 + $0x190] sm:$0x3] %vm392_vm1, %v8336_v0  ;;  %444 = vst.msk [vmem:[#allocation2 + $0x1a8] sm:$0x3] %vm392_vm1, %v8336_v0 }
  0x38   : > { %446 = vst.msk [vmem:[#allocation3] sm:$0xff] %vm445_vm2, %v8336_v0  ;;  %449 = vst.msk [vmem:[#allocation3 + $0x10] sm:$0xff] %vm445_vm2, %v8336_v0 }
  0x39   : > { %451 = vst.msk [vmem:[#allocation3 + $0x20] sm:$0xff] %vm445_vm2, %v8336_v0  ;;  %453 = vst.msk [vmem:[#allocation3 + $0x30] sm:$0xff] %vm445_vm2, %v8336_v0 }
  0x3a   : > { %455 = vst.msk [vmem:[#allocation3 + $0x40] sm:$0xff] %vm445_vm2, %v8336_v0  ;;  %457 = vst.msk [vmem:[#allocation3 + $0x50] sm:$0xff] %vm445_vm2, %v8336_v0 }
  0x3b   : > { %459 = vst.msk [vmem:[#allocation3 + $0x60] sm:$0xff] %vm445_vm2, %v8336_v0  ;;  %461 = vst.msk [vmem:[#allocation3 + $0x70] sm:$0xff] %vm445_vm2, %v8336_v0 }
  0x3c   : > { %463 = vst.msk [vmem:[#allocation3 + $0x80] sm:$0xff] %vm445_vm2, %v8336_v0  ;;  %465 = vst.msk [vmem:[#allocation3 + $0x90] sm:$0xff] %vm445_vm2, %v8336_v0 }
  0x3d   : > { %448 = vst.msk [vmem:[#allocation3 + $0x8] sm:$0x3] %vm447_vm3, %v8336_v0  ;;  %450 = vst.msk [vmem:[#allocation3 + $0x18] sm:$0x3] %vm447_vm3, %v8336_v0 }
  0x3e   : > { %452 = vst.msk [vmem:[#allocation3 + $0x28] sm:$0x3] %vm447_vm3, %v8336_v0  ;;  %454 = vst.msk [vmem:[#allocation3 + $0x38] sm:$0x3] %vm447_vm3, %v8336_v0 }
  0x3f   : > { %456 = vst.msk [vmem:[#allocation3 + $0x48] sm:$0x3] %vm447_vm3, %v8336_v0  ;;  %458 = vst.msk [vmem:[#allocation3 + $0x58] sm:$0x3] %vm447_vm3, %v8336_v0 }
  0x40   : > { %460 = vst.msk [vmem:[#allocation3 + $0x68] sm:$0x3] %vm447_vm3, %v8336_v0  ;;  %462 = vst.msk [vmem:[#allocation3 + $0x78] sm:$0x3] %vm447_vm3, %v8336_v0 }
  0x41   : > { %464 = vst.msk [vmem:[#allocation3 + $0x88] sm:$0x3] %vm447_vm3, %v8336_v0  ;;  %466 = vst.msk [vmem:[#allocation3 + $0x98] sm:$0x3] %vm447_vm3, %v8336_v0 }
  0x42   : > { %468 = vst.msk [vmem:[#allocation4] sm:$0x3f] %vm467_vm4, %v8336_v0  ;;  %469 = vst.msk [vmem:[#allocation4 + $0x8] sm:$0x3f] %vm467_vm4, %v8336_v0 }
  0x43   : > { %470 = vst.msk [vmem:[#allocation4 + $0x10] sm:$0x3f] %vm467_vm4, %v8336_v0  ;;  %471 = vst.msk [vmem:[#allocation4 + $0x18] sm:$0x3f] %vm467_vm4, %v8336_v0 }
  0x44   : > { %472 = vst.msk [vmem:[#allocation4 + $0x20] sm:$0x3f] %vm467_vm4, %v8336_v0  ;;  %473 = vst.msk [vmem:[#allocation4 + $0x28] sm:$0x3f] %vm467_vm4, %v8336_v0 }
  0x45 PF: > { %v765_v1 = vld [vmem:[#allocation2 + $0x1] sm:$0xff]  ;;  %v766_v2 = vld [vmem:[#allocation2 + $0x9] sm:$0xff]  ;;  %vm539_vm5 = vcmask 64512   ;;  %v7966_v13 = vld [vmem:[%s8468_s15 + $0x18] sm:$0xff]   ;;  %s8337_s22 = smov 8   ;;  %s10425_s24 = smov 16  }
  0x46   : > { %v1023_v3 = vld [vmem:[#allocation2 + $0xa] sm:$0xff]  ;;  %v7588_v4 = vpack.c.bf16 %v765_v1, %v765_v1  ;;  %v7901_v6 = vld [vmem:[%s8468_s15] sm:$0xff]   ;;  %v7589_v8 = vpack.c.bf16 %v766_v2, %v766_v2  ;;  %v7914_v18 = vunpack.c.l.bf16 %v7966_v13  ;;  %v7915_v22 = vunpack.c.h.bf16 %v7966_v13  ;;  %s10415_s25 = smov 24   ;;  %s10413_s30 = smov 32  }
  0x47   : > { %v7621_v5 = vpack.c.bf16 %v1023_v3, %v1023_v3  ;;  %v7964_v7 = vld [vmem:[%s8468_s15 + $0x8] sm:$0xff]   ;;  %v7902_v9 = vunpack.c.l.bf16 %v7901_v6  ;;  %v7903_v10 = vunpack.c.h.bf16 %v7901_v6  ;;  %v7965_v12 = vld [vmem:[%s8468_s15 + $0x10] sm:$0xff]   ;;  %v7967_v14 = vld [vmem:[%s8468_s15 + $0x20] sm:$0xff]   ;;  %vm732_vm6 = vcmask 60416   ;;  %s10411_s12 = smov 40   ;;  %s10417_s13 = smov 48  }
  0x48   : > { %v7906_v11 = vunpack.c.l.bf16 %v7964_v7  ;;  %893 = vrot.lane.b32.xlu0 %v7588_v4, %s8337_s22  ;;  %v7907_v15 = vunpack.c.h.bf16 %v7964_v7  ;;  %v7910_v16 = vunpack.c.l.bf16 %v7965_v12  ;;  %v7911_v17 = vunpack.c.h.bf16 %v7965_v12  ;;  %v572_v19 = vld [vmem:[#allocation2] sm:$0xff]  ;;  %v573_v20 = vld [vmem:[#allocation2 + $0x8] sm:$0xff]  ;;  %546 = vst.msk [vmem:[#allocation2 + $0x61] sm:$0xff] %vm539_vm5, %v7914_v18  ;;  %547 = vst.msk [vmem:[#allocation2 + $0x69] sm:$0xff] %vm539_vm5, %v7915_v22  ;;  %s10438_s1 = sld [smem:[#allocation13_spill]]  ;;  %s10440_s29 = smov 32  }
  0x49   : > { %1152 = vrot.lane.b32.xlu1 %v7621_v5, %s10425_s24  ;;  %v1022_v21 = vld [vmem:[#allocation2 + $0x2] sm:$0xff]  ;;  %540 = vst.msk [vmem:[#allocation2 + $0x19] sm:$0xff] %vm539_vm5, %v7902_v9  ;;  %541 = vst.msk [vmem:[#allocation2 + $0x21] sm:$0xff] %vm539_vm5, %v7903_v10  ;;  %v7918_v23 = vunpack.c.l.bf16 %v7967_v14  ;;  %v7556_v24 = vpack.c.bf16 %v572_v19, %v572_v19  ;;  %v7919_v25 = vunpack.c.h.bf16 %v7967_v14  ;;  %v7557_v26 = vpack.c.bf16 %v573_v20, %v573_v20  ;;  %v7969_v5 = vld [vmem:[%s8468_s15 + $0x30] sm:$0xff]   ;;  %s10442_s14 = smov 48  }
  0x4a   : > { %542 = vst.msk [vmem:[#allocation2 + $0x31] sm:$0xff] %vm539_vm5, %v7906_v11  ;;  %543 = vst.msk [vmem:[#allocation2 + $0x39] sm:$0xff] %vm539_vm5, %v7907_v15  ;;  %v7620_v27 = vpack.c.bf16 %v1022_v21, %v1022_v21  ;;  %v7968_v56 = vld [vmem:[%s8468_s15 + $0x28] sm:$0xff]   ;;  %v7926_v6 = vunpack.c.l.bf16 %v7969_v5  ;;  %v7927_v9 = vunpack.c.h.bf16 %v7969_v5  ;;  %vm3026_vm7 = vcmask 1043456  }
  0x4b   : > { %544 = vst.msk [vmem:[#allocation2 + $0x49] sm:$0xff] %vm539_vm5, %v7910_v16  ;;  %545 = vst.msk [vmem:[#allocation2 + $0x51] sm:$0xff] %vm539_vm5, %v7911_v17  ;;  %v7922_v58 = vunpack.c.l.bf16 %v7968_v56  ;;  %v7923_v59 = vunpack.c.h.bf16 %v7968_v56  ;;  %vm989_vm8 = vcmask 126016   ;;  %vm1246_vm9 = vcmask 191616  }
  0x4c   : > { %548 = vst.msk [vmem:[#allocation2 + $0x79] sm:$0xff] %vm539_vm5, %v7918_v23  ;;  %895 = vrot.lane.b32.xlu0 %v7589_v8, %s8337_s22  ;;  %549 = vst.msk [vmem:[#allocation2 + $0x81] sm:$0xff] %vm539_vm5, %v7919_v25  ;;  %vm10424_vm10 = vcmask 257216   ;;  %vm1760_vm11 = vcmask 322816   ;;  %vm2017_vm12 = vcmask 388416   ;;  %vm2275_vm13 = vcmask 454016  }
  0x4d   : > { %733 = vst.msk [vmem:[#allocation5] sm:$0xf] %vm732_vm6, %v7556_v24  ;;  %734 = vst.msk [vmem:[#allocation5 + $0x4] sm:$0xf] %vm732_vm6, %v7557_v26  ;;  %vm2532_vm14 = vcmask 519616   ;;  %vm2789_vm15 = vcmask 585216  }
  0x4e   : > { %550 = vst.msk [vmem:[#allocation2 + $0x91] sm:$0xff] %vm539_vm5, %v7922_v58  ;;  %551 = vst.msk [vmem:[#allocation2 + $0x99] sm:$0xff] %vm539_vm5, %v7923_v59  ;;  %v8183_v13 = vld [vmem:[%s10438_s1 + $0x20] ss:$0 sps:$4 sm:$0xff]   ;;  %v8184_v18 = vld [vmem:[%s10438_s1 + $0x18] sm:$0xff]   ;;  %vm2977_vm0 = vcmask 588800  }
  0x4f   : > { %v1285_v47 = vld [vmem:[#allocation2 + $0x60] sm:$0xff]  ;;  %v1286_v48 = vld [vmem:[#allocation2 + $0x68] sm:$0xff]  ;;  %552 = vst.msk [vmem:[#allocation2 + $0xa9] sm:$0xff] %vm539_vm5, %v7926_v6  ;;  %553 = vst.msk [vmem:[#allocation2 + $0xb1] sm:$0xff] %vm539_vm5, %v7927_v9  ;;  %8126 = vmatprep.subr.msk.bf16.mxu0 %vm3026_vm7, %v8183_v13  ;;  %v3028_v14 = vsel %vm3026_vm7, %v8183_v13, 0  ;;  %vm4631_vm1 = vcmask 1041409  }
  0x50   : > { %1150 = vrot.lane.b32.xlu0 %v7620_v27, %s10425_s24  ;;  %v767_v28 = vld [vmem:[#allocation2 + $0x19] sm:$0xff]  ;;  %v768_v30 = vld [vmem:[#allocation2 + $0x21] sm:$0xff]  ;;  %v8666_v50 = vpack.c.bf16 %v1285_v47, %v1285_v47  ;;  %v8668_v51 = vpack.c.bf16 %v1286_v48, %v1286_v48  ;;  %8057 = vmatpush3.bf16.msra.mxu0 %v3028_v14  ;;  %v8185_v20 = vld [vmem:[%s10438_s1 + $0x10] sm:$0xff]   ;;  %vm10421_vm2 = vcmask 1042434   ;;  %vm10422_vm3 = vcmask 1043459  }
  0x51   : > { %v1024_v29 = vld [vmem:[#allocation2 + $0x1a] sm:$0xff]  ;;  %v7590_v31 = vpack.c.bf16 %v767_v28, %v767_v28  ;;  %v1281_v34 = vld [vmem:[#allocation2 + $0x30] sm:$0xff]  ;;  %v7591_v39 = vpack.c.bf16 %v768_v30, %v768_v30  ;;  %v1025_v42 = vld [vmem:[#allocation2 + $0x22] sm:$0xff]  ;;  %8058 = vmatprep.subr.bf16.mxu0 %v8184_v18  ;;  %vm4637_vm4 = vcmask 1044484   ;;  %vm4641_vm7 = vcmask 1046534  }
  0x52   : > { %v8646_v32 = vpack.c.bf16 %v1024_v29, %v1024_v29  ;;  %v1279_v33 = vld [vmem:[#allocation2 + $0x18] sm:$0xff]  ;;  %v8648_v36 = vpack.c.bf16 %v1281_v34, %v1281_v34  ;;  %v1280_v37 = vld [vmem:[#allocation2 + $0x20] sm:$0xff]  ;;  %v2053_v43 = vld [vmem:[#allocation2 + $0x48] sm:$0xff]  ;;  %v7623_v49 = vpack.c.bf16 %v1025_v42, %v1025_v42  ;;  %741 = vst.msk [vmem:[#allocation5 + $0x20] sm:$0xf] %vm732_vm6, %v8666_v50 }
  0x53   : > { %v7652_v35 = vpack.c.bf16 %v1279_v33, %v1279_v33  ;;  %v1282_v38 = vld [vmem:[#allocation2 + $0x38] sm:$0xff]  ;;  %897 = vrot.lane.b32.xlu1 %v7590_v31, %s8337_s22  ;;  %v7653_v40 = vpack.c.bf16 %v1280_v37, %v1280_v37  ;;  %v2054_v44 = vld [vmem:[#allocation2 + $0x50] sm:$0xff]  ;;  %v8658_v45 = vpack.c.bf16 %v2053_v43, %v2053_v43  ;;  %v2058_v53 = vld [vmem:[#allocation2 + $0x80] sm:$0xff]  ;;  %742 = vst.msk [vmem:[#allocation5 + $0x24] sm:$0xf] %vm732_vm6, %v8668_v51 }
  0x54   : > { %v8651_v41 = vpack.c.bf16 %v1282_v38, %v1282_v38  ;;  %1154 = vrot.lane.b32.xlu0 %v8646_v32, %s10425_s24  ;;  %737 = vst.msk [vmem:[#allocation5 + $0x10] sm:$0xf] %vm732_vm6, %v8648_v36  ;;  %v8660_v46 = vpack.c.bf16 %v2054_v44, %v2054_v44  ;;  %v2057_v52 = vld [vmem:[#allocation2 + $0x78] sm:$0xff]  ;;  %v8677_v55 = vpack.c.bf16 %v2058_v53, %v2058_v53  ;;  %v2310_v11 = vld [vmem:[#allocation2 + $0x49] sm:$0xff]  ;;  %v8188_v25 = vld [vmem:[%s10438_s1] sm:$0xff]  }
  0x55   : > { %735 = vst.msk [vmem:[#allocation5 + $0x8] sm:$0xf] %vm732_vm6, %v7652_v35  ;;  %736 = vst.msk [vmem:[#allocation5 + $0xc] sm:$0xf] %vm732_vm6, %v7653_v40  ;;  %v8675_v54 = vpack.c.bf16 %v2057_v52, %v2057_v52  ;;  %v1538_v57 = vld [vmem:[#allocation2 + $0x31] sm:$0xff]  ;;  %v1539_v61 = vld [vmem:[#allocation2 + $0x39] sm:$0xff]  ;;  %v7782_v15 = vpack.c.bf16 %v2310_v11, %v2310_v11  ;;  %8059 = vmatpush3.bf16.msra.mxu0 %v8184_v18 }
  0x56   : > { %738 = vst.msk [vmem:[#allocation5 + $0x14] sm:$0xf] %vm732_vm6, %v8651_v41  ;;  %739 = vst.msk [vmem:[#allocation5 + $0x18] sm:$0xf] %vm732_vm6, %v8658_v45  ;;  %v7686_v60 = vpack.c.bf16 %v1538_v57, %v1538_v57  ;;  %v1795_v62 = vld [vmem:[#allocation2 + $0x32] sm:$0xff]  ;;  %v7687_v3 = vpack.c.bf16 %v1539_v61, %v1539_v61  ;;  %v1796_v7 = vld [vmem:[#allocation2 + $0x3a] sm:$0xff]  ;;  %8060 = vmatprep.subr.bf16.mxu0 %v8185_v20 }
  0x57   : > { %899 = vrot.lane.b32.xlu1 %v7591_v39, %s8337_s22  ;;  %740 = vst.msk [vmem:[#allocation5 + $0x1c] sm:$0xf] %vm732_vm6, %v8660_v46  ;;  %743 = vst.msk [vmem:[#allocation5 + $0x28] sm:$0xf] %vm732_vm6, %v8675_v54  ;;  %v1289_v63 = vld [vmem:[#allocation2 + $0x90] sm:$0xff]  ;;  %v1290_v0 = vld [vmem:[#allocation2 + $0x98] sm:$0xff]  ;;  %v7718_v4 = vpack.c.bf16 %v1795_v62, %v1795_v62  ;;  %v7719_v8 = vpack.c.bf16 %v1796_v7, %v1796_v7 }
  0x58   : > { %1407 = vrot.lane.b32.xlu0 %v7652_v35, %s10415_s25  ;;  %744 = vst.msk [vmem:[#allocation5 + $0x2c] sm:$0xf] %vm732_vm6, %v8677_v55  ;;  %v8698_v1 = vpack.c.bf16 %v1289_v63, %v1289_v63  ;;  %v8700_v2 = vpack.c.bf16 %v1290_v0, %v1290_v0  ;;  %v2061_v10 = vld [vmem:[#allocation2 + $0xa8] sm:$0xff]  ;;  %v2062_v16 = vld [vmem:[#allocation2 + $0xb0] sm:$0xff]  ;;  %v7970_v28 = vld [vmem:[%s8468_s15 + $0x38] sm:$0xff]  }
  0x59   : > { %v8718_v12 = vpack.c.bf16 %v2061_v10, %v2061_v10  ;;  %v8730_v17 = vpack.c.bf16 %v2062_v16, %v2062_v16  ;;  %v2311_v19 = vld [vmem:[#allocation2 + $0x51] sm:$0xff]  ;;  %8061 = vmatpush3.bf16.msra.mxu0 %v8185_v20  ;;  %v8186_v23 = vld [vmem:[%s10438_s1 + $0x8] sm:$0xff]   ;;  %v7930_v29 = vunpack.c.l.bf16 %v7970_v28  ;;  %v7931_v30 = vunpack.c.h.bf16 %v7970_v28  ;;  %v2314_v48 = vld [vmem:[#allocation2 + $0x79] sm:$0xff] }
  0x5a   : > { %745 = vst.msk [vmem:[#allocation5 + $0x30] sm:$0xf] %vm732_vm6, %v8698_v1  ;;  %746 = vst.msk [vmem:[#allocation5 + $0x34] sm:$0xf] %vm732_vm6, %v8700_v2  ;;  %v7783_v21 = vpack.c.bf16 %v2311_v19, %v2311_v19  ;;  %v2567_v22 = vld [vmem:[#allocation2 + $0x4a] sm:$0xff]  ;;  %8062 = vmatprep.subr.bf16.mxu0 %v8186_v23  ;;  %v2568_v26 = vld [vmem:[#allocation2 + $0x52] sm:$0xff] }
  0x5b   : > { %1156 = vrot.lane.b32.xlu1 %v7623_v49, %s10425_s24  ;;  %747 = vst.msk [vmem:[#allocation5 + $0x38] sm:$0xf] %vm732_vm6, %v8718_v12  ;;  %748 = vst.msk [vmem:[#allocation5 + $0x3c] sm:$0xf] %vm732_vm6, %v8730_v17  ;;  %v7814_v24 = vpack.c.bf16 %v2567_v22, %v2567_v22  ;;  %v7815_v27 = vpack.c.bf16 %v2568_v26, %v2568_v26  ;;  %v1542_v33 = vld [vmem:[#allocation2 + $0x61] sm:$0xff]  ;;  %v1543_v37 = vld [vmem:[#allocation2 + $0x69] sm:$0xff] }
  0x5c   : > { %1411 = vrot.lane.b32.xlu0 %v8648_v36, %s10415_s25  ;;  %554 = vst.msk [vmem:[#allocation2 + $0xc1] sm:$0xff] %vm539_vm5, %v7930_v29  ;;  %555 = vst.msk [vmem:[#allocation2 + $0xc9] sm:$0xff] %vm539_vm5, %v7931_v30  ;;  %v7690_v34 = vpack.c.bf16 %v1542_v33, %v1542_v33  ;;  %v1799_v38 = vld [vmem:[#allocation2 + $0x62] sm:$0xff]  ;;  %v1800_v43 = vld [vmem:[#allocation2 + $0x6a] sm:$0xff] }
  0x5d   : > { %8063 = vmatpush3.bf16.msra.mxu0 %v8186_v23  ;;  %v8794_v44 = vpack.c.bf16 %v1800_v43, %v1800_v43  ;;  %v2571_v59 = vld [vmem:[#allocation2 + $0x7a] sm:$0xff]  ;;  %v2572_v0 = vld [vmem:[#allocation2 + $0x82] sm:$0xff]  ;;  %v1546_v20 = vld [vmem:[#allocation2 + $0x91] sm:$0xff] }
  0x5e   : > { %8064 = vmatprep.subr.bf16.mxu0 %v8188_v25  ;;  %v8832_v61 = vpack.c.bf16 %v2571_v59, %v2571_v59  ;;  %v8843_v5 = vpack.c.bf16 %v2572_v0, %v2572_v0  ;;  %v7973_v29 = vld [vmem:[%s8468_s15 + $0x50] sm:$0xff]  }
  0x5f   : > { %1409 = vrot.lane.b32.xlu1 %v7653_v40, %s10415_s25  ;;  %v8786_v40 = vpack.c.bf16 %v1799_v38, %v1799_v38 }
  0x60   : > { %1664 = vrot.lane.b32.xlu0 %v7590_v31, %s10413_s30 }
  0x61   : > { %8065 = vmatpush3.bf16.msra.mxu0 %v8188_v25  ;;  %v1803_v25 = vld [vmem:[#allocation2 + $0x92] sm:$0xff] }
  0x62   : > { %v8896_v28 = vpack.c.bf16 %v1803_v25, %v1803_v25 }
  0x63   : > { %1413 = vrot.lane.b32.xlu1 %v8651_v41, %s10415_s25  ;;  %v1293_v31 = vld [vmem:[#allocation2 + $0xc0] sm:$0xff]  ;;  %v1294_v35 = vld [vmem:[#allocation2 + $0xc8] sm:$0xff]  ;;  %s10441_s25 = smov 40  }
  0x64   : > { %1668 = vrot.lane.b32.xlu0 %v7686_v60, %s10413_s30  ;;  %v1807_v25 = vld [vmem:[#allocation2 + $0xc2] sm:$0xff] }
  0x67   : > { %1666 = vrot.lane.b32.xlu1 %v7591_v39, %s10413_s30  ;;  %v7691_v39 = vpack.c.bf16 %v1543_v37, %v1543_v37 }
  0x68   : > { %1921 = vrot.lane.b32.xlu0 %v8646_v32, %s10411_s12  ;;  %v8768_v32 = vpack.c.bf16 %v1293_v31, %v1293_v31  ;;  %v7942_v31 = vunpack.c.l.bf16 %v7973_v29 }
  0x6a   : > { %749 = vst.msk [vmem:[#allocation5 + $0x40] sm:$0xf] %vm732_vm6, %v8768_v32 }
  0x6b   : > { %1670 = vrot.lane.b32.xlu1 %v7687_v3, %s10413_s30  ;;  %s10431_s30 = smov 64   ;;  %560 = vst.msk [vmem:[#allocation2 + $0x109] sm:$0xff] %vm539_vm5, %v7942_v31 }
  0x6c   : > { %1925 = vrot.lane.b32.xlu0 %v7718_v4, %s10411_s12 }
  0x6f   : > { %1923 = vrot.lane.b32.xlu1 %v7623_v49, %s10411_s12  ;;  %v8810_v49 = vpack.c.bf16 %v2314_v48, %v2314_v48 }
  0x70   : > { %2179 = vrot.lane.b32.xlu0 %v8648_v36, %s10417_s13  ;;  %v8777_v36 = vpack.c.bf16 %v1294_v35, %v1294_v35 }
  0x72   : > { %750 = vst.msk [vmem:[#allocation5 + $0x44] sm:$0xf] %vm732_vm6, %v8777_v36 }
  0x73   : > { %1927 = vrot.lane.b32.xlu1 %v7719_v8, %s10411_s12  ;;  %s10419_s12 = smov 56  }
  0x74   : > { %2183 = vrot.lane.b32.xlu0 %v8658_v45, %s10417_s13 }
  0x77   : > { %2181 = vrot.lane.b32.xlu1 %v8651_v41, %s10417_s13  ;;  %v7971_v41 = vld [vmem:[%s8468_s15 + $0x40] sm:$0xff]  }
  0x78   : > { %2436 = vrot.lane.b32.xlu0 %v7686_v60, %s10419_s12  ;;  %v7934_v42 = vunpack.c.l.bf16 %v7971_v41 }
  0x7a   : > { %556 = vst.msk [vmem:[#allocation2 + $0xd9] sm:$0xff] %vm539_vm5, %v7934_v42  ;;  %v2069_v42 = vld [vmem:[#allocation2 + $0x108] sm:$0xff] }
  0x7b   : > { %2185 = vrot.lane.b32.xlu1 %v8660_v46, %s10417_s13  ;;  %s10439_s13 = smov 24   ;;  %v8919_v43 = vpack.c.bf16 %v2069_v42, %v2069_v42 }
  0x7c   : > { %2440 = vrot.lane.b32.xlu0 %v7782_v15, %s10419_s12 }
  0x7d   : > { %755 = vst.msk [vmem:[#allocation5 + $0x58] sm:$0xf] %vm732_vm6, %v8919_v43 }
  0x7f   : > { %2438 = vrot.lane.b32.xlu1 %v7687_v3, %s10419_s12 }
  0x80   : > { %2693 = vrot.lane.b32.xlu0 %v7718_v4, %s10431_s30 }
  0x83   : > { %2442 = vrot.lane.b32.xlu1 %v7783_v21, %s10419_s12 }
  0x84   : > { %901 = vrot.lane.b32.xlu0 %v7686_v60, %s8337_s22 }
  0x87   : > { %2695 = vrot.lane.b32.xlu1 %v7719_v8, %s10431_s30 }
  0x88   : > { %2697 = vrot.lane.b32.xlu0 %v7814_v24, %s10431_s30 }
  0x8b   : > { %903 = vrot.lane.b32.xlu1 %v7687_v3, %s8337_s22 }
  0x8c   : > { %905 = vrot.lane.b32.xlu0 %v7782_v15, %s8337_s22 }
  0x8f   : > { %2699 = vrot.lane.b32.xlu1 %v7815_v27, %s10431_s30 }
  0x90   : > { %1158 = vrot.lane.b32.xlu0 %v7718_v4, %s10425_s24 }
  0x93   : > { %907 = vrot.lane.b32.xlu1 %v7783_v21, %s8337_s22 }
  0x94   : > { %1162 = vrot.lane.b32.xlu0 %v7814_v24, %s10425_s24 }
  0x97   : > { %1160 = vrot.lane.b32.xlu1 %v7719_v8, %s10425_s24  ;;  %v7972_v8 = vld [vmem:[%s8468_s15 + $0x48] sm:$0xff]  }
  0x98   : > { %1415 = vrot.lane.b32.xlu0 %v8658_v45, %s10439_s13  ;;  %v7935_v45 = vunpack.c.h.bf16 %v7971_v41  ;;  %v7938_v10 = vunpack.c.l.bf16 %v7972_v8 }
  0x9a   : > { %557 = vst.msk [vmem:[#allocation2 + $0xe1] sm:$0xff] %vm539_vm5, %v7935_v45  ;;  %558 = vst.msk [vmem:[#allocation2 + $0xf1] sm:$0xff] %vm539_vm5, %v7938_v10  ;;  %v7974_v10 = vld [vmem:[%s8468_s15 + $0x58] sm:$0xff]  }
  0x9b   : > { %1164 = vrot.lane.b32.xlu1 %v7815_v27, %s10425_s24 }
  0x9c   : > { %1419 = vrot.lane.b32.xlu0 %v8666_v50, %s10439_s13 }
  0x9f   : > { %1417 = vrot.lane.b32.xlu1 %v8660_v46, %s10439_s13  ;;  %v2065_v46 = vld [vmem:[#allocation2 + $0xd8] sm:$0xff] }
  0xa0   : > { %1672 = vrot.lane.b32.xlu0 %v7782_v15, %s10440_s29  ;;  %v8801_v47 = vpack.c.bf16 %v2065_v46, %v2065_v46  ;;  %v7939_v15 = vunpack.c.h.bf16 %v7972_v8 }
  0xa2   : > { %751 = vst.msk [vmem:[#allocation5 + $0x48] sm:$0xf] %vm732_vm6, %v8801_v47 }
  0xa3   : > { %1421 = vrot.lane.b32.xlu1 %v8668_v51, %s10439_s13  ;;  %559 = vst.msk [vmem:[#allocation2 + $0xf9] sm:$0xff] %vm539_vm5, %v7939_v15 }
  0xa4   : > { %1676 = vrot.lane.b32.xlu0 %v7690_v34, %s10440_s29 }
  0xa7   : > { %1674 = vrot.lane.b32.xlu1 %v7783_v21, %s10440_s29  ;;  %v8880_v21 = vpack.c.bf16 %v1546_v20, %v1546_v20 }
  0xa8   : > { %1929 = vrot.lane.b32.xlu0 %v7814_v24, %s10441_s25 }
  0xab   : > { %1678 = vrot.lane.b32.xlu1 %v7691_v39, %s10440_s29 }
  0xac   : > { %1933 = vrot.lane.b32.xlu0 %v8786_v40, %s10441_s25 }
  0xaf   : > { %1931 = vrot.lane.b32.xlu1 %v7815_v27, %s10441_s25 }
  0xb0   : > { %2187 = vrot.lane.b32.xlu0 %v8666_v50, %s10442_s14  ;;  %v2066_v50 = vld [vmem:[#allocation2 + $0xe0] sm:$0xff] }
  0xb1   : > { %v8812_v52 = vpack.c.bf16 %v2066_v50, %v2066_v50 }
  0xb3   : > { %1935 = vrot.lane.b32.xlu1 %v8794_v44, %s10441_s25  ;;  %752 = vst.msk [vmem:[#allocation5 + $0x4c] sm:$0xf] %vm732_vm6, %v8812_v52 }
  0xb4   : > { %2191 = vrot.lane.b32.xlu0 %v8675_v54, %s10442_s14 }
  0xb7   : > { %2189 = vrot.lane.b32.xlu1 %v8668_v51, %s10442_s14  ;;  %v2315_v51 = vld [vmem:[#allocation2 + $0x81] sm:$0xff] }
  0xb8   : > { %2444 = vrot.lane.b32.xlu0 %v7690_v34, %s10419_s12  ;;  %v8823_v58 = vpack.c.bf16 %v2315_v51, %v2315_v51 }
  0xba   : > { %v894_v53 = vpop.permute.xlu0 %893 }
  0xbb   : > { %990 = vst.msk [vmem:[#allocation5] sm:$0xf] %vm989_vm8, %v894_v53  ;;  %2193 = vrot.lane.b32.xlu1 %v8677_v55, %s10442_s14  ;;  %v1153_v56 = vpop.permute.xlu1 %1152 }
  0xbc   : > { %2448 = vrot.lane.b32.xlu0 %v8810_v49, %s10419_s12 }
  0xbe   : > { %v896_v57 = vpop.permute.xlu0 %895 }
  0xbf   : > { %991 = vst.msk [vmem:[#allocation5 + $0x4] sm:$0xf] %vm989_vm8, %v896_v57  ;;  %2446 = vrot.lane.b32.xlu1 %v7691_v39, %s10419_s12 }
  0xc0   : > { %1248 = vst.msk [vmem:[#allocation5 + $0x4] sm:$0xf] %vm1246_vm9, %v1153_v56  ;;  %2701 = vrot.lane.b32.xlu0 %v8786_v40, %s10431_s30 }
  0xc2   : > { %v1151_v60 = vpop.permute.xlu0 %1150 }
  0xc3   : > { %1247 = vst.msk [vmem:[#allocation5] sm:$0xf] %vm1246_vm9, %v1151_v60  ;;  %2450 = vrot.lane.b32.xlu1 %v8823_v58, %s10419_s12  ;;  %v2575_v60 = vld [vmem:[#allocation2 + $0xaa] sm:$0xff] }
  0xc4   : > { %909 = vrot.lane.b32.xlu0 %v7690_v34, %s8337_s22  ;;  %v1804_v34 = vld [vmem:[#allocation2 + $0x9a] sm:$0xff] }
  0xc5   : > { %v898_v62 = vpop.permute.xlu1 %897  ;;  %v8910_v38 = vpack.c.bf16 %v1804_v34, %v1804_v34  ;;  %v1808_v34 = vld [vmem:[#allocation2 + $0xca] sm:$0xff] }
  0xc6   : > { %992 = vst.msk [vmem:[#allocation5 + $0x8] sm:$0xf] %vm989_vm8, %v898_v62  ;;  %v1155_v63 = vpop.permute.xlu0 %1154  ;;  %v8958_v62 = vpack.c.bf16 %v2575_v60, %v2575_v60 }
  0xc7   : > { %1249 = vst.msk [vmem:[#allocation5 + $0x8] sm:$0xf] %vm1246_vm9, %v1155_v63  ;;  %2703 = vrot.lane.b32.xlu1 %v8794_v44, %s10431_s30 }
  0xc8   : > { %2705 = vrot.lane.b32.xlu0 %v8832_v61, %s10431_s30 }
  0xc9   : > { %v900_v3 = vpop.permute.xlu1 %899 }
  0xca   : > { %993 = vst.msk [vmem:[#allocation5 + $0xc] sm:$0xf] %vm989_vm8, %v900_v3  ;;  %v1408_v4 = vpop.permute.xlu0 %1407  ;;  %v2576_v3 = vld [vmem:[#allocation2 + $0xb2] sm:$0xff] }
  0xcb   : > { %1504 = vst.msk [vmem:[#allocation5] sm:$0xf] %vm10424_vm10, %v1408_v4  ;;  %911 = vrot.lane.b32.xlu1 %v7691_v39, %s8337_s22  ;;  %v7943_v39 = vunpack.c.h.bf16 %v7973_v29  ;;  %v7975_v29 = vld [vmem:[%s8468_s15 + $0x60] sm:$0xff]  }
  0xcc   : > { %913 = vrot.lane.b32.xlu0 %v8810_v49, %s8337_s22  ;;  %v7950_v31 = vunpack.c.l.bf16 %v7975_v29 }
  0xcd   : > { %v1157_v6 = vpop.permute.xlu1 %1156  ;;  %561 = vst.msk [vmem:[#allocation2 + $0x111] sm:$0xff] %vm539_vm5, %v7943_v39  ;;  %v7951_v39 = vunpack.c.h.bf16 %v7975_v29  ;;  %v7977_v29 = vld [vmem:[%s8468_s15 + $0x70] sm:$0xff]  }
  0xce   : > { %1250 = vst.msk [vmem:[#allocation5 + $0xc] sm:$0xf] %vm1246_vm9, %v1157_v6  ;;  %v1412_v7 = vpop.permute.xlu0 %1411 }
  0xcf   : > { %1506 = vst.msk [vmem:[#allocation5 + $0x8] sm:$0xf] %vm10424_vm10, %v1412_v7  ;;  %2707 = vrot.lane.b32.xlu1 %v8843_v5, %s10431_s30  ;;  %v8971_v7 = vpack.c.bf16 %v2576_v3, %v2576_v3 }
  0xd0   : > { %1166 = vrot.lane.b32.xlu0 %v8786_v40, %s10425_s24  ;;  %564 = vst.msk [vmem:[#allocation2 + $0x139] sm:$0xff] %vm539_vm5, %v7950_v31  ;;  %565 = vst.msk [vmem:[#allocation2 + $0x141] sm:$0xff] %vm539_vm5, %v7951_v39  ;;  %v1812_v31 = vld [vmem:[#allocation2 + $0xfa] sm:$0xff] }
  0xd1   : > { %v1410_v9 = vpop.permute.xlu1 %1409 }
  0xd2   : > { %1505 = vst.msk [vmem:[#allocation5 + $0x4] sm:$0xf] %vm10424_vm10, %v1410_v9  ;;  %v1665_v11 = vpop.permute.xlu0 %1664 }
  0xd3   : > { %1761 = vst.msk [vmem:[#allocation5] sm:$0xf] %vm1760_vm11, %v1665_v11  ;;  %915 = vrot.lane.b32.xlu1 %v8823_v58, %s8337_s22 }
  0xd4   : > { %1170 = vrot.lane.b32.xlu0 %v8832_v61, %s10425_s24  ;;  %v2070_v48 = vld [vmem:[#allocation2 + $0x110] sm:$0xff] }
  0xd5   : > { %v1414_v13 = vpop.permute.xlu1 %1413  ;;  %v8933_v50 = vpack.c.bf16 %v2070_v48, %v2070_v48  ;;  %v2323_v48 = vld [vmem:[#allocation2 + $0xe1] sm:$0xff] }
  0xd6   : > { %1507 = vst.msk [vmem:[#allocation5 + $0xc] sm:$0xf] %vm10424_vm10, %v1414_v13  ;;  %v1669_v14 = vpop.permute.xlu0 %1668  ;;  %v7946_v13 = vunpack.c.l.bf16 %v7974_v10 }
  0xd7   : > { %1763 = vst.msk [vmem:[#allocation5 + $0x8] sm:$0xf] %vm1760_vm11, %v1669_v14  ;;  %1168 = vrot.lane.b32.xlu1 %v8794_v44, %s10425_s24 }
  0xd8   : > { %1423 = vrot.lane.b32.xlu0 %v8675_v54, %s10439_s13  ;;  %756 = vst.msk [vmem:[#allocation5 + $0x5c] sm:$0xf] %vm732_vm6, %v8933_v50 }
  0xd9   : > { %v1667_v16 = vpop.permute.xlu1 %1666  ;;  %562 = vst.msk [vmem:[#allocation2 + $0x121] sm:$0xff] %vm539_vm5, %v7946_v13 }
  0xda   : > { %1762 = vst.msk [vmem:[#allocation5 + $0x4] sm:$0xf] %vm1760_vm11, %v1667_v16  ;;  %v1922_v18 = vpop.permute.xlu0 %1921 }
  0xdb   : > { %2018 = vst.msk [vmem:[#allocation5] sm:$0xf] %vm2017_vm12, %v1922_v18  ;;  %1172 = vrot.lane.b32.xlu1 %v8843_v5, %s10425_s24  ;;  %v7947_v18 = vunpack.c.h.bf16 %v7974_v10 }
  0xdc   : > { %1427 = vrot.lane.b32.xlu0 %v8698_v1, %s10439_s13 }
  0xdd   : > { %v1671_v19 = vpop.permute.xlu1 %1670  ;;  %563 = vst.msk [vmem:[#allocation2 + $0x129] sm:$0xff] %vm539_vm5, %v7947_v18 }
  0xde   : > { %1764 = vst.msk [vmem:[#allocation5 + $0xc] sm:$0xf] %vm1760_vm11, %v1671_v19  ;;  %v1926_v54 = vpop.permute.xlu0 %1925 }
  0xdf   : > { %2020 = vst.msk [vmem:[#allocation5 + $0x8] sm:$0xf] %vm2017_vm12, %v1926_v54  ;;  %1425 = vrot.lane.b32.xlu1 %v8677_v55, %s10439_s13  ;;  %v1547_v55 = vld [vmem:[#allocation2 + $0x99] sm:$0xff] }
  0xe0   : > { %1680 = vrot.lane.b32.xlu0 %v8810_v49, %s10440_s29  ;;  %v8892_v27 = vpack.c.bf16 %v1547_v55, %v1547_v55 }
  0xe1   : > { %v1924_v22 = vpop.permute.xlu1 %1923 }
  0xe2   : > { %2019 = vst.msk [vmem:[#allocation5 + $0x4] sm:$0xf] %vm2017_vm12, %v1924_v22  ;;  %v2180_v23 = vpop.permute.xlu0 %2179 }
  0xe3   : > { %2276 = vst.msk [vmem:[#allocation5] sm:$0xf] %vm2275_vm13, %v2180_v23  ;;  %1429 = vrot.lane.b32.xlu1 %v8700_v2, %s10439_s13 }
  0xe4   : > { %1684 = vrot.lane.b32.xlu0 %v8880_v21, %s10440_s29 }
  0xe5   : > { %v1928_v24 = vpop.permute.xlu1 %1927 }
  0xe6   : > { %2021 = vst.msk [vmem:[#allocation5 + $0xc] sm:$0xf] %vm2017_vm12, %v1928_v24  ;;  %v2184_v26 = vpop.permute.xlu0 %2183  ;;  %v1551_v24 = vld [vmem:[#allocation2 + $0xc9] sm:$0xff] }
  0xe7   : > { %2278 = vst.msk [vmem:[#allocation5 + $0x8] sm:$0xf] %vm2275_vm13, %v2184_v26  ;;  %1682 = vrot.lane.b32.xlu1 %v8823_v58, %s10440_s29 }
  0xe8   : > { %1937 = vrot.lane.b32.xlu0 %v8832_v61, %s10441_s25 }
  0xe9   : > { %v2182_v30 = vpop.permute.xlu1 %2181 }
  0xea   : > { %2277 = vst.msk [vmem:[#allocation5 + $0x4] sm:$0xf] %vm2275_vm13, %v2182_v30  ;;  %v2437_v33 = vpop.permute.xlu0 %2436 }
  0xeb   : > { %2533 = vst.msk [vmem:[#allocation5] sm:$0xf] %vm2532_vm14, %v2437_v33  ;;  %1686 = vrot.lane.b32.xlu1 %v8892_v27, %s10440_s29 }
  0xec   : > { %1941 = vrot.lane.b32.xlu0 %v8896_v28, %s10441_s25 }
  0xed   : > { %v2186_v35 = vpop.permute.xlu1 %2185 }
  0xee   : > { %2279 = vst.msk [vmem:[#allocation5 + $0xc] sm:$0xf] %vm2275_vm13, %v2186_v35  ;;  %v2441_v37 = vpop.permute.xlu0 %2440 }
  0xef   : > { %2535 = vst.msk [vmem:[#allocation5 + $0x8] sm:$0xf] %vm2532_vm14, %v2441_v37  ;;  %1939 = vrot.lane.b32.xlu1 %v8843_v5, %s10441_s25 }
  0xf0   : > { %2195 = vrot.lane.b32.xlu0 %v8698_v1, %s10442_s14  ;;  %v2318_v1 = vld [vmem:[#allocation2 + $0xa9] sm:$0xff] }
  0xf1   : > { %v2439_v40 = vpop.permute.xlu1 %2438  ;;  %v8931_v46 = vpack.c.bf16 %v2318_v1, %v2318_v1 }
  0xf2   : > { %2534 = vst.msk [vmem:[#allocation5 + $0x4] sm:$0xf] %vm2532_vm14, %v2439_v40  ;;  %v2694_v41 = vpop.permute.xlu0 %2693 }
  0xf3   : > { %2790 = vst.msk [vmem:[#allocation5] sm:$0xf] %vm2789_vm15, %v2694_v41  ;;  %1943 = vrot.lane.b32.xlu1 %v8910_v38, %s10441_s25 }
  0xf4   : > { %2199 = vrot.lane.b32.xlu0 %v8718_v12, %s10442_s14 }
  0xf5   : > { %v2443_v44 = vpop.permute.xlu1 %2442 }
  0xf6   : > { %2536 = vst.msk [vmem:[#allocation5 + $0xc] sm:$0xf] %vm2532_vm14, %v2443_v44  ;;  %v902_v45 = vpop.permute.xlu0 %901  ;;  %v2322_v44 = vld [vmem:[#allocation2 + $0xd9] sm:$0xff] }
  0xf7   : > { %994 = vst.msk [vmem:[#allocation5 + $0x10] sm:$0xf] %vm989_vm8, %v902_v45  ;;  %2197 = vrot.lane.b32.xlu1 %v8700_v2, %s10442_s14  ;;  %v2319_v2 = vld [vmem:[#allocation2 + $0xb1] sm:$0xff] }
  0xf8   : > { %2452 = vrot.lane.b32.xlu0 %v8880_v21, %s10419_s12  ;;  %v8947_v57 = vpack.c.bf16 %v2319_v2, %v2319_v2 }
  0xf9   : > { %v2696_v49 = vpop.permute.xlu1 %2695 }
  0xfa   : > { %2791 = vst.msk [vmem:[#allocation5 + $0x4] sm:$0xf] %vm2789_vm15, %v2696_v49  ;;  %v2698_v53 = vpop.permute.xlu0 %2697 }
  0xfb   : > { %2792 = vst.msk [vmem:[#allocation5 + $0x8] sm:$0xf] %vm2789_vm15, %v2698_v53  ;;  %2201 = vrot.lane.b32.xlu1 %v8730_v17, %s10442_s14  ;;  %v9067_v53 = vpack.c.bf16 %v2323_v48, %v2323_v48  ;;  %v2327_v48 = vld [vmem:[#allocation2 + $0x111] sm:$0xff] }
  0xfc   : > { %2456 = vrot.lane.b32.xlu0 %v8931_v46, %s10419_s12 }
  0xfd   : > { %v904_v51 = vpop.permute.xlu1 %903 }
  0xfe   : > { %995 = vst.msk [vmem:[#allocation5 + $0x14] sm:$0xf] %vm989_vm8, %v904_v51  ;;  %v906_v56 = vpop.permute.xlu0 %905 }
  0xff   : > { %996 = vst.msk [vmem:[#allocation5 + $0x18] sm:$0xf] %vm989_vm8, %v906_v56  ;;  %2454 = vrot.lane.b32.xlu1 %v8892_v27, %s10419_s12  ;;  %v2579_v56 = vld [vmem:[#allocation2 + $0xda] sm:$0xff] }
 0x100   : > { %2709 = vrot.lane.b32.xlu0 %v8896_v28, %s10431_s30 }
 0x101   : > { %v2700_v58 = vpop.permute.xlu1 %2699  ;;  %v8187_v59 = vld [vmem:[#allocation5] sm:$0xff]  }
 0x102   : > { %2793 = vst.msk [vmem:[#allocation5 + $0xc] sm:$0xf] %vm2789_vm15, %v2700_v58  ;;  %v1159_v61 = vpop.permute.xlu0 %1158  ;;  %8066 = vmatprep.mubr.msk.bf16.mxu0 %vm2977_vm0, %v8187_v59  ;;  %v9078_v58 = vpack.c.bf16 %v2579_v56, %v2579_v56 }
 0x103   : > { %1251 = vst.msk [vmem:[#allocation5 + $0x10] sm:$0xf] %vm1246_vm9, %v1159_v61  ;;  %2458 = vrot.lane.b32.xlu1 %v8947_v57, %s10419_s12  ;;  %v2580_v61 = vld [vmem:[#allocation2 + $0xe2] sm:$0xff] }
 0x104   : > { %917 = vrot.lane.b32.xlu0 %v8880_v21, %s8337_s22  ;;  %v1550_v21 = vld [vmem:[#allocation2 + $0xc1] sm:$0xff]  ;;  %v9091_v3 = vpack.c.bf16 %v2580_v61, %v2580_v61 }
 0x105   : > { %v908_v63 = vpop.permute.xlu1 %907 }
 0x106   : > { %997 = vst.msk [vmem:[#allocation5 + $0x1c] sm:$0xf] %vm989_vm8, %v908_v63  ;;  %v1163_v0 = vpop.permute.xlu0 %1162 }
 0x107   : > { %1253 = vst.msk [vmem:[#allocation5 + $0x18] sm:$0xf] %vm1246_vm9, %v1163_v0  ;;  %2711 = vrot.lane.b32.xlu1 %v8910_v38, %s10431_s30 }
 0x108   : > { %2713 = vrot.lane.b32.xlu0 %v8958_v62, %s10431_s30 }
 0x109   : > { %v1161_v4 = vpop.permute.xlu1 %1160  ;;  %v8189_v5 = vld [vmem:[#allocation5 + $0x8] sm:$0xff]  }
 0x10a   : > { %1252 = vst.msk [vmem:[#allocation5 + $0x14] sm:$0xf] %vm1246_vm9, %v1161_v4  ;;  %v1416_v6 = vpop.permute.xlu0 %1415  ;;  %8067 = vmatmul.mubr.msk.bf16.vlgmr.msra.gmra.mxu0 %vm2977_vm0, %v8189_v5 }
 0x10b   : > { %1508 = vst.msk [vmem:[#allocation5 + $0x10] sm:$0xf] %vm10424_vm10, %v1416_v6  ;;  %919 = vrot.lane.b32.xlu1 %v8892_v27, %s8337_s22  ;;  %v9020_v27 = vpack.c.bf16 %v1551_v24, %v1551_v24  ;;  %v1811_v24 = vld [vmem:[#allocation2 + $0xf2] sm:$0xff] }
 0x10c   : > { %921 = vrot.lane.b32.xlu0 %v8931_v46, %s8337_s22 }
 0x10d   : > { %v1165_v8 = vpop.permute.xlu1 %1164 }
 0x10e   : > { %1254 = vst.msk [vmem:[#allocation5 + $0x1c] sm:$0xf] %vm1246_vm9, %v1165_v8  ;;  %v1420_v9 = vpop.permute.xlu0 %1419  ;;  %v7976_v8 = vld [vmem:[%s8468_s15 + $0x68] sm:$0xff]  }
 0x10f   : > { %1510 = vst.msk [vmem:[#allocation5 + $0x18] sm:$0xf] %vm10424_vm10, %v1420_v9  ;;  %2715 = vrot.lane.b32.xlu1 %v8971_v7, %s10431_s30  ;;  %v7954_v9 = vunpack.c.l.bf16 %v7976_v8 }
 0x110   : > { %1174 = vrot.lane.b32.xlu0 %v8896_v28, %s10425_s24  ;;  %v9024_v28 = vpack.c.bf16 %v1807_v25, %v1807_v25 }
 0x111   : > { %v1418_v11 = vpop.permute.xlu1 %1417  ;;  %566 = vst.msk [vmem:[#allocation2 + $0x151] sm:$0xff] %vm539_vm5, %v7954_v9 }
 0x112   : > { %1509 = vst.msk [vmem:[#allocation5 + $0x14] sm:$0xf] %vm10424_vm10, %v1418_v11  ;;  %v1673_v14 = vpop.permute.xlu0 %1672  ;;  %v1297_v11 = vld [vmem:[#allocation2 + $0xf0] sm:$0xff] }
 0x113   : > { %1765 = vst.msk [vmem:[#allocation5 + $0x10] sm:$0xf] %vm1760_vm11, %v1673_v14  ;;  %923 = vrot.lane.b32.xlu1 %v8947_v57, %s8337_s22  ;;  %v7670_v14 = vpack.c.bf16 %v1297_v11, %v1297_v11 }
 0x114   : > { %1178 = vrot.lane.b32.xlu0 %v8958_v62, %s10425_s24 }
 0x115   : > { %v1422_v15 = vpop.permute.xlu1 %1421 }
 0x116   : > { %1511 = vst.msk [vmem:[#allocation5 + $0x1c] sm:$0xf] %vm10424_vm10, %v1422_v15  ;;  %v1677_v16 = vpop.permute.xlu0 %1676 }
 0x117   : > { %1767 = vst.msk [vmem:[#allocation5 + $0x18] sm:$0xf] %vm1760_vm11, %v1677_v16  ;;  %1176 = vrot.lane.b32.xlu1 %v8910_v38, %s10425_s24  ;;  %v9038_v38 = vpack.c.bf16 %v1808_v34, %v1808_v34  ;;  %v7955_v16 = vunpack.c.h.bf16 %v7976_v8 }
 0x118   : > { %1431 = vrot.lane.b32.xlu0 %v8718_v12, %s10439_s13  ;;  %v9008_v12 = vpack.c.bf16 %v1550_v21, %v1550_v21 }
 0x119   : > { %v1675_v19 = vpop.permute.xlu1 %1674  ;;  %567 = vst.msk [vmem:[#allocation2 + $0x159] sm:$0xff] %vm539_vm5, %v7955_v16 }
 0x11a   : > { %1766 = vst.msk [vmem:[#allocation5 + $0x14] sm:$0xf] %vm1760_vm11, %v1675_v19  ;;  %v1930_v20 = vpop.permute.xlu0 %1929  ;;  %v1298_v19 = vld [vmem:[#allocation2 + $0xf8] sm:$0xff] }
 0x11b   : > { %2022 = vst.msk [vmem:[#allocation5 + $0x10] sm:$0xf] %vm2017_vm12, %v1930_v20  ;;  %1180 = vrot.lane.b32.xlu1 %v8971_v7, %s10425_s24  ;;  %v7671_v21 = vpack.c.bf16 %v1298_v19, %v1298_v19 }
 0x11c   : > { %1435 = vrot.lane.b32.xlu0 %v8768_v32, %s10439_s13 }
 0x11d   : > { %v1679_v54 = vpop.permute.xlu1 %1678 }
 0x11e   : > { %1768 = vst.msk [vmem:[#allocation5 + $0x1c] sm:$0xf] %vm1760_vm11, %v1679_v54  ;;  %v1934_v22 = vpop.permute.xlu0 %1933  ;;  %v1554_v54 = vld [vmem:[#allocation2 + $0xf1] sm:$0xff] }
 0x11f   : > { %2024 = vst.msk [vmem:[#allocation5 + $0x18] sm:$0xf] %vm2017_vm12, %v1934_v22  ;;  %1433 = vrot.lane.b32.xlu1 %v8730_v17, %s10439_s13  ;;  %v9127_v22 = vpack.c.bf16 %v1554_v54, %v1554_v54  ;;  %v1302_v54 = vld [vmem:[#allocation2 + $0x128] sm:$0xff] }
 0x120   : > { %1688 = vrot.lane.b32.xlu0 %v8931_v46, %s10440_s29 }
 0x121   : > { %v1932_v23 = vpop.permute.xlu1 %1931 }
 0x122   : > { %2023 = vst.msk [vmem:[#allocation5 + $0x14] sm:$0xf] %vm2017_vm12, %v1932_v23  ;;  %v2188_v55 = vpop.permute.xlu0 %2187 }
 0x123   : > { %2280 = vst.msk [vmem:[#allocation5 + $0x10] sm:$0xf] %vm2275_vm13, %v2188_v55  ;;  %1437 = vrot.lane.b32.xlu1 %v8777_v36, %s10439_s13  ;;  %v1555_v55 = vld [vmem:[#allocation2 + $0xf9] sm:$0xff] }
 0x124   : > { %1692 = vrot.lane.b32.xlu0 %v9008_v12, %s10440_s29  ;;  %v9138_v25 = vpack.c.bf16 %v1555_v55, %v1555_v55 }
 0x125   : > { %v1936_v17 = vpop.permute.xlu1 %1935 }
 0x126   : > { %2025 = vst.msk [vmem:[#allocation5 + $0x1c] sm:$0xf] %vm2017_vm12, %v1936_v17  ;;  %v2192_v26 = vpop.permute.xlu0 %2191 }
 0x127   : > { %2282 = vst.msk [vmem:[#allocation5 + $0x18] sm:$0xf] %vm2275_vm13, %v2192_v26  ;;  %1690 = vrot.lane.b32.xlu1 %v8947_v57, %s10440_s29  ;;  %v9142_v26 = vpack.c.bf16 %v1811_v24, %v1811_v24 }
 0x128   : > { %1945 = vrot.lane.b32.xlu0 %v8958_v62, %s10441_s25 }
 0x129   : > { %v2190_v30 = vpop.permute.xlu1 %2189 }
 0x12a   : > { %2281 = vst.msk [vmem:[#allocation5 + $0x14] sm:$0xf] %vm2275_vm13, %v2190_v30  ;;  %v2445_v33 = vpop.permute.xlu0 %2444  ;;  %v7958_v30 = vunpack.c.l.bf16 %v7977_v29 }
 0x12b   : > { %2537 = vst.msk [vmem:[#allocation5 + $0x10] sm:$0xf] %vm2532_vm14, %v2445_v33  ;;  %1694 = vrot.lane.b32.xlu1 %v9020_v27, %s10440_s29 }
 0x12c   : > { %1949 = vrot.lane.b32.xlu0 %v9024_v28, %s10441_s25  ;;  %568 = vst.msk [vmem:[#allocation2 + $0x169] sm:$0xff] %vm539_vm5, %v7958_v30 }
 0x12d   : > { %v2194_v35 = vpop.permute.xlu1 %2193 }
 0x12e   : > { %2283 = vst.msk [vmem:[#allocation5 + $0x1c] sm:$0xf] %vm2275_vm13, %v2194_v35  ;;  %v2449_v37 = vpop.permute.xlu0 %2448  ;;  %v9156_v35 = vpack.c.bf16 %v1812_v31, %v1812_v31  ;;  %v2073_v31 = vld [vmem:[#allocation2 + $0x138] sm:$0xff] }
 0x12f   : > { %2539 = vst.msk [vmem:[#allocation5 + $0x18] sm:$0xf] %vm2532_vm14, %v2449_v37  ;;  %1947 = vrot.lane.b32.xlu1 %v8971_v7, %s10441_s25 }
 0x130   : > { %2203 = vrot.lane.b32.xlu0 %v8768_v32, %s10442_s14  ;;  %v9055_v32 = vpack.c.bf16 %v2322_v44, %v2322_v44  ;;  %v592_v44 = vld [vmem:[#allocation2 + $0xf0] sm:$0xff] }
 0x131   : > { %v2447_v40 = vpop.permute.xlu1 %2446 }
 0x132   : > { %2538 = vst.msk [vmem:[#allocation5 + $0x14] sm:$0xf] %vm2532_vm14, %v2447_v40  ;;  %v2702_v41 = vpop.permute.xlu0 %2701 }
 0x133   : > { %2794 = vst.msk [vmem:[#allocation5 + $0x10] sm:$0xf] %vm2789_vm15, %v2702_v41  ;;  %1951 = vrot.lane.b32.xlu1 %v9038_v38, %s10441_s25  ;;  %v2326_v41 = vld [vmem:[#allocation2 + $0x109] sm:$0xff] }
 0x134   : > { %2207 = vrot.lane.b32.xlu0 %v8801_v47, %s10442_s14 }
 0x135   : > { %v2451_v42 = vpop.permute.xlu1 %2450 }
 0x136   : > { %2540 = vst.msk [vmem:[#allocation5 + $0x1c] sm:$0xf] %vm2532_vm14, %v2451_v42  ;;  %v910_v1 = vpop.permute.xlu0 %909 }
 0x137   : > { %998 = vst.msk [vmem:[#allocation5 + $0x20] sm:$0xf] %vm989_vm8, %v910_v1  ;;  %2205 = vrot.lane.b32.xlu1 %v8777_v36, %s10442_s14  ;;  %v7576_v1 = vpack.c.bf16 %v592_v44, %v592_v44  ;;  %v596_v44 = vld [vmem:[#allocation2 + $0x120] sm:$0xff] }
 0x138   : > { %2460 = vrot.lane.b32.xlu0 %v9008_v12, %s10419_s12 }
 0x139   : > { %v2704_v45 = vpop.permute.xlu1 %2703  ;;  %753 = vst.msk [vmem:[#allocation5 + $0x50] sm:$0xf] %vm732_vm6, %v7576_v1 }
 0x13a   : > { %2795 = vst.msk [vmem:[#allocation5 + $0x14] sm:$0xf] %vm2789_vm15, %v2704_v45  ;;  %v2706_v46 = vpop.permute.xlu0 %2705 }
 0x13b   : > { %2796 = vst.msk [vmem:[#allocation5 + $0x18] sm:$0xf] %vm2789_vm15, %v2706_v46  ;;  %2209 = vrot.lane.b32.xlu1 %v8812_v52, %s10442_s14 }
 0x13c   : > { %2464 = vrot.lane.b32.xlu0 %v9055_v32, %s10419_s12 }
 0x13d   : > { %v912_v49 = vpop.permute.xlu1 %911 }
 0x13e   : > { %999 = vst.msk [vmem:[#allocation5 + $0x24] sm:$0xf] %vm989_vm8, %v912_v49  ;;  %v914_v36 = vpop.permute.xlu0 %913  ;;  %v593_v49 = vld [vmem:[#allocation2 + $0xf8] sm:$0xff] }
 0x13f   : > { %1000 = vst.msk [vmem:[#allocation5 + $0x28] sm:$0xf] %vm989_vm8, %v914_v36  ;;  %2462 = vrot.lane.b32.xlu1 %v9020_v27, %s10419_s12 }
 0x140   : > { %2717 = vrot.lane.b32.xlu0 %v9024_v28, %s10431_s30 }
 0x141   : > { %v2708_v2 = vpop.permute.xlu1 %2707  ;;  %v8190_v51 = vld [vmem:[#allocation5 + $0x10] sm:$0xff]  }
 0x142   : > { %2797 = vst.msk [vmem:[#allocation5 + $0x1c] sm:$0xf] %vm2789_vm15, %v2708_v2  ;;  %v1167_v57 = vpop.permute.xlu0 %1166  ;;  %8070 = vmatprep.mubr.msk.bf16.mxu0 %vm2977_vm0, %v8190_v51  ;;  %v9184_v51 = vpack.c.bf16 %v2327_v48, %v2327_v48 }
 0x143   : > { %1255 = vst.msk [vmem:[#allocation5 + $0x20] sm:$0xf] %vm1246_vm9, %v1167_v57  ;;  %2466 = vrot.lane.b32.xlu1 %v9067_v53, %s10419_s12 }
 0x144   : > { %925 = vrot.lane.b32.xlu0 %v9008_v12, %s8337_s22 }
 0x145   : > { %v916_v59 = vpop.permute.xlu1 %915 }
 0x146   : > { %1001 = vst.msk [vmem:[#allocation5 + $0x2c] sm:$0xf] %vm989_vm8, %v916_v59  ;;  %v1171_v60 = vpop.permute.xlu0 %1170 }
 0x147   : > { %1257 = vst.msk [vmem:[#allocation5 + $0x28] sm:$0xf] %vm1246_vm9, %v1171_v60  ;;  %2719 = vrot.lane.b32.xlu1 %v9038_v38, %s10431_s30 }
 0x148   : > { %2721 = vrot.lane.b32.xlu0 %v9078_v58, %s10431_s30 }
 0x149   : > { %v1169_v62 = vpop.permute.xlu1 %1168  ;;  %v8191_v63 = vld [vmem:[#allocation5 + $0x18] sm:$0xff]  }
 0x14a   : > { %1256 = vst.msk [vmem:[#allocation5 + $0x24] sm:$0xf] %vm1246_vm9, %v1169_v62  ;;  %v1424_v0 = vpop.permute.xlu0 %1423  ;;  %8071 = vmatmul.mubr.msk.bf16.gmra.mxu0 %vm2977_vm0, %v8191_v63  ;;  %v2584_v63 = vld [vmem:[#allocation2 + $0x112] sm:$0xff] }
 0x14b   : > { %1512 = vst.msk [vmem:[#allocation5 + $0x20] sm:$0xf] %vm10424_vm10, %v1424_v0  ;;  %927 = vrot.lane.b32.xlu1 %v9020_v27, %s8337_s22 }
 0x14c   : > { %929 = vrot.lane.b32.xlu0 %v9055_v32, %s8337_s22 }
 0x14d   : > { %v1173_v4 = vpop.permute.xlu1 %1172 }
 0x14e   : > { %1258 = vst.msk [vmem:[#allocation5 + $0x2c] sm:$0xf] %vm1246_vm9, %v1173_v4  ;;  %v1428_v5 = vpop.permute.xlu0 %1427 }
 0x14f   : > { %1514 = vst.msk [vmem:[#allocation5 + $0x28] sm:$0xf] %vm10424_vm10, %v1428_v5  ;;  %2723 = vrot.lane.b32.xlu1 %v9091_v3, %s10431_s30  ;;  %v9209_v5 = vpack.c.bf16 %v2584_v63, %v2584_v63 }
 0x150   : > { %1182 = vrot.lane.b32.xlu0 %v9024_v28, %s10425_s24 }
 0x151   : > { %v1426_v6 = vpop.permute.xlu1 %1425 }
 0x152   : > { %1513 = vst.msk [vmem:[#allocation5 + $0x24] sm:$0xf] %vm10424_vm10, %v1426_v6  ;;  %v1681_v7 = vpop.permute.xlu0 %1680 }
 0x153   : > { %1769 = vst.msk [vmem:[#allocation5 + $0x20] sm:$0xf] %vm1760_vm11, %v1681_v7  ;;  %931 = vrot.lane.b32.xlu1 %v9067_v53, %s8337_s22 }
 0x154   : > { %1186 = vrot.lane.b32.xlu0 %v9078_v58, %s10425_s24 }
 0x155   : > { %v1430_v10 = vpop.permute.xlu1 %1429 }
 0x156   : > { %1515 = vst.msk [vmem:[#allocation5 + $0x2c] sm:$0xf] %vm10424_vm10, %v1430_v10  ;;  %v1685_v13 = vpop.permute.xlu0 %1684  ;;  %v7978_v10 = vld [vmem:[%s8468_s15 + $0x78] sm:$0xff]   ;;  %s8349_s15 = smov 112  }
 0x157   : > { %1771 = vst.msk [vmem:[#allocation5 + $0x28] sm:$0xf] %vm1760_vm11, %v1685_v13  ;;  %1184 = vrot.lane.b32.xlu1 %v9038_v38, %s10425_s24  ;;  %v7959_v38 = vunpack.c.h.bf16 %v7977_v29  ;;  %v7962_v11 = vunpack.c.l.bf16 %v7978_v10  ;;  %v7963_v19 = vunpack.c.h.bf16 %v7978_v10  ;;  %v1816_v29 = vld [vmem:[#allocation2 + $0x12a] sm:$0xff] }
 0x158   : > { %1439 = vrot.lane.b32.xlu0 %v8801_v47, %s10439_s13 }
 0x159   : > { %v1683_v15 = vpop.permute.xlu1 %1682  ;;  %569 = vst.msk [vmem:[#allocation2 + $0x171] sm:$0xff] %vm539_vm5, %v7959_v38  ;;  %570 = vst.msk [vmem:[#allocation2 + $0x181] sm:$0xff] %vm539_vm5, %v7962_v11  ;;  %v2588_v11 = vld [vmem:[#allocation2 + $0x142] sm:$0xff] }
 0x15a   : > { %1770 = vst.msk [vmem:[#allocation5 + $0x24] sm:$0xf] %vm1760_vm11, %v1683_v15  ;;  %v1938_v18 = vpop.permute.xlu0 %1937 }
 0x15b   : > { %2026 = vst.msk [vmem:[#allocation5 + $0x20] sm:$0xf] %vm2017_vm12, %v1938_v18  ;;  %1188 = vrot.lane.b32.xlu1 %v9091_v3, %s10425_s24 }
 0x15c   : > { %1443 = vrot.lane.b32.xlu0 %v7670_v14, %s10439_s13  ;;  %571 = vst.msk [vmem:[#allocation2 + $0x189] sm:$0xff] %vm539_vm5, %v7963_v19  ;;  %v9337_v19 = vpack.c.bf16 %v2588_v11, %v2588_v11  ;;  %vm4639_vm5 = vcmask 1045509  }
 0x15d   : > { %v1687_v20 = vpop.permute.xlu1 %1686 }
 0x15e   : > { %1772 = vst.msk [vmem:[#allocation5 + $0x2c] sm:$0xf] %vm1760_vm11, %v1687_v20  ;;  %v1942_v47 = vpop.permute.xlu0 %1941 }
 0x15f   : > { %2028 = vst.msk [vmem:[#allocation5 + $0x28] sm:$0xf] %vm2017_vm12, %v1942_v47  ;;  %1441 = vrot.lane.b32.xlu1 %v8812_v52, %s10439_s13 }
 0x160   : > { %1696 = vrot.lane.b32.xlu0 %v9055_v32, %s10440_s29  ;;  %v9171_v32 = vpack.c.bf16 %v2326_v41, %v2326_v41  ;;  %v2330_v41 = vld [vmem:[#allocation2 + $0x139] sm:$0xff] }
 0x161   : > { %v1940_v12 = vpop.permute.xlu1 %1939 }
 0x162   : > { %2027 = vst.msk [vmem:[#allocation5 + $0x24] sm:$0xf] %vm2017_vm12, %v1940_v12  ;;  %v2196_v23 = vpop.permute.xlu0 %2195 }
 0x163   : > { %2284 = vst.msk [vmem:[#allocation5 + $0x20] sm:$0xf] %vm2275_vm13, %v2196_v23  ;;  %1445 = vrot.lane.b32.xlu1 %v7671_v21, %s10439_s13 }
 0x164   : > { %1700 = vrot.lane.b32.xlu0 %v9127_v22, %s10440_s29 }
 0x165   : > { %v1944_v52 = vpop.permute.xlu1 %1943 }
 0x166   : > { %2029 = vst.msk [vmem:[#allocation5 + $0x2c] sm:$0xf] %vm2017_vm12, %v1944_v52  ;;  %v2200_v17 = vpop.permute.xlu0 %2199  ;;  %v1559_v52 = vld [vmem:[#allocation2 + $0x129] sm:$0xff] }
 0x167   : > { %2286 = vst.msk [vmem:[#allocation5 + $0x28] sm:$0xf] %vm2275_vm13, %v2200_v17  ;;  %1698 = vrot.lane.b32.xlu1 %v9067_v53, %s10440_s29  ;;  %v7577_v53 = vpack.c.bf16 %v593_v49, %v593_v49  ;;  %v2331_v49 = vld [vmem:[#allocation2 + $0x141] sm:$0xff] }
 0x168   : > { %1953 = vrot.lane.b32.xlu0 %v9078_v58, %s10441_s25  ;;  %v2583_v58 = vld [vmem:[#allocation2 + $0x10a] sm:$0xff] }
 0x169   : > { %v2198_v27 = vpop.permute.xlu1 %2197  ;;  %754 = vst.msk [vmem:[#allocation5 + $0x54] sm:$0xf] %vm732_vm6, %v7577_v53  ;;  %v9196_v60 = vpack.c.bf16 %v2583_v58, %v2583_v58 }
 0x16a   : > { %2285 = vst.msk [vmem:[#allocation5 + $0x24] sm:$0xf] %vm2275_vm13, %v2198_v27  ;;  %v2453_v28 = vpop.permute.xlu0 %2452 }
 0x16b   : > { %2541 = vst.msk [vmem:[#allocation5 + $0x20] sm:$0xf] %vm2532_vm14, %v2453_v28  ;;  %1702 = vrot.lane.b32.xlu1 %v9138_v25, %s10440_s29 }
 0x16c   : > { %1957 = vrot.lane.b32.xlu0 %v9142_v26, %s10441_s25 }
 0x16d   : > { %v2202_v33 = vpop.permute.xlu1 %2201 }
 0x16e   : > { %2287 = vst.msk [vmem:[#allocation5 + $0x2c] sm:$0xf] %vm2275_vm13, %v2202_v33  ;;  %v2457_v34 = vpop.permute.xlu0 %2456 }
 0x16f   : > { %2543 = vst.msk [vmem:[#allocation5 + $0x28] sm:$0xf] %vm2532_vm14, %v2457_v34  ;;  %1955 = vrot.lane.b32.xlu1 %v9091_v3, %s10441_s25  ;;  %v9272_v34 = vpack.c.bf16 %v1816_v29, %v1816_v29 }
 0x170   : > { %2211 = vrot.lane.b32.xlu0 %v7670_v14, %s10442_s14  ;;  %v1301_v14 = vld [vmem:[#allocation2 + $0x120] sm:$0xff] }
 0x171   : > { %v2455_v37 = vpop.permute.xlu1 %2454  ;;  %v7674_v16 = vpack.c.bf16 %v1301_v14, %v1301_v14  ;;  %v9330_v14 = vld [vmem:[%s10400_s2] ss:$0 sm:$0xff] }
 0x172   : > { %2542 = vst.msk [vmem:[#allocation5 + $0x24] sm:$0xf] %vm2532_vm14, %v2455_v37  ;;  %v2710_v39 = vpop.permute.xlu0 %2709 }
 0x173   : > { %2798 = vst.msk [vmem:[#allocation5 + $0x20] sm:$0xf] %vm2789_vm15, %v2710_v39  ;;  %1959 = vrot.lane.b32.xlu1 %v9156_v35, %s10441_s25  ;;  %v2074_v39 = vld [vmem:[#allocation2 + $0x140] sm:$0xff] }
 0x174   : > { %2215 = vrot.lane.b32.xlu0 %v8919_v43, %s10442_s14  ;;  %v9286_v1 = vpack.c.bf16 %v2074_v39, %v2074_v39 }
 0x175   : > { %v2459_v40 = vpop.permute.xlu1 %2458 }
 0x176   : > { %2544 = vst.msk [vmem:[#allocation5 + $0x2c] sm:$0xf] %vm2532_vm14, %v2459_v40  ;;  %v918_v42 = vpop.permute.xlu0 %917 }
 0x177   : > { %1002 = vst.msk [vmem:[#allocation5 + $0x30] sm:$0xf] %vm989_vm8, %v918_v42  ;;  %2213 = vrot.lane.b32.xlu1 %v7671_v21, %s10442_s14  ;;  %v1558_v21 = vld [vmem:[#allocation2 + $0x121] sm:$0xff] }
 0x178   : > { %2468 = vrot.lane.b32.xlu0 %v9127_v22, %s10419_s12  ;;  %v9245_v12 = vpack.c.bf16 %v1558_v21, %v1558_v21 }
 0x179   : > { %v2712_v45 = vpop.permute.xlu1 %2711 }
 0x17a   : > { %2799 = vst.msk [vmem:[#allocation5 + $0x24] sm:$0xf] %vm2789_vm15, %v2712_v45  ;;  %v2714_v46 = vpop.permute.xlu0 %2713  ;;  %v9290_v45 = vpack.c.bf16 %v2330_v41, %v2330_v41 }
 0x17b   : > { %2800 = vst.msk [vmem:[#allocation5 + $0x28] sm:$0xf] %vm2789_vm15, %v2714_v46  ;;  %2217 = vrot.lane.b32.xlu1 %v8933_v50, %s10442_s14 }
 0x17c   : > { %2472 = vrot.lane.b32.xlu0 %v9171_v32, %s10419_s12 }
 0x17d   : > { %v920_v36 = vpop.permute.xlu1 %919 }
 0x17e   : > { %1003 = vst.msk [vmem:[#allocation5 + $0x34] sm:$0xf] %vm989_vm8, %v920_v36  ;;  %v922_v2 = vpop.permute.xlu0 %921  ;;  %v597_v36 = vld [vmem:[#allocation2 + $0x128] sm:$0xff] }
 0x17f   : > { %1004 = vst.msk [vmem:[#allocation5 + $0x38] sm:$0xf] %vm989_vm8, %v922_v2  ;;  %2470 = vrot.lane.b32.xlu1 %v9138_v25, %s10419_s12  ;;  %v7581_v2 = vpack.c.bf16 %v597_v36, %v597_v36 }
 0x180   : > { %2725 = vrot.lane.b32.xlu0 %v9142_v26, %s10431_s30 }
 0x181   : > { %v2716_v56 = vpop.permute.xlu1 %2715  ;;  %v8192_v57 = vld [vmem:[#allocation5 + $0x20] sm:$0xff]   ;;  %758 = vst.msk [vmem:[#allocation5 + $0x64] sm:$0xf] %vm732_vm6, %v7581_v2 }
 0x182   : > { %2801 = vst.msk [vmem:[#allocation5 + $0x2c] sm:$0xf] %vm2789_vm15, %v2716_v56  ;;  %v1175_v59 = vpop.permute.xlu0 %1174  ;;  %8074 = vmatprep.mubr.msk.bf16.mxu0 %vm2977_vm0, %v8192_v57  ;;  %v598_v56 = vld [vmem:[#allocation2 + $0x138] sm:$0xff]  ;;  %v9303_v57 = vpack.c.bf16 %v2331_v49, %v2331_v49 }
 0x183   : > { %1259 = vst.msk [vmem:[#allocation5 + $0x30] sm:$0xf] %vm1246_vm9, %v1175_v59  ;;  %2474 = vrot.lane.b32.xlu1 %v9184_v51, %s10419_s12  ;;  %v7582_v58 = vpack.c.bf16 %v598_v56, %v598_v56 }
 0x184   : > { %933 = vrot.lane.b32.xlu0 %v9127_v22, %s8337_s22  ;;  %v7675_v22 = vpack.c.bf16 %v1302_v54, %v1302_v54 }
 0x185   : > { %v924_v61 = vpop.permute.xlu1 %923  ;;  %759 = vst.msk [vmem:[#allocation5 + $0x68] sm:$0xf] %vm732_vm6, %v7582_v58 }
 0x186   : > { %1005 = vst.msk [vmem:[#allocation5 + $0x3c] sm:$0xf] %vm989_vm8, %v924_v61  ;;  %v1179_v62 = vpop.permute.xlu0 %1178  ;;  %v2587_v61 = vld [vmem:[#allocation2 + $0x13a] sm:$0xff] }
 0x187   : > { %1261 = vst.msk [vmem:[#allocation5 + $0x38] sm:$0xf] %vm1246_vm9, %v1179_v62  ;;  %2727 = vrot.lane.b32.xlu1 %v9156_v35, %s10431_s30  ;;  %v9316_v63 = vpack.c.bf16 %v2587_v61, %v2587_v61 }
 0x188   : > { %2729 = vrot.lane.b32.xlu0 %v9196_v60, %s10431_s30 }
 0x189   : > { %v1177_v0 = vpop.permute.xlu1 %1176  ;;  %v8193_v3 = vld [vmem:[#allocation5 + $0x28] sm:$0xff]  }
 0x18a   : > { %1260 = vst.msk [vmem:[#allocation5 + $0x34] sm:$0xf] %vm1246_vm9, %v1177_v0  ;;  %v1432_v4 = vpop.permute.xlu0 %1431  ;;  %8075 = vmatmul.mubr.msk.bf16.gmra.mxu0 %vm2977_vm0, %v8193_v3  ;;  %v8345_v0 = vmov 1983009808  }
 0x18b   : > { %1516 = vst.msk [vmem:[#allocation5 + $0x30] sm:$0xf] %vm10424_vm10, %v1432_v4  ;;  %935 = vrot.lane.b32.xlu1 %v9138_v25, %s8337_s22  ;;  %v9256_v25 = vpack.c.bf16 %v1559_v52, %v1559_v52  ;;  %v3257_v3 = vunpack.c.l.s4 %v8345_v0  ;;  %v3259_v4 = vlaneseq }
 0x18c   : > { %937 = vrot.lane.b32.xlu0 %v9171_v32, %s8337_s22 }
 0x18d   : > { %v1181_v6 = vpop.permute.xlu1 %1180  ;;  %v9325_v10 = vshrl.u32 %v3259_v4, 7 }
 0x18e   : > { %1262 = vst.msk [vmem:[#allocation5 + $0x3c] sm:$0xf] %vm1246_vm9, %v1181_v6  ;;  %v1436_v7 = vpop.permute.xlu0 %1435 }
 0x18f   : > { %1518 = vst.msk [vmem:[#allocation5 + $0x38] sm:$0xf] %vm10424_vm10, %v1436_v7  ;;  %2731 = vrot.lane.b32.xlu1 %v9209_v5, %s10431_s30 }
 0x190   : > { %1190 = vrot.lane.b32.xlu0 %v9142_v26, %s10425_s24 }
 0x191   : > { %v1434_v8 = vpop.permute.xlu1 %1433 }
 0x192   : > { %1517 = vst.msk [vmem:[#allocation5 + $0x34] sm:$0xf] %vm10424_vm10, %v1434_v8  ;;  %v1689_v9 = vpop.permute.xlu0 %1688 }
 0x193   : > { %1773 = vst.msk [vmem:[#allocation5 + $0x30] sm:$0xf] %vm1760_vm11, %v1689_v9  ;;  %939 = vrot.lane.b32.xlu1 %v9184_v51, %s8337_s22  ;;  %v3258_v9 = vunpack.c.0.s8 %v3257_v3 }
 0x194   : > { %1194 = vrot.lane.b32.xlu0 %v9196_v60, %s10425_s24 }
 0x195   : > { %v1438_v13 = vpop.permute.xlu1 %1437  ;;  %v9341_v54 = vsub.s32 %v3258_v9, %v9325_v10 }
 0x196   : > { %1519 = vst.msk [vmem:[#allocation5 + $0x3c] sm:$0xf] %vm10424_vm10, %v1438_v13  ;;  %v1693_v15 = vpop.permute.xlu0 %1692 }
 0x197   : > { %1775 = vst.msk [vmem:[#allocation5 + $0x38] sm:$0xf] %vm1760_vm11, %v1693_v15  ;;  %1192 = vrot.lane.b32.xlu1 %v9156_v35, %s10425_s24  ;;  %v9275_v35 = vpack.c.bf16 %v2073_v31, %v2073_v31  ;;  %v9357_v31 = vsub.s32 0, %v9325_v10 }
 0x198   : > { %1447 = vrot.lane.b32.xlu0 %v8919_v43, %s10439_s13 }
 0x199   : > { %v1691_v18 = vpop.permute.xlu1 %1690 }
 0x19a   : > { %1774 = vst.msk [vmem:[#allocation5 + $0x34] sm:$0xf] %vm1760_vm11, %v1691_v18  ;;  %v1946_v20 = vpop.permute.xlu0 %1945 }
 0x19b   : > { %2030 = vst.msk [vmem:[#allocation5 + $0x30] sm:$0xf] %vm2017_vm12, %v1946_v20  ;;  %1196 = vrot.lane.b32.xlu1 %v9209_v5, %s10425_s24 }
 0x19c   : > { %1451 = vrot.lane.b32.xlu0 %v7674_v16, %s10439_s13 }
 0x19d   : > { %v1695_v47 = vpop.permute.xlu1 %1694 }
 0x19e   : > { %1776 = vst.msk [vmem:[#allocation5 + $0x3c] sm:$0xf] %vm1760_vm11, %v1695_v47  ;;  %v1950_v43 = vpop.permute.xlu0 %1949 }
 0x19f   : > { %2032 = vst.msk [vmem:[#allocation5 + $0x38] sm:$0xf] %vm2017_vm12, %v1950_v43  ;;  %1449 = vrot.lane.b32.xlu1 %v8933_v50, %s10439_s13  ;;  %v1815_v50 = vld [vmem:[#allocation2 + $0x122] sm:$0xff] }
 0x1a0   : > { %1704 = vrot.lane.b32.xlu0 %v9171_v32, %s10440_s29  ;;  %v9260_v26 = vpack.c.bf16 %v1815_v50, %v1815_v50  ;;  %v7580_v32 = vpack.c.bf16 %v596_v44, %v596_v44 }
 0x1a1   : > { %v1948_v23 = vpop.permute.xlu1 %1947 }
 0x1a2   : > { %2031 = vst.msk [vmem:[#allocation5 + $0x34] sm:$0xf] %vm2017_vm12, %v1948_v23  ;;  %v2204_v55 = vpop.permute.xlu0 %2203 }
 0x1a3   : > { %2288 = vst.msk [vmem:[#allocation5 + $0x30] sm:$0xf] %vm2275_vm13, %v2204_v55  ;;  %1453 = vrot.lane.b32.xlu1 %v7675_v22, %s10439_s13 }
 0x1a4   : > { %1708 = vrot.lane.b32.xlu0 %v9245_v12, %s10440_s29  ;;  %757 = vst.msk [vmem:[#allocation5 + $0x60] sm:$0xf] %vm732_vm6, %v7580_v32 }
 0x1a5   : > { %v1952_v24 = vpop.permute.xlu1 %1951 }
 0x1a6   : > { %2033 = vst.msk [vmem:[#allocation5 + $0x3c] sm:$0xf] %vm2017_vm12, %v1952_v24  ;;  %v2208_v17 = vpop.permute.xlu0 %2207 }
 0x1a7   : > { %2290 = vst.msk [vmem:[#allocation5 + $0x38] sm:$0xf] %vm2275_vm13, %v2208_v17  ;;  %1706 = vrot.lane.b32.xlu1 %v9184_v51, %s10440_s29  ;;  %v1305_v17 = vld [vmem:[#allocation2 + $0x150] sm:$0xff] }
 0x1a8   : > { %1961 = vrot.lane.b32.xlu0 %v9196_v60, %s10441_s25 }
 0x1a9   : > { %v2206_v27 = vpop.permute.xlu1 %2205 }
 0x1aa   : > { %2289 = vst.msk [vmem:[#allocation5 + $0x34] sm:$0xf] %vm2275_vm13, %v2206_v27  ;;  %v2461_v28 = vpop.permute.xlu0 %2460 }
 0x1ab   : > { %2545 = vst.msk [vmem:[#allocation5 + $0x30] sm:$0xf] %vm2532_vm14, %v2461_v28  ;;  %1710 = vrot.lane.b32.xlu1 %v9256_v25, %s10440_s29 }
 0x1ac   : > { %1965 = vrot.lane.b32.xlu0 %v9260_v26, %s10441_s25 }
 0x1ad   : > { %v2210_v30 = vpop.permute.xlu1 %2209 }
 0x1ae   : > { %2291 = vst.msk [vmem:[#allocation5 + $0x3c] sm:$0xf] %vm2275_vm13, %v2210_v30  ;;  %v2465_v33 = vpop.permute.xlu0 %2464 }
 0x1af   : > { %2547 = vst.msk [vmem:[#allocation5 + $0x38] sm:$0xf] %vm2532_vm14, %v2465_v33  ;;  %1963 = vrot.lane.b32.xlu1 %v9209_v5, %s10441_s25  ;;  %v599_v5 = vld [vmem:[#allocation2 + $0x140] sm:$0xff] }
 0x1b0   : > { %2219 = vrot.lane.b32.xlu0 %v7674_v16, %s10442_s14  ;;  %v7583_v7 = vpack.c.bf16 %v599_v5, %v599_v5 }
 0x1b1   : > { %v2463_v37 = vpop.permute.xlu1 %2462 }
 0x1b2   : > { %2546 = vst.msk [vmem:[#allocation5 + $0x34] sm:$0xf] %vm2532_vm14, %v2463_v37  ;;  %v2718_v38 = vpop.permute.xlu0 %2717 }
 0x1b3   : > { %2802 = vst.msk [vmem:[#allocation5 + $0x30] sm:$0xf] %vm2789_vm15, %v2718_v38  ;;  %1967 = vrot.lane.b32.xlu1 %v9272_v34, %s10441_s25 }
 0x1b4   : > { %2223 = vrot.lane.b32.xlu0 %v9275_v35, %s10442_s14  ;;  %760 = vst.msk [vmem:[#allocation5 + $0x6c] sm:$0xf] %vm732_vm6, %v7583_v7 }
 0x1b5   : > { %v2467_v40 = vpop.permute.xlu1 %2466 }
 0x1b6   : > { %2548 = vst.msk [vmem:[#allocation5 + $0x3c] sm:$0xf] %vm2532_vm14, %v2467_v40  ;;  %v926_v42 = vpop.permute.xlu0 %925 }
 0x1b7   : > { %1006 = vst.msk [vmem:[#allocation5 + $0x40] sm:$0xf] %vm989_vm8, %v926_v42  ;;  %2221 = vrot.lane.b32.xlu1 %v7675_v22, %s10442_s14 }
 0x1b8   : > { %2476 = vrot.lane.b32.xlu0 %v9245_v12, %s10419_s12 }
 0x1b9   : > { %v2720_v46 = vpop.permute.xlu1 %2719 }
 0x1ba   : > { %2803 = vst.msk [vmem:[#allocation5 + $0x34] sm:$0xf] %vm2789_vm15, %v2720_v46  ;;  %v2722_v48 = vpop.permute.xlu0 %2721 }
 0x1bb   : > { %2804 = vst.msk [vmem:[#allocation5 + $0x38] sm:$0xf] %vm2789_vm15, %v2722_v48  ;;  %2225 = vrot.lane.b32.xlu1 %v9286_v1, %s10442_s14 }
 0x1bc   : > { %2480 = vrot.lane.b32.xlu0 %v9290_v45, %s10419_s12 }
 0x1bd   : > { %v928_v53 = vpop.permute.xlu1 %927 }
 0x1be   : > { %1007 = vst.msk [vmem:[#allocation5 + $0x44] sm:$0xf] %vm989_vm8, %v928_v53  ;;  %v930_v51 = vpop.permute.xlu0 %929 }
 0x1bf   : > { %1008 = vst.msk [vmem:[#allocation5 + $0x48] sm:$0xf] %vm989_vm8, %v930_v51  ;;  %2478 = vrot.lane.b32.xlu1 %v9256_v25, %s10419_s12 }
 0x1c0   : > { %2733 = vrot.lane.b32.xlu0 %v9260_v26, %s10431_s30 }
 0x1c1   : > { %v2724_v59 = vpop.permute.xlu1 %2723  ;;  %v8194_v60 = vld [vmem:[#allocation5 + $0x30] sm:$0xff]  }
 0x1c2   : > { %2805 = vst.msk [vmem:[#allocation5 + $0x3c] sm:$0xf] %vm2789_vm15, %v2724_v59  ;;  %v1183_v62 = vpop.permute.xlu0 %1182  ;;  %8078 = vmatprep.mubr.msk.bf16.mxu0 %vm2977_vm0, %v8194_v60 }
 0x1c3   : > { %1263 = vst.msk [vmem:[#allocation5 + $0x40] sm:$0xf] %vm1246_vm9, %v1183_v62  ;;  %2482 = vrot.lane.b32.xlu1 %v9303_v57, %s10419_s12  ;;  %s10443_s12 = smov 56  }
 0x1c4   : > { %941 = vrot.lane.b32.xlu0 %v9245_v12, %s8337_s22 }
 0x1c5   : > { %v932_v6 = vpop.permute.xlu1 %931 }
 0x1c6   : > { %1009 = vst.msk [vmem:[#allocation5 + $0x4c] sm:$0xf] %vm989_vm8, %v932_v6  ;;  %v1187_v8 = vpop.permute.xlu0 %1186 }
 0x1c7   : > { %1265 = vst.msk [vmem:[#allocation5 + $0x48] sm:$0xf] %vm1246_vm9, %v1187_v8  ;;  %2735 = vrot.lane.b32.xlu1 %v9272_v34, %s10431_s30 }
 0x1c8   : > { %2737 = vrot.lane.b32.xlu0 %v9316_v63, %s10431_s30 }
 0x1c9   : > { %v1185_v13 = vpop.permute.xlu1 %1184  ;;  %v8195_v15 = vld [vmem:[#allocation5 + $0x38] sm:$0xff]  }
 0x1ca   : > { %1264 = vst.msk [vmem:[#allocation5 + $0x44] sm:$0xf] %vm1246_vm9, %v1185_v13  ;;  %v1440_v16 = vpop.permute.xlu0 %1439  ;;  %v8068_v18 = vpop.f32.mrf.mxu0  ;;  %8079 = vmatmul.mubr.msk.bf16.gmra.mxu0 %vm2977_vm0, %v8195_v15 }
 0x1cb   : > { %1520 = vst.msk [vmem:[#allocation5 + $0x40] sm:$0xf] %vm10424_vm10, %v1440_v16  ;;  %943 = vrot.lane.b32.xlu1 %v9256_v25, %s8337_s22  ;;  %v3073_v20 = vadd.f32 %v8068_v18, %v9330_v14 }
 0x1cc   : > { %945 = vrot.lane.b32.xlu0 %v9290_v45, %s8337_s22  ;;  %v3064_v21 = vpop.f32.mrf.mxu0 }
 0x1cd   : > { %v1189_v47 = vpop.permute.xlu1 %1188  ;;  %v3193_v43 = vmax.f32 %v3073_v20, 0.0  ;;  %v3065_v22 = vadd.f32 %v9330_v14, %v3064_v21 }
 0x1ce   : > { %1266 = vst.msk [vmem:[#allocation5 + $0x4c] sm:$0xf] %vm1246_vm9, %v1189_v47  ;;  %v1444_v12 = vpop.permute.xlu0 %1443  ;;  %v8069_v23 = vpop.f32.mrf.mxu0 }
 0x1cf   : > { %1522 = vst.msk [vmem:[#allocation5 + $0x48] sm:$0xf] %vm10424_vm10, %v1444_v12  ;;  %2739 = vrot.lane.b32.xlu1 %v9337_v19, %s10431_s30  ;;  %v3289_v55 = vcombine.high %v3193_v43, %v3193_v43  ;;  %v3296_v52 = vrot.slane %v3193_v43, %v9341_v54  ;;  %v3191_v24 = vmax.f32 %v3065_v22, 0.0  ;;  %v3076_v50 = vadd.f32 %v8069_v23, %v9330_v14 }
 0x1d0   : > { %1198 = vrot.lane.b32.xlu0 %v9260_v26, %s10425_s24  ;;  %v3067_v27 = vpop.f32.mrf.mxu0  ;;  %v9364_v26 = vpack.c.bf16 %v1305_v17, %v1305_v17  ;;  %v1562_v17 = vld [vmem:[#allocation2 + $0x151] sm:$0xff] }
 0x1d1   : > { %v1442_v25 = vpop.permute.xlu1 %1441  ;;  %v3303_v28 = vrot.slane %v3289_v55, %v9341_v54  ;;  %v3255_v29 = vcombine.high %v3191_v24, %v3191_v24  ;;  %v3262_v30 = vrot.slane %v3191_v24, %v9341_v54  ;;  %v3194_v37 = vmax.f32 %v3076_v50, 0.0 }
 0x1d2   : > { %1521 = vst.msk [vmem:[#allocation5 + $0x44] sm:$0xf] %vm10424_vm10, %v1442_v25  ;;  %v1697_v33 = vpop.permute.xlu0 %1696  ;;  %v3068_v38 = vadd.f32 %v9330_v14, %v3067_v27  ;;  %v3304_v39 = vcombine.high %v3296_v52, %v3296_v52 }
 0x1d3   : > { %1777 = vst.msk [vmem:[#allocation5 + $0x40] sm:$0xf] %vm1760_vm11, %v1697_v33  ;;  %947 = vrot.lane.b32.xlu1 %v9303_v57, %s8337_s22  ;;  %v3269_v40 = vrot.slane %v3255_v29, %v9341_v54  ;;  %v3270_v41 = vcombine.high %v3262_v30, %v3262_v30  ;;  %v3927_v42 = vmax.f32 %v3262_v30, %v3296_v52 }
 0x1d4   : > { %1202 = vrot.lane.b32.xlu0 %v9316_v63, %s10425_s24  ;;  %v3305_v44 = vcombine.high %v3303_v28, %v3303_v28  ;;  %v3306_v32 = vcombine.high %v3194_v37, %v3194_v37  ;;  %v3313_v46 = vrot.slane %v3194_v37, %v9341_v54  ;;  %v3192_v48 = vmax.f32 %v3068_v38, 0.0 }
 0x1d5   : > { %v1446_v49 = vpop.permute.xlu1 %1445  ;;  %v3271_v36 = vcombine.high %v3269_v40, %v3269_v40  ;;  %v3928_v53 = vmax.f32 %v3270_v41, %v3304_v39  ;;  %v3929_v2 = vmax.f32 %v3269_v40, %v3303_v28  ;;  %v7345_v51 = vrot.slane %v3927_v42, 9 }
 0x1d6   : > { %1523 = vst.msk [vmem:[#allocation5 + $0x4c] sm:$0xf] %vm10424_vm10, %v1446_v49  ;;  %v1701_v56 = vpop.permute.xlu0 %1700  ;;  %v3320_v58 = vrot.slane %v3306_v32, %v9341_v54  ;;  %v3272_v59 = vcombine.high %v3192_v48, %v3192_v48  ;;  %v3279_v60 = vrot.slane %v3192_v48, %v9341_v54  ;;  %v3321_v4 = vcombine.high %v3313_v46, %v3313_v46 }
 0x1d7   : > { %1779 = vst.msk [vmem:[#allocation5 + $0x48] sm:$0xf] %vm1760_vm11, %v1701_v56  ;;  %1200 = vrot.lane.b32.xlu1 %v9272_v34, %s10425_s24  ;;  %v3930_v61 = vmax.f32 %v3271_v36, %v3305_v44  ;;  %v7346_v62 = vrot.slane %v3928_v53, 9  ;;  %v7347_v0 = vrot.slane %v3929_v2, 9  ;;  %v4247_v3 = vmax.f32 %v3927_v42, %v7345_v51  ;;  %v1819_v56 = vld [vmem:[#allocation2 + $0x152] sm:$0xff] }
 0x1d8   : > { %1455 = vrot.lane.b32.xlu0 %v9275_v35, %s10439_s13  ;;  %v3286_v5 = vrot.slane %v3272_v59, %v9341_v54  ;;  %v3287_v6 = vcombine.high %v3279_v60, %v3279_v60  ;;  %v3931_v7 = vmax.f32 %v3279_v60, %v3313_v46  ;;  %v3322_v15 = vcombine.high %v3320_v58, %v3320_v58  ;;  %v1306_v35 = vld [vmem:[#allocation2 + $0x158] sm:$0xff] }
 0x1d9   : > { %v1699_v8 = vpop.permute.xlu1 %1698  ;;  %v7348_v9 = vrot.slane %v3930_v61, 9  ;;  %v4248_v11 = vmax.f32 %v3928_v53, %v7346_v62  ;;  %v4249_v13 = vmax.f32 %v3929_v2, %v7347_v0  ;;  %v4378_v43 = vrot.slane %v4247_v3, %v9357_v31  ;;  %v1563_v53 = vld [vmem:[#allocation2 + $0x159] sm:$0xff]  ;;  %v2077_v3 = vld [vmem:[#allocation2 + $0x168] sm:$0xff] }
 0x1da   : > { %1778 = vst.msk [vmem:[#allocation5 + $0x44] sm:$0xf] %vm1760_vm11, %v1699_v8  ;;  %v1954_v34 = vpop.permute.xlu0 %1953  ;;  %v3288_v16 = vcombine.high %v3286_v5, %v3286_v5  ;;  %v3932_v18 = vmax.f32 %v3287_v6, %v3321_v4  ;;  %v3933_v20 = vmax.f32 %v3286_v5, %v3320_v58  ;;  %v7349_v47 = vrot.slane %v3931_v7, 9 }
 0x1db   : > { %2034 = vst.msk [vmem:[#allocation5 + $0x40] sm:$0xf] %vm2017_vm12, %v1954_v34  ;;  %1204 = vrot.lane.b32.xlu1 %v9337_v19, %s10425_s24  ;;  %v4250_v21 = vmax.f32 %v3930_v61, %v7348_v9  ;;  %v4382_v22 = vrot.slane %v4248_v11, %v9357_v31  ;;  %v4386_v12 = vrot.slane %v4249_v13, %v9357_v31 }
 0x1dc   : > { %1459 = vrot.lane.b32.xlu0 %v9364_v26, %s10439_s13  ;;  %v3934_v23 = vmax.f32 %v3288_v16, %v3322_v15  ;;  %v7350_v55 = vrot.slane %v3932_v18, 9  ;;  %v7351_v52 = vrot.slane %v3933_v20, 9  ;;  %v4251_v24 = vmax.f32 %v3931_v7, %v7349_v47  ;;  %v600_v15 = vld [vmem:[#allocation2 + $0x150] sm:$0xff] }
 0x1dd   : > { %v1703_v50 = vpop.permute.xlu1 %1702  ;;  %v4390_v25 = vrot.slane %v4250_v21, %v9357_v31  ;;  %v4632_v27 = vsel %vm4631_vm1, %v4382_v22, %v4378_v43  ;;  %v9391_v29 = vpack.c.bf16 %v1306_v35, %v1306_v35  ;;  %v9401_v41 = vpack.c.bf16 %v1562_v17, %v1562_v17  ;;  %v2335_v35 = vld [vmem:[#allocation2 + $0x171] sm:$0xff] }
 0x1de   : > { %1780 = vst.msk [vmem:[#allocation5 + $0x4c] sm:$0xf] %vm1760_vm11, %v1703_v50  ;;  %v1958_v28 = vpop.permute.xlu0 %1957  ;;  %v4634_v30 = vsel %vm10421_vm2, %v4386_v12, %v4632_v27  ;;  %v7352_v33 = vrot.slane %v3934_v23, 9  ;;  %v4252_v37 = vmax.f32 %v3932_v18, %v7350_v55  ;;  %v4253_v38 = vmax.f32 %v3933_v20, %v7351_v52  ;;  %v601_v21 = vld [vmem:[#allocation2 + $0x158] sm:$0xff]  ;;  %v2591_v17 = vld [vmem:[#allocation2 + $0x16a] sm:$0xff] }
 0x1df   : > { %2036 = vst.msk [vmem:[#allocation5 + $0x48] sm:$0xf] %vm2017_vm12, %v1958_v28  ;;  %1457 = vrot.lane.b32.xlu1 %v9286_v1, %s10439_s13  ;;  %v4394_v39 = vrot.slane %v4251_v24, %v9357_v31  ;;  %v4636_v40 = vsel %vm10422_vm3, %v4390_v25, %v4634_v30  ;;  %vm4643_vm2 = vcmask 1047559   ;;  %vm10423_vm3 = vcmask 130048   ;;  %v603_v27 = vld [vmem:[#allocation2 + $0x170] sm:$0xff] }
 0x1e0   : > { %1712 = vrot.lane.b32.xlu0 %v9290_v45, %s10440_s29  ;;  %v4254_v42 = vmax.f32 %v3934_v23, %v7352_v33  ;;  %v4398_v44 = vrot.slane %v4252_v37, %v9357_v31  ;;  %v4402_v32 = vrot.slane %v4253_v38, %v9357_v31  ;;  %v9421_v59 = vpack.c.bf16 %v1563_v53, %v1563_v53  ;;  %v602_v23 = vld [vmem:[#allocation2 + $0x168] sm:$0xff]  ;;  %v2592_v37 = vld [vmem:[#allocation2 + $0x172] sm:$0xff] }
 0x1e1   : > { %v1956_v46 = vpop.permute.xlu1 %1955  ;;  %v4638_v48 = vsel %vm4637_vm4, %v4394_v39, %v4636_v40  ;;  %v9425_v60 = vpack.c.bf16 %v1819_v56, %v1819_v56  ;;  %v9443_v7 = vpack.c.bf16 %v2077_v3, %v2077_v3  ;;  %v7584_v16 = vpack.c.bf16 %v600_v15, %v600_v15 }
 0x1e2   : > { %2035 = vst.msk [vmem:[#allocation5 + $0x44] sm:$0xf] %vm2017_vm12, %v1956_v46  ;;  %v2212_v1 = vpop.permute.xlu0 %2211  ;;  %v4406_v49 = vrot.slane %v4254_v42, %v9357_v31  ;;  %v4640_v36 = vsel %vm4639_vm5, %v4398_v44, %v4638_v48  ;;  %v7585_v22 = vpack.c.bf16 %v601_v21, %v601_v21  ;;  %v9474_v55 = vpack.c.bf16 %v2335_v35, %v2335_v35 }
 0x1e3   : > { %2292 = vst.msk [vmem:[#allocation5 + $0x40] sm:$0xf] %vm2275_vm13, %v2212_v1  ;;  %1461 = vrot.lane.b32.xlu1 %v9391_v29, %s10439_s13  ;;  %v4642_v45 = vsel %vm4641_vm7, %v4402_v32, %v4640_v36  ;;  %v7586_v52 = vpack.c.bf16 %v602_v23, %v602_v23  ;;  %v9487_v28 = vpack.c.bf16 %v2591_v17, %v2591_v17 }
 0x1e4   : > { %1716 = vrot.lane.b32.xlu0 %v9401_v41, %s10440_s29  ;;  %v4644_v2 = vsel %vm4643_vm2, %v4406_v49, %v4642_v45  ;;  %761 = vst.msk [vmem:[#allocation5 + $0x70] sm:$0xf] %vm732_vm6, %v7584_v16  ;;  %762 = vst.msk [vmem:[#allocation5 + $0x74] sm:$0xf] %vm732_vm6, %v7585_v22  ;;  %v9501_v42 = vpack.c.bf16 %v2592_v37, %v2592_v37 }
 0x1e5   : > { %v1960_v51 = vpop.permute.xlu1 %1959  ;;  %4704 = vst.msk [vmem:[#allocation3 + $0x11] sm:$0xff] %vm10423_vm3, %v4644_v2  ;;  %vm4728_vm3 = vcmask 125952  }
 0x1e6   : > { %2037 = vst.msk [vmem:[#allocation5 + $0x4c] sm:$0xf] %vm2017_vm12, %v1960_v51  ;;  %v2216_v58 = vpop.permute.xlu0 %2215 }
 0x1e7   : > { %2294 = vst.msk [vmem:[#allocation5 + $0x48] sm:$0xf] %vm2275_vm13, %v2216_v58  ;;  %1714 = vrot.lane.b32.xlu1 %v9303_v57, %s10440_s29  ;;  %v1820_v57 = vld [vmem:[#allocation2 + $0x15a] sm:$0xff] }
 0x1e8   : > { %1969 = vrot.lane.b32.xlu0 %v9316_v63, %s10441_s25  ;;  %v9439_v6 = vpack.c.bf16 %v1820_v57, %v1820_v57  ;;  %763 = vst.msk [vmem:[#allocation5 + $0x78] sm:$0xf] %vm732_vm6, %v7586_v52 }
 0x1e9   : > { %v2214_v61 = vpop.permute.xlu1 %2213 }
 0x1ea   : > { %2293 = vst.msk [vmem:[#allocation5 + $0x44] sm:$0xf] %vm2275_vm13, %v2214_v61  ;;  %v2469_v62 = vpop.permute.xlu0 %2468 }
 0x1eb   : > { %2549 = vst.msk [vmem:[#allocation5 + $0x40] sm:$0xf] %vm2532_vm14, %v2469_v62  ;;  %1718 = vrot.lane.b32.xlu1 %v9421_v59, %s10440_s29 }
 0x1ec   : > { %1973 = vrot.lane.b32.xlu0 %v9425_v60, %s10441_s25  ;;  %v4883_v4 = vld [vmem:[#allocation3 + $0x10] sm:$0xff] }
 0x1ed   : > { %v2218_v0 = vpop.permute.xlu1 %2217  ;;  %v9434_v5 = vpack.c.bf16 %v4883_v4, %v4883_v4 }
 0x1ee   : > { %2295 = vst.msk [vmem:[#allocation5 + $0x4c] sm:$0xf] %vm2275_vm13, %v2218_v0  ;;  %v2473_v63 = vpop.permute.xlu0 %2472 }
 0x1ef   : > { %2551 = vst.msk [vmem:[#allocation5 + $0x48] sm:$0xf] %vm2532_vm14, %v2473_v63  ;;  %1971 = vrot.lane.b32.xlu1 %v9337_v19, %s10441_s25  ;;  %v2078_v19 = vld [vmem:[#allocation2 + $0x170] sm:$0xff] }
 0x1f0   : > { %2227 = vrot.lane.b32.xlu0 %v9364_v26, %s10442_s14  ;;  %4730 = vst.msk [vmem:[#allocation6 + $0x8] sm:$0xf] %vm4728_vm3, %v9434_v5  ;;  %v2334_v26 = vld [vmem:[#allocation2 + $0x169] sm:$0xff]  ;;  %v9457_v34 = vpack.c.bf16 %v2078_v19, %v2078_v19 }
 0x1f1   : > { %v2471_v8 = vpop.permute.xlu1 %2470  ;;  %v9461_v18 = vpack.c.bf16 %v2334_v26, %v2334_v26 }
 0x1f2   : > { %2550 = vst.msk [vmem:[#allocation5 + $0x44] sm:$0xf] %vm2532_vm14, %v2471_v8  ;;  %v2726_v9 = vpop.permute.xlu0 %2725 }
 0x1f3   : > { %2806 = vst.msk [vmem:[#allocation5 + $0x40] sm:$0xf] %vm2789_vm15, %v2726_v9  ;;  %1975 = vrot.lane.b32.xlu1 %v9439_v6, %s10441_s25  ;;  %v1309_v9 = vld [vmem:[#allocation2 + $0x180] sm:$0xff] }
 0x1f4   : > { %2231 = vrot.lane.b32.xlu0 %v9443_v7, %s10442_s14  ;;  %v9532_v23 = vpack.c.bf16 %v1309_v9, %v1309_v9 }
 0x1f5   : > { %v2475_v11 = vpop.permute.xlu1 %2474 }
 0x1f6   : > { %2552 = vst.msk [vmem:[#allocation5 + $0x4c] sm:$0xf] %vm2532_vm14, %v2475_v11  ;;  %v934_v13 = vpop.permute.xlu0 %933 }
 0x1f7   : > { %1010 = vst.msk [vmem:[#allocation5 + $0x50] sm:$0xf] %vm989_vm8, %v934_v13  ;;  %2229 = vrot.lane.b32.xlu1 %v9391_v29, %s10442_s14  ;;  %v7587_v29 = vpack.c.bf16 %v603_v27, %v603_v27 }
 0x1f8   : > { %2484 = vrot.lane.b32.xlu0 %v9401_v41, %s10443_s12 }
 0x1f9   : > { %v2728_v20 = vpop.permute.xlu1 %2727  ;;  %764 = vst.msk [vmem:[#allocation5 + $0x7c] sm:$0xf] %vm732_vm6, %v7587_v29  ;;  %vm10444_vm6 = vcmask 1042434  }
 0x1fa   : > { %2807 = vst.msk [vmem:[#allocation5 + $0x44] sm:$0xf] %vm2789_vm15, %v2728_v20  ;;  %v2730_v47 = vpop.permute.xlu0 %2729 }
 0x1fb   : > { %2808 = vst.msk [vmem:[#allocation5 + $0x48] sm:$0xf] %vm2789_vm15, %v2730_v47  ;;  %2233 = vrot.lane.b32.xlu1 %v9457_v34, %s10442_s14 }
 0x1fc   : > { %2488 = vrot.lane.b32.xlu0 %v9461_v18, %s10443_s12 }
 0x1fd   : > { %v936_v43 = vpop.permute.xlu1 %935 }
 0x1fe   : > { %1011 = vst.msk [vmem:[#allocation5 + $0x54] sm:$0xf] %vm989_vm8, %v936_v43  ;;  %v938_v12 = vpop.permute.xlu0 %937 }
 0x1ff   : > { %1012 = vst.msk [vmem:[#allocation5 + $0x58] sm:$0xf] %vm989_vm8, %v938_v12  ;;  %2486 = vrot.lane.b32.xlu1 %v9421_v59, %s10443_s12 }
 0x200   : > { %2741 = vrot.lane.b32.xlu0 %v9425_v60, %s10431_s30 }
 0x201   : > { %v2732_v24 = vpop.permute.xlu1 %2731  ;;  %v8196_v50 = vld [vmem:[#allocation5 + $0x40] sm:$0xff]  }
 0x202   : > { %2809 = vst.msk [vmem:[#allocation5 + $0x4c] sm:$0xf] %vm2789_vm15, %v2732_v24  ;;  %v1191_v25 = vpop.permute.xlu0 %1190  ;;  %8082 = vmatprep.mubr.msk.bf16.mxu0 %vm2977_vm0, %v8196_v50 }
 0x203   : > { %1267 = vst.msk [vmem:[#allocation5 + $0x50] sm:$0xf] %vm1246_vm9, %v1191_v25  ;;  %2490 = vrot.lane.b32.xlu1 %v9474_v55, %s10443_s12 }
 0x204   : > { %949 = vrot.lane.b32.xlu0 %v9401_v41, %s8337_s22 }
 0x205   : > { %v940_v30 = vpop.permute.xlu1 %939 }
 0x206   : > { %1013 = vst.msk [vmem:[#allocation5 + $0x5c] sm:$0xf] %vm989_vm8, %v940_v30  ;;  %v1195_v33 = vpop.permute.xlu0 %1194 }
 0x207   : > { %1269 = vst.msk [vmem:[#allocation5 + $0x58] sm:$0xf] %vm1246_vm9, %v1195_v33  ;;  %2743 = vrot.lane.b32.xlu1 %v9439_v6, %s10431_s30 }
 0x208   : > { %2745 = vrot.lane.b32.xlu0 %v9487_v28, %s10431_s30 }
 0x209   : > { %v1193_v38 = vpop.permute.xlu1 %1192  ;;  %v8197_v39 = vld [vmem:[#allocation5 + $0x48] sm:$0xff]  }
 0x20a   : > { %1268 = vst.msk [vmem:[#allocation5 + $0x54] sm:$0xf] %vm1246_vm9, %v1193_v38  ;;  %v1448_v40 = vpop.permute.xlu0 %1447  ;;  %v8072_v41 = vpop.f32.mrf.mxu0  ;;  %8083 = vmatmul.mubr.msk.bf16.gmra.mxu0 %vm2977_vm0, %v8197_v39 }
 0x20b   : > { %1524 = vst.msk [vmem:[#allocation5 + $0x50] sm:$0xf] %vm10424_vm10, %v1448_v40  ;;  %951 = vrot.lane.b32.xlu1 %v9421_v59, %s8337_s22  ;;  %v3089_v44 = vadd.f32 %v8072_v41, %v9330_v14 }
 0x20c   : > { %953 = vrot.lane.b32.xlu0 %v9461_v18, %s8337_s22  ;;  %v3080_v46 = vpop.f32.mrf.mxu0 }
 0x20d   : > { %v1197_v32 = vpop.permute.xlu1 %1196  ;;  %v3197_v48 = vmax.f32 %v3089_v44, 0.0  ;;  %v3081_v1 = vadd.f32 %v9330_v14, %v3080_v46 }
 0x20e   : > { %1270 = vst.msk [vmem:[#allocation5 + $0x5c] sm:$0xf] %vm1246_vm9, %v1197_v32  ;;  %v1452_v49 = vpop.permute.xlu0 %1451  ;;  %v8073_v36 = vpop.f32.mrf.mxu0 }
 0x20f   : > { %1526 = vst.msk [vmem:[#allocation5 + $0x58] sm:$0xf] %vm10424_vm10, %v1452_v49  ;;  %2747 = vrot.lane.b32.xlu1 %v9501_v42, %s10431_s30  ;;  %v3357_v45 = vcombine.high %v3197_v48, %v3197_v48  ;;  %v3364_v53 = vrot.slane %v3197_v48, %v9341_v54  ;;  %v3195_v2 = vmax.f32 %v3081_v1, 0.0  ;;  %v3092_v51 = vadd.f32 %v8073_v36, %v9330_v14 }
 0x210   : > { %1206 = vrot.lane.b32.xlu0 %v9425_v60, %s10425_s24  ;;  %v3083_v58 = vpop.f32.mrf.mxu0 }
 0x211   : > { %v1450_v56 = vpop.permute.xlu1 %1449  ;;  %v3371_v59 = vrot.slane %v3357_v45, %v9341_v54  ;;  %v3323_v61 = vcombine.high %v3195_v2, %v3195_v2  ;;  %v3330_v62 = vrot.slane %v3195_v2, %v9341_v54  ;;  %v3198_v0 = vmax.f32 %v3092_v51, 0.0 }
 0x212   : > { %1525 = vst.msk [vmem:[#allocation5 + $0x54] sm:$0xf] %vm10424_vm10, %v1450_v56  ;;  %v1705_v57 = vpop.permute.xlu0 %1704  ;;  %v3084_v3 = vadd.f32 %v9330_v14, %v3083_v58  ;;  %v3372_v4 = vcombine.high %v3364_v53, %v3364_v53  ;;  %v1566_v58 = vld [vmem:[#allocation2 + $0x181] sm:$0xff] }
 0x213   : > { %1781 = vst.msk [vmem:[#allocation5 + $0x50] sm:$0xf] %vm1760_vm11, %v1705_v57  ;;  %955 = vrot.lane.b32.xlu1 %v9474_v55, %s8337_s22  ;;  %v3337_v60 = vrot.slane %v3323_v61, %v9341_v54  ;;  %v3338_v63 = vcombine.high %v3330_v62, %v3330_v62  ;;  %v3935_v8 = vmax.f32 %v3330_v62, %v3364_v53 }
 0x214   : > { %1210 = vrot.lane.b32.xlu0 %v9487_v28, %s10425_s24  ;;  %v3373_v19 = vcombine.high %v3371_v59, %v3371_v59  ;;  %v3374_v11 = vcombine.high %v3198_v0, %v3198_v0  ;;  %v3381_v26 = vrot.slane %v3198_v0, %v9341_v54  ;;  %v3196_v13 = vmax.f32 %v3084_v3, 0.0 }
 0x215   : > { %v1454_v15 = vpop.permute.xlu1 %1453  ;;  %v3339_v16 = vcombine.high %v3337_v60, %v3337_v60  ;;  %v3936_v20 = vmax.f32 %v3338_v63, %v3372_v4  ;;  %v3937_v47 = vmax.f32 %v3337_v60, %v3371_v59  ;;  %v7353_v35 = vrot.slane %v3935_v8, 9 }
 0x216   : > { %1527 = vst.msk [vmem:[#allocation5 + $0x5c] sm:$0xf] %vm10424_vm10, %v1454_v15  ;;  %v1709_v21 = vpop.permute.xlu0 %1708  ;;  %v3388_v43 = vrot.slane %v3374_v11, %v9341_v54  ;;  %v3340_v22 = vcombine.high %v3196_v13, %v3196_v13  ;;  %v3347_v12 = vrot.slane %v3196_v13, %v9341_v54  ;;  %v3389_v25 = vcombine.high %v3381_v26, %v3381_v26 }
 0x217   : > { %1783 = vst.msk [vmem:[#allocation5 + $0x58] sm:$0xf] %vm1760_vm11, %v1709_v21  ;;  %1208 = vrot.lane.b32.xlu1 %v9439_v6, %s10425_s24  ;;  %v3938_v52 = vmax.f32 %v3339_v16, %v3373_v19  ;;  %v7354_v24 = vrot.slane %v3936_v20, 9  ;;  %v7355_v50 = vrot.slane %v3937_v47, 9  ;;  %v4255_v17 = vmax.f32 %v3935_v8, %v7353_v35 }
 0x218   : > { %1463 = vrot.lane.b32.xlu0 %v9443_v7, %s10439_s13  ;;  %v3354_v27 = vrot.slane %v3340_v22, %v9341_v54  ;;  %v3355_v29 = vcombine.high %v3347_v12, %v3347_v12  ;;  %v3939_v30 = vmax.f32 %v3347_v12, %v3381_v26  ;;  %v3390_v40 = vcombine.high %v3388_v43, %v3388_v43  ;;  %v1310_v7 = vld [vmem:[#allocation2 + $0x188] sm:$0xff] }
 0x219   : > { %v1707_v33 = vpop.permute.xlu1 %1706  ;;  %v7356_v37 = vrot.slane %v3938_v52, 9  ;;  %v4256_v38 = vmax.f32 %v3936_v20, %v7354_v24  ;;  %v4257_v39 = vmax.f32 %v3937_v47, %v7355_v50  ;;  %v4410_v1 = vrot.slane %v4255_v17, %v9357_v31  ;;  %v1567_v47 = vld [vmem:[#allocation2 + $0x189] sm:$0xff] }
 0x21a   : > { %1782 = vst.msk [vmem:[#allocation5 + $0x54] sm:$0xf] %vm1760_vm11, %v1707_v33  ;;  %v1962_v6 = vpop.permute.xlu0 %1961  ;;  %v3356_v41 = vcombine.high %v3354_v27, %v3354_v27  ;;  %v3940_v44 = vmax.f32 %v3355_v29, %v3389_v25  ;;  %v3941_v32 = vmax.f32 %v3354_v27, %v3388_v43  ;;  %v7357_v46 = vrot.slane %v3939_v30, 9  ;;  %v1823_v43 = vld [vmem:[#allocation2 + $0x182] sm:$0xff]  ;;  %v1824_v17 = vld [vmem:[#allocation2 + $0x18a] sm:$0xff]  ;;  %v2081_v27 = vld [vmem:[#allocation2 + $0x198] sm:$0xff] }
 0x21b   : > { %2038 = vst.msk [vmem:[#allocation5 + $0x50] sm:$0xf] %vm2017_vm12, %v1962_v6  ;;  %1212 = vrot.lane.b32.xlu1 %v9501_v42, %s10425_s24  ;;  %v4258_v48 = vmax.f32 %v3938_v52, %v7356_v37  ;;  %v4414_v49 = vrot.slane %v4256_v38, %v9357_v31  ;;  %v4418_v36 = vrot.slane %v4257_v39, %v9357_v31  ;;  %vm10445_vm10 = vcmask 1043459  }
 0x21c   : > { %1467 = vrot.lane.b32.xlu0 %v9532_v23, %s10439_s13  ;;  %v3942_v45 = vmax.f32 %v3356_v41, %v3390_v40  ;;  %v7358_v53 = vrot.slane %v3940_v44, 9  ;;  %v7359_v2 = vrot.slane %v3941_v32, 9  ;;  %v4259_v51 = vmax.f32 %v3939_v30, %v7357_v46 }
 0x21d   : > { %v1711_v56 = vpop.permute.xlu1 %1710  ;;  %v4422_v59 = vrot.slane %v4258_v48, %v9357_v31  ;;  %v4645_v61 = vsel %vm4631_vm1, %v4414_v49, %v4410_v1  ;;  %v9549_v57 = vpack.c.bf16 %v1310_v7, %v1310_v7  ;;  %v7714_v9 = vpack.c.bf16 %v1566_v58, %v1566_v58  ;;  %v4712_v48 = vld [vmem:[#allocation3] sm:$0xff]  ;;  %v2339_v49 = vld [vmem:[#allocation2 + $0x1a1] sm:$0xff] }
 0x21e   : > { %1784 = vst.msk [vmem:[#allocation5 + $0x5c] sm:$0xf] %vm1760_vm11, %v1711_v56  ;;  %v1966_v62 = vpop.permute.xlu0 %1965  ;;  %v4646_v0 = vsel %vm10444_vm6, %v4418_v36, %v4645_v61  ;;  %v7360_v3 = vrot.slane %v3942_v45, 9  ;;  %v4260_v4 = vmax.f32 %v3940_v44, %v7358_v53  ;;  %v4261_v60 = vmax.f32 %v3941_v32, %v7359_v2 }
 0x21f   : > { %2040 = vst.msk [vmem:[#allocation5 + $0x58] sm:$0xf] %vm2017_vm12, %v1966_v62  ;;  %1465 = vrot.lane.b32.xlu1 %v9457_v34, %s10439_s13  ;;  %v4426_v63 = vrot.slane %v4259_v51, %v9357_v31  ;;  %v4647_v8 = vsel %vm10445_vm10, %v4422_v59, %v4646_v0  ;;  %vm10446_vm10 = vcmask 130048   ;;  %v7715_v12 = vpack.c.bf16 %v1567_v47, %v1567_v47  ;;  %v4737_v59 = vld [vmem:[#allocation3 + $0x1] sm:$0xff] }
 0x220   : > { %1720 = vrot.lane.b32.xlu0 %v9461_v18, %s10440_s29  ;;  %v4262_v19 = vmax.f32 %v3942_v45, %v7360_v3  ;;  %v4430_v11 = vrot.slane %v4260_v4, %v9357_v31  ;;  %v4434_v26 = vrot.slane %v4261_v60, %v9357_v31  ;;  %v7746_v52 = vpack.c.bf16 %v1823_v43, %v1823_v43  ;;  %v2595_v45 = vld [vmem:[#allocation2 + $0x19a] sm:$0xff]  ;;  %v4810_v3 = vld [vmem:[#allocation3 + $0x2] sm:$0xff] }
 0x221   : > { %v1964_v13 = vpop.permute.xlu1 %1963  ;;  %v4648_v15 = vsel %vm4637_vm4, %v4426_v63, %v4647_v8  ;;  %v7747_v37 = vpack.c.bf16 %v1824_v17, %v1824_v17  ;;  %v7778_v38 = vpack.c.bf16 %v2081_v27, %v2081_v27  ;;  %v4720_v1 = vpack.c.bf16 %v4712_v48, %v4712_v48 }
 0x222   : > { %2039 = vst.msk [vmem:[#allocation5 + $0x54] sm:$0xf] %vm2017_vm12, %v1964_v13  ;;  %v2220_v16 = vpop.permute.xlu0 %2219  ;;  %v4438_v34 = vrot.slane %v4262_v19, %v9357_v31  ;;  %v4649_v20 = vsel %vm4639_vm5, %v4430_v11, %v4648_v15  ;;  %v7811_v2 = vpack.c.bf16 %v2339_v49, %v2339_v49  ;;  %v7842_v51 = vpack.c.bf16 %v2595_v45, %v2595_v45  ;;  %v4738_v11 = vld [vmem:[#allocation3 + $0x11] sm:$0xff] }
 0x223   : > { %2296 = vst.msk [vmem:[#allocation5 + $0x50] sm:$0xf] %vm2275_vm13, %v2220_v16  ;;  %1469 = vrot.lane.b32.xlu1 %v9549_v57, %s10439_s13  ;;  %v4650_v18 = vsel %vm4641_vm7, %v4434_v26, %v4649_v20  ;;  %v7844_v62 = vpack.c.bf16 %v4737_v59, %v4737_v59  ;;  %v7852_v63 = vpack.c.bf16 %v4810_v3, %v4810_v3  ;;  %vm10447_vm6 = vcmask 257216   ;;  %v8204_v20 = vld [vmem:[%s10401_s3 + $0x38] sm:$0xff]   ;;  %s10427_s13 = smov 80  }
 0x224   : > { %1724 = vrot.lane.b32.xlu0 %v7714_v9, %s10440_s29  ;;  %v4651_v35 = vsel %vm4643_vm2, %v4438_v34, %v4650_v18  ;;  %4729 = vst.msk [vmem:[#allocation6] sm:$0xf] %vm4728_vm3, %v4720_v1  ;;  %v7845_v34 = vpack.c.bf16 %v4738_v11, %v4738_v11  ;;  %v8346_v43 = vmov 0   ;;  %v8206_v1 = vld [vmem:[%s10401_s3 + $0x28] sm:$0xff]  }
 0x225   : > { %v1968_v21 = vpop.permute.xlu1 %1967  ;;  %4705 = vst.msk [vmem:[#allocation3 + $0x21] sm:$0xff] %vm10446_vm10, %v4651_v35  ;;  %5408 = vmatprep.subr.bf16.mxu1 %v8346_v43  ;;  %vm10448_vm10 = vmmov %vm10447_vm6 }
 0x226   : > { %2041 = vst.msk [vmem:[#allocation5 + $0x5c] sm:$0xf] %vm2017_vm12, %v1968_v21  ;;  %v2224_v22 = vpop.permute.xlu0 %2223  ;;  %v4811_v21 = vld [vmem:[#allocation3 + $0x12] sm:$0xff]  ;;  %5409 = vmatpush1.bf16.msra.mxu1 %v8204_v20 }
 0x227   : > { %2298 = vst.msk [vmem:[#allocation5 + $0x58] sm:$0xf] %vm2275_vm13, %v2224_v22  ;;  %1722 = vrot.lane.b32.xlu1 %v9474_v55, %s10440_s29  ;;  %5410 = vmatprep.subr.bf16.mxu1 %v8346_v43 }
 0x228   : > { %1977 = vrot.lane.b32.xlu0 %v9487_v28, %s10441_s25 }
 0x229   : > { %v2222_v24 = vpop.permute.xlu1 %2221 }
 0x22a   : > { %2297 = vst.msk [vmem:[#allocation5 + $0x54] sm:$0xf] %vm2275_vm13, %v2222_v24  ;;  %v2477_v50 = vpop.permute.xlu0 %2476 }
 0x22b   : > { %2553 = vst.msk [vmem:[#allocation5 + $0x50] sm:$0xf] %vm2532_vm14, %v2477_v50  ;;  %1726 = vrot.lane.b32.xlu1 %v7715_v12, %s10440_s29 }
 0x22c   : > { %1981 = vrot.lane.b32.xlu0 %v7746_v52, %s10441_s25  ;;  %v4884_v29 = vld [vmem:[#allocation3 + $0x20] sm:$0xff] }
 0x22d   : > { %v2226_v25 = vpop.permute.xlu1 %2225  ;;  %v5030_v55 = vld [vmem:[#allocation3 + $0x22] sm:$0xff]  ;;  %v9583_v28 = vpack.c.bf16 %v4884_v29, %v4884_v29  ;;  %v7853_v29 = vpack.c.bf16 %v4811_v21, %v4811_v21 }
 0x22e   : > { %2299 = vst.msk [vmem:[#allocation5 + $0x5c] sm:$0xf] %vm2275_vm13, %v2226_v25  ;;  %v2481_v30 = vpop.permute.xlu0 %2480  ;;  %v9585_v33 = vpack.c.bf16 %v5030_v55, %v5030_v55  ;;  %v4957_v17 = vld [vmem:[#allocation3 + $0x21] sm:$0xff] }
 0x22f   : > { %2555 = vst.msk [vmem:[#allocation5 + $0x58] sm:$0xf] %vm2532_vm14, %v2481_v30  ;;  %1979 = vrot.lane.b32.xlu1 %v9501_v42, %s10441_s25  ;;  %v2082_v42 = vld [vmem:[#allocation2 + $0x1a0] sm:$0xff]  ;;  %v8205_v55 = vld [vmem:[%s10401_s3 + $0x30] sm:$0xff]  }
 0x230   : > { %2235 = vrot.lane.b32.xlu0 %v9532_v23, %s10442_s14  ;;  %4731 = vst.msk [vmem:[#allocation6 + $0x10] sm:$0xf] %vm4728_vm3, %v9583_v28  ;;  %5265 = vst.msk [vmem:[#allocation6 + $0x4] sm:$0xf] %vm4728_vm3, %v9585_v33  ;;  %v2338_v23 = vld [vmem:[#allocation2 + $0x199] sm:$0xff]  ;;  %v7779_v44 = vpack.c.bf16 %v2082_v42, %v2082_v42  ;;  %v9651_v42 = vpack.c.bf16 %v4957_v17, %v4957_v17  ;;  %5411 = vmatpush1.bf16.msra.mxu1 %v8205_v55 }
 0x231   : > { %v2479_v39 = vpop.permute.xlu1 %2478  ;;  %v7810_v32 = vpack.c.bf16 %v2338_v23, %v2338_v23  ;;  %5412 = vmatprep.subr.bf16.mxu1 %v8346_v43  ;;  %v8208_v17 = vld [vmem:[%s10401_s3 + $0x18] sm:$0xff]  }
 0x232   : > { %2554 = vst.msk [vmem:[#allocation5 + $0x54] sm:$0xf] %vm2532_vm14, %v2479_v39  ;;  %v2734_v40 = vpop.permute.xlu0 %2733 }
 0x233   : > { %2810 = vst.msk [vmem:[#allocation5 + $0x50] sm:$0xf] %vm2789_vm15, %v2734_v40  ;;  %1983 = vrot.lane.b32.xlu1 %v7747_v37, %s10441_s25 }
 0x234   : > { %2239 = vrot.lane.b32.xlu0 %v7778_v38, %s10442_s14  ;;  %5413 = vmatpush1.bf16.msra.mxu1 %v8206_v1 }
 0x235   : > { %v2483_v6 = vpop.permute.xlu1 %2482  ;;  %5414 = vmatprep.subr.bf16.mxu1 %v8346_v43 }
 0x236   : > { %2556 = vst.msk [vmem:[#allocation5 + $0x5c] sm:$0xf] %vm2532_vm14, %v2483_v6  ;;  %v942_v41 = vpop.permute.xlu0 %941 }
 0x237   : > { %1014 = vst.msk [vmem:[#allocation5 + $0x60] sm:$0xf] %vm989_vm8, %v942_v41  ;;  %2237 = vrot.lane.b32.xlu1 %v9549_v57, %s10442_s14  ;;  %v2596_v57 = vld [vmem:[#allocation2 + $0x1a2] sm:$0xff] }
 0x238   : > { %2492 = vrot.lane.b32.xlu0 %v7714_v9, %s10443_s12  ;;  %v7843_v60 = vpack.c.bf16 %v2596_v57, %v2596_v57 }
 0x239   : > { %v2736_v46 = vpop.permute.xlu1 %2735 }
 0x23a   : > { %2811 = vst.msk [vmem:[#allocation5 + $0x54] sm:$0xf] %vm2789_vm15, %v2736_v46  ;;  %v2738_v7 = vpop.permute.xlu0 %2737 }
 0x23b   : > { %2812 = vst.msk [vmem:[#allocation5 + $0x58] sm:$0xf] %vm2789_vm15, %v2738_v7  ;;  %2241 = vrot.lane.b32.xlu1 %v7779_v44, %s10442_s14 }
 0x23c   : > { %2496 = vrot.lane.b32.xlu0 %v7810_v32, %s10443_s12 }
 0x23d   : > { %v944_v36 = vpop.permute.xlu1 %943 }
 0x23e   : > { %1015 = vst.msk [vmem:[#allocation5 + $0x64] sm:$0xf] %vm989_vm8, %v944_v36  ;;  %v946_v53 = vpop.permute.xlu0 %945 }
 0x23f   : > { %1016 = vst.msk [vmem:[#allocation5 + $0x68] sm:$0xf] %vm989_vm8, %v946_v53  ;;  %2494 = vrot.lane.b32.xlu1 %v7715_v12, %s10443_s12 }
 0x240   : > { %2749 = vrot.lane.b32.xlu0 %v7746_v52, %s10431_s30 }
 0x241   : > { %v2740_v56 = vpop.permute.xlu1 %2739  ;;  %v8198_v58 = vld [vmem:[#allocation5 + $0x50] sm:$0xff]  }
 0x242   : > { %2813 = vst.msk [vmem:[#allocation5 + $0x5c] sm:$0xf] %vm2789_vm15, %v2740_v56  ;;  %v1199_v61 = vpop.permute.xlu0 %1198  ;;  %8086 = vmatprep.mubr.msk.bf16.mxu0 %vm2977_vm0, %v8198_v58 }
 0x243   : > { %1271 = vst.msk [vmem:[#allocation5 + $0x60] sm:$0xf] %vm1246_vm9, %v1199_v61  ;;  %2498 = vrot.lane.b32.xlu1 %v7811_v2, %s10443_s12  ;;  %s10429_s12 = smov 96  }
 0x244   : > { %2753 = vrot.lane.b32.xlu0 %v7842_v51, %s10431_s30 }
 0x245   : > { %v948_v0 = vpop.permute.xlu1 %947 }
 0x246   : > { %1017 = vst.msk [vmem:[#allocation5 + $0x6c] sm:$0xf] %vm989_vm8, %v948_v0  ;;  %v1203_v4 = vpop.permute.xlu0 %1202 }
 0x247   : > { %1273 = vst.msk [vmem:[#allocation5 + $0x68] sm:$0xf] %vm1246_vm9, %v1203_v4  ;;  %2751 = vrot.lane.b32.xlu1 %v7747_v37, %s10431_s30 }
 0x248   : > { %4777 = vrot.lane.b32.xlu0 %v7844_v62, %s10425_s24 }
 0x249   : > { %v1201_v8 = vpop.permute.xlu1 %1200  ;;  %v8199_v9 = vld [vmem:[#allocation5 + $0x58] sm:$0xff]  }
 0x24a   : > { %1272 = vst.msk [vmem:[#allocation5 + $0x64] sm:$0xf] %vm1246_vm9, %v1201_v8  ;;  %v1456_v19 = vpop.permute.xlu0 %1455  ;;  %v8076_v26 = vpop.f32.mrf.mxu0  ;;  %8087 = vmatmul.mubr.msk.bf16.gmra.mxu0 %vm2977_vm0, %v8199_v9  ;;  %v8207_v9 = vld [vmem:[%s10401_s3 + $0x20] sm:$0xff]  }
 0x24b   : > { %1528 = vst.msk [vmem:[#allocation5 + $0x60] sm:$0xf] %vm10447_vm6, %v1456_v19  ;;  %2755 = vrot.lane.b32.xlu1 %v7843_v60, %s10431_s30  ;;  %v3105_v13 = vadd.f32 %v8076_v26, %v9330_v14  ;;  %5415 = vmatpush1.bf16.msra.mxu1 %v8207_v9 }
 0x24c   : > { %4850 = vrot.lane.b32.xlu0 %v7852_v63, %s10440_s29  ;;  %v3096_v16 = vpop.f32.mrf.mxu0  ;;  %5416 = vmatprep.subr.bf16.mxu1 %v8346_v43 }
 0x24d   : > { %v1205_v15 = vpop.permute.xlu1 %1204  ;;  %v3201_v18 = vmax.f32 %v3105_v13, 0.0  ;;  %v3097_v47 = vadd.f32 %v9330_v14, %v3096_v16 }
 0x24e   : > { %1274 = vst.msk [vmem:[#allocation5 + $0x6c] sm:$0xf] %vm1246_vm9, %v1205_v15  ;;  %v1460_v35 = vpop.permute.xlu0 %1459  ;;  %v8077_v22 = vpop.f32.mrf.mxu0 }
 0x24f   : > { %1530 = vst.msk [vmem:[#allocation5 + $0x68] sm:$0xf] %vm10448_vm10, %v1460_v35  ;;  %4779 = vrot.lane.b32.xlu1 %v7845_v34, %s10425_s24  ;;  %v3425_v12 = vcombine.high %v3201_v18, %v3201_v18  ;;  %v3432_v52 = vrot.slane %v3201_v18, %v9341_v54  ;;  %v3199_v24 = vmax.f32 %v3097_v47, 0.0  ;;  %v3108_v50 = vadd.f32 %v8077_v22, %v9330_v14  ;;  %vm10449_vm10 = vmmov %vm10447_vm6 }
 0x250   : > { %4923 = vrot.lane.b32.xlu0 %v9434_v5, %s10442_s14  ;;  %v3099_v27 = vpop.f32.mrf.mxu0  ;;  %5417 = vmatpush1.bf16.msra.mxu1 %v8208_v17 }
 0x251   : > { %v1458_v25 = vpop.permute.xlu1 %1457  ;;  %v3439_v30 = vrot.slane %v3425_v12, %v9341_v54  ;;  %v3391_v37 = vcombine.high %v3199_v24, %v3199_v24  ;;  %v3398_v38 = vrot.slane %v3199_v24, %v9341_v54  ;;  %v3202_v40 = vmax.f32 %v3108_v50, 0.0  ;;  %5418 = vmatprep.subr.bf16.mxu1 %v8346_v43 }
 0x252   : > { %1529 = vst.msk [vmem:[#allocation5 + $0x64] sm:$0xf] %vm10447_vm6, %v1458_v25  ;;  %v1713_v39 = vpop.permute.xlu0 %1712  ;;  %v3100_v5 = vadd.f32 %v9330_v14, %v3099_v27  ;;  %v3440_v6 = vcombine.high %v3432_v52, %v3432_v52  ;;  %vm10450_vm6 = vcmask 1042434  }
 0x253   : > { %1785 = vst.msk [vmem:[#allocation5 + $0x60] sm:$0xf] %vm1760_vm11, %v1713_v39  ;;  %4852 = vrot.lane.b32.xlu1 %v7853_v29, %s10440_s29  ;;  %v3405_v23 = vrot.slane %v3391_v37, %v9341_v54  ;;  %v3406_v41 = vcombine.high %v3398_v38, %v3398_v38  ;;  %v3943_v44 = vmax.f32 %v3398_v38, %v3432_v52 }
 0x254   : > { %4996 = vrot.lane.b32.xlu0 %v7845_v34, %s10431_s30  ;;  %v3441_v32 = vcombine.high %v3439_v30, %v3439_v30  ;;  %v3442_v46 = vcombine.high %v3202_v40, %v3202_v40  ;;  %v3449_v7 = vrot.slane %v3202_v40, %v9341_v54  ;;  %v3200_v48 = vmax.f32 %v3100_v5, 0.0 }
 0x255   : > { %v1462_v14 = vpop.permute.xlu1 %1461  ;;  %v3407_v49 = vcombine.high %v3405_v23, %v3405_v23  ;;  %v3944_v36 = vmax.f32 %v3406_v41, %v3440_v6  ;;  %v3945_v45 = vmax.f32 %v3405_v23, %v3439_v30  ;;  %v7361_v53 = vrot.slane %v3943_v44, 9  ;;  %v8209_v41 = vld [vmem:[%s10401_s3 + $0x10] sm:$0xff]  }
 0x256   : > { %1531 = vst.msk [vmem:[#allocation5 + $0x6c] sm:$0xf] %vm10449_vm10, %v1462_v14  ;;  %v1717_v2 = vpop.permute.xlu0 %1716  ;;  %v3456_v51 = vrot.slane %v3442_v46, %v9341_v54  ;;  %v3457_v56 = vcombine.high %v3449_v7, %v3449_v7  ;;  %v3408_v58 = vcombine.high %v3200_v48, %v3200_v48  ;;  %v3415_v59 = vrot.slane %v3200_v48, %v9341_v54 }
 0x257   : > { %1787 = vst.msk [vmem:[#allocation5 + $0x68] sm:$0xf] %vm1760_vm11, %v1717_v2  ;;  %4925 = vrot.lane.b32.xlu1 %v9583_v28, %s10442_s14  ;;  %v3946_v61 = vmax.f32 %v3407_v49, %v3441_v32  ;;  %v7362_v62 = vrot.slane %v3944_v36, 9  ;;  %v7363_v57 = vrot.slane %v3945_v45, 9  ;;  %v4263_v0 = vmax.f32 %v3943_v44, %v7361_v53  ;;  %5419 = vmatpush1.bf16.msra.mxu1 %v8209_v41  ;;  %v8210_v49 = vld [vmem:[%s10401_s3 + $0x8] sm:$0xff]  }
 0x258   : > { %5069 = vrot.lane.b32.xlu0 %v7853_v29, %s10427_s13  ;;  %v3458_v3 = vcombine.high %v3456_v51, %v3456_v51  ;;  %v3422_v4 = vrot.slane %v3408_v58, %v9341_v54  ;;  %v3423_v60 = vcombine.high %v3415_v59, %v3415_v59  ;;  %v3947_v63 = vmax.f32 %v3415_v59, %v3449_v7 }
 0x259   : > { %v1715_v8 = vpop.permute.xlu1 %1714  ;;  %v7364_v19 = vrot.slane %v3946_v61, 9  ;;  %v4264_v11 = vmax.f32 %v3944_v36, %v7362_v62  ;;  %v4265_v26 = vmax.f32 %v3945_v45, %v7363_v57  ;;  %v4442_v13 = vrot.slane %v4263_v0, %v9357_v31  ;;  %5420 = vmatprep.subr.bf16.mxu1 %v8346_v43  ;;  %v8211_v45 = vld [vmem:[%s10401_s3] sm:$0xff]  }
 0x25a   : > { %1786 = vst.msk [vmem:[#allocation5 + $0x64] sm:$0xf] %vm1760_vm11, %v1715_v8  ;;  %v1970_v15 = vpop.permute.xlu0 %1969  ;;  %v3424_v16 = vcombine.high %v3422_v4, %v3422_v4  ;;  %v3948_v34 = vmax.f32 %v3423_v60, %v3457_v56  ;;  %v3949_v20 = vmax.f32 %v3422_v4, %v3456_v51  ;;  %v7365_v18 = vrot.slane %v3947_v63, 9 }
 0x25b   : > { %2042 = vst.msk [vmem:[#allocation5 + $0x60] sm:$0xf] %vm2017_vm12, %v1970_v15  ;;  %4998 = vrot.lane.b32.xlu1 %v9651_v42, %s10431_s30  ;;  %v4266_v47 = vmax.f32 %v3946_v61, %v7364_v19  ;;  %v4446_v35 = vrot.slane %v4264_v11, %v9357_v31  ;;  %v4450_v21 = vrot.slane %v4265_v26, %v9357_v31  ;;  %vm10451_vm10 = vcmask 1043459   ;;  %v8212_v61 = vld [vmem:[%s10401_s3 + $0x40] sm:$0xff]  }
 0x25c   : > { %5143 = vrot.lane.b32.xlu0 %v9583_v28, %s10429_s12  ;;  %v3950_v22 = vmax.f32 %v3424_v16, %v3458_v3  ;;  %v7366_v12 = vrot.slane %v3948_v34, 9  ;;  %v7367_v52 = vrot.slane %v3949_v20, 9  ;;  %v4267_v24 = vmax.f32 %v3947_v63, %v7365_v18  ;;  %5421 = vmatpush1.bf16.msra.mxu1 %v8210_v49 }
 0x25d   : > { %v1719_v50 = vpop.permute.xlu1 %1718  ;;  %v4454_v25 = vrot.slane %v4266_v47, %v9357_v31  ;;  %v4652_v27 = vsel %vm4631_vm1, %v4446_v35, %v4442_v13  ;;  %5422 = vmatprep.subr.bf16.mxu1 %v8346_v43  ;;  %v9760_v47 = vld [vmem:[%s10400_s2] ss:$0 sm:$0xff] }
 0x25e   : > { %1788 = vst.msk [vmem:[#allocation5 + $0x6c] sm:$0xf] %vm1760_vm11, %v1719_v50  ;;  %v1974_v29 = vpop.permute.xlu0 %1973  ;;  %v4653_v28 = vsel %vm10450_vm6, %v4450_v21, %v4652_v27  ;;  %v7368_v55 = vrot.slane %v3950_v22, 9  ;;  %v4268_v30 = vmax.f32 %v3948_v34, %v7366_v12  ;;  %v4269_v37 = vmax.f32 %v3949_v20, %v7367_v52 }
 0x25f   : > { %2044 = vst.msk [vmem:[#allocation5 + $0x68] sm:$0xf] %vm2017_vm12, %v1974_v29  ;;  %5071 = vrot.lane.b32.xlu1 %v9585_v33, %s10427_s13  ;;  %v4458_v38 = vrot.slane %v4267_v24, %v9357_v31  ;;  %v4654_v39 = vsel %vm10451_vm10, %v4454_v25, %v4653_v28  ;;  %vm10452_vm6 = vcmask 130048   ;;  %s10454_s13 = smov 16   ;;  %vm10455_vm10 = vcmask 257216  }
 0x260   : > { %5216 = vrot.lane.b32.xlu0 %v9651_v42, %s8349_s15  ;;  %v4270_v40 = vmax.f32 %v3950_v22, %v7368_v55  ;;  %v4462_v5 = vrot.slane %v4268_v30, %v9357_v31  ;;  %v4466_v6 = vrot.slane %v4269_v37, %v9357_v31  ;;  %5423 = vmatpush1.bf16.msra.mxu1 %v8211_v45 }
 0x261   : > { %v1972_v23 = vpop.permute.xlu1 %1971  ;;  %v4655_v44 = vsel %vm4637_vm4, %v4458_v38, %v4654_v39  ;;  %5438 = vmatprep.subr.bf16.mxu1 %v8346_v43 }
 0x262   : > { %2043 = vst.msk [vmem:[#allocation5 + $0x64] sm:$0xf] %vm2017_vm12, %v1972_v23  ;;  %v2228_v32 = vpop.permute.xlu0 %2227  ;;  %v4470_v46 = vrot.slane %v4270_v40, %v9357_v31  ;;  %v4656_v7 = vsel %vm4639_vm5, %v4462_v5, %v4655_v44 }
 0x263   : > { %2300 = vst.msk [vmem:[#allocation5 + $0x60] sm:$0xf] %vm2275_vm13, %v2228_v32  ;;  %v4657_v48 = vsel %vm4641_vm7, %v4466_v6, %v4656_v7 }
 0x264   : > { %4781 = vrot.lane.b32.xlu0 %v9651_v42, %s10425_s24  ;;  %v4658_v14 = vsel %vm4643_vm2, %v4470_v46, %v4657_v48  ;;  %5439 = vmatpush2.bf16.msra.mxu1 %v8212_v61  ;;  %s10453_s24 = smov 80  }
 0x265   : > { %v1976_v1 = vpop.permute.xlu1 %1975  ;;  %4706 = vst.msk [vmem:[#allocation3 + $0x31] sm:$0xff] %vm10452_vm6, %v4658_v14 }
 0x266   : > { %2045 = vst.msk [vmem:[#allocation5 + $0x6c] sm:$0xf] %vm2017_vm12, %v1976_v1  ;;  %v2232_v36 = vpop.permute.xlu0 %2231 }
 0x267   : > { %2302 = vst.msk [vmem:[#allocation5 + $0x68] sm:$0xf] %vm2275_vm13, %v2232_v36 }
 0x268   : > { %4854 = vrot.lane.b32.xlu0 %v9585_v33, %s10440_s29 }
 0x269   : > { %v2230_v42 = vpop.permute.xlu1 %2229 }
 0x26a   : > { %2301 = vst.msk [vmem:[#allocation5 + $0x64] sm:$0xf] %vm2275_vm13, %v2230_v42  ;;  %v2485_v53 = vpop.permute.xlu0 %2484 }
 0x26b   : > { %2557 = vst.msk [vmem:[#allocation5 + $0x60] sm:$0xf] %vm2532_vm14, %v2485_v53 }
 0x26c   : > { %v4885_v51 = vld [vmem:[#allocation3 + $0x30] sm:$0xff] }
 0x26d   : > { %v2234_v2 = vpop.permute.xlu1 %2233  ;;  %v5031_v56 = vld [vmem:[#allocation3 + $0x32] sm:$0xff]  ;;  %v7862_v58 = vpack.c.bf16 %v4885_v51, %v4885_v51 }
 0x26e   : > { %2303 = vst.msk [vmem:[#allocation5 + $0x6c] sm:$0xf] %vm2275_vm13, %v2234_v2  ;;  %v2489_v33 = vpop.permute.xlu0 %2488  ;;  %v7878_v59 = vpack.c.bf16 %v5031_v56, %v5031_v56  ;;  %v4958_v62 = vld [vmem:[#allocation3 + $0x31] sm:$0xff] }
 0x26f   : > { %2559 = vst.msk [vmem:[#allocation5 + $0x68] sm:$0xf] %vm2532_vm14, %v2489_v33  ;;  %4927 = vrot.lane.b32.xlu0 %v7862_v58, %s10442_s14  ;;  %5145 = vrot.lane.b32.xlu1 %v7862_v58, %s10429_s12  ;;  %v7870_v0 = vpack.c.bf16 %v4958_v62, %v4958_v62 }
 0x270   : > { %4732 = vst.msk [vmem:[#allocation6 + $0x18] sm:$0xf] %vm4728_vm3, %v7862_v58  ;;  %5266 = vst.msk [vmem:[#allocation6 + $0xc] sm:$0xf] %vm4728_vm3, %v7878_v59 }
 0x271   : > { %v2487_v43 = vpop.permute.xlu1 %2486 }
 0x272   : > { %2558 = vst.msk [vmem:[#allocation5 + $0x64] sm:$0xf] %vm2532_vm14, %v2487_v43  ;;  %v2742_v57 = vpop.permute.xlu0 %2741 }
 0x273   : > { %2814 = vst.msk [vmem:[#allocation5 + $0x60] sm:$0xf] %vm2789_vm15, %v2742_v57  ;;  %5000 = vrot.lane.b32.xlu0 %v7870_v0, %s10431_s30  ;;  %5218 = vrot.lane.b32.xlu1 %v7870_v0, %s8349_s15 }
 0x275   : > { %v2491_v3 = vpop.permute.xlu1 %2490 }
 0x276   : > { %2560 = vst.msk [vmem:[#allocation5 + $0x6c] sm:$0xf] %vm2532_vm14, %v2491_v3  ;;  %v950_v4 = vpop.permute.xlu0 %949 }
 0x277   : > { %1018 = vst.msk [vmem:[#allocation5 + $0x70] sm:$0xf] %vm989_vm8, %v950_v4  ;;  %5073 = vrot.lane.b32.xlu0 %v7878_v59, %s10453_s24  ;;  %4783 = vrot.lane.b32.xlu1 %v7870_v0, %s10454_s13 }
 0x279   : > { %v2744_v60 = vpop.permute.xlu1 %2743 }
 0x27a   : > { %2815 = vst.msk [vmem:[#allocation5 + $0x64] sm:$0xf] %vm2789_vm15, %v2744_v60  ;;  %v2746_v63 = vpop.permute.xlu0 %2745 }
 0x27b   : > { %2816 = vst.msk [vmem:[#allocation5 + $0x68] sm:$0xf] %vm2789_vm15, %v2746_v63  ;;  %4856 = vrot.lane.b32.xlu1 %v7878_v59, %s10440_s29 }
 0x27d   : > { %v952_v8 = vpop.permute.xlu1 %951 }
 0x27e   : > { %1019 = vst.msk [vmem:[#allocation5 + $0x74] sm:$0xf] %vm989_vm8, %v952_v8  ;;  %v954_v9 = vpop.permute.xlu0 %953 }
 0x27f   : > { %1020 = vst.msk [vmem:[#allocation5 + $0x78] sm:$0xf] %vm989_vm8, %v954_v9 }
 0x281   : > { %v2748_v19 = vpop.permute.xlu1 %2747  ;;  %v8200_v11 = vld [vmem:[#allocation5 + $0x60] sm:$0xff]  }
 0x282   : > { %2817 = vst.msk [vmem:[#allocation5 + $0x6c] sm:$0xf] %vm2789_vm15, %v2748_v19  ;;  %v1207_v26 = vpop.permute.xlu0 %1206  ;;  %8090 = vmatprep.mubr.msk.bf16.mxu0 %vm2977_vm0, %v8200_v11 }
 0x283   : > { %1275 = vst.msk [vmem:[#allocation5 + $0x70] sm:$0xf] %vm1246_vm9, %v1207_v26 }
 0x285   : > { %v956_v13 = vpop.permute.xlu1 %955 }
 0x286   : > { %1021 = vst.msk [vmem:[#allocation5 + $0x7c] sm:$0xf] %vm989_vm8, %v956_v13  ;;  %v1211_v15 = vpop.permute.xlu0 %1210  ;;  %vm10456_vm8 = vmmov %vm10455_vm10 }
 0x287   : > { %1277 = vst.msk [vmem:[#allocation5 + $0x78] sm:$0xf] %vm1246_vm9, %v1211_v15  ;;  %vm10458_vm6 = vmmov %vm10456_vm8 }
 0x289   : > { %v1209_v16 = vpop.permute.xlu1 %1208  ;;  %v8201_v34 = vld [vmem:[#allocation5 + $0x68] sm:$0xff]  }
 0x28a   : > { %1276 = vst.msk [vmem:[#allocation5 + $0x74] sm:$0xf] %vm1246_vm9, %v1209_v16  ;;  %v1464_v20 = vpop.permute.xlu0 %1463  ;;  %v8080_v18 = vpop.f32.mrf.mxu0  ;;  %8091 = vmatmul.mubr.msk.bf16.gmra.mxu0 %vm2977_vm0, %v8201_v34 }
 0x28b   : > { %1532 = vst.msk [vmem:[#allocation5 + $0x70] sm:$0xf] %vm10455_vm10, %v1464_v20  ;;  %v3121_v35 = vadd.f32 %v9760_v47, %v8080_v18  ;;  %vm10459_vm10 = vcmask 1042434  }
 0x28c   : > { %v3112_v22 = vpop.f32.mrf.mxu0 }
 0x28d   : > { %v1213_v21 = vpop.permute.xlu1 %1212  ;;  %v3205_v12 = vmax.f32 %v3121_v35, 0.0  ;;  %v3113_v52 = vadd.f32 %v9760_v47, %v3112_v22 }
 0x28e   : > { %1278 = vst.msk [vmem:[#allocation5 + $0x7c] sm:$0xf] %vm1246_vm9, %v1213_v21  ;;  %v1468_v24 = vpop.permute.xlu0 %1467  ;;  %v8081_v50 = vpop.f32.mrf.mxu0  ;;  %vm10457_vm9 = vmmov %vm10456_vm8 }
 0x28f   : > { %1534 = vst.msk [vmem:[#allocation5 + $0x78] sm:$0xf] %vm10456_vm8, %v1468_v24  ;;  %v3493_v17 = vcombine.high %v3205_v12, %v3205_v12  ;;  %v3500_v25 = vrot.slane %v3205_v12, %v9341_v54  ;;  %v3203_v27 = vmax.f32 %v3113_v52, 0.0  ;;  %v3124_v29 = vadd.f32 %v9760_v47, %v8081_v50 }
 0x290   : > { %v3115_v55 = vpop.f32.mrf.mxu0  ;;  %vm10460_vm8 = vcmask 1043459  }
 0x291   : > { %v1466_v28 = vpop.permute.xlu1 %1465  ;;  %v3507_v30 = vrot.slane %v3493_v17, %v9341_v54  ;;  %v3459_v37 = vcombine.high %v3203_v27, %v3203_v27  ;;  %v3466_v38 = vrot.slane %v3203_v27, %v9341_v54  ;;  %v3206_v40 = vmax.f32 %v3124_v29, 0.0 }
 0x292   : > { %1533 = vst.msk [vmem:[#allocation5 + $0x74] sm:$0xf] %vm10457_vm9, %v1466_v28  ;;  %v1721_v39 = vpop.permute.xlu0 %1720  ;;  %v3116_v5 = vadd.f32 %v9760_v47, %v3115_v55  ;;  %v3508_v6 = vcombine.high %v3500_v25, %v3500_v25  ;;  %vm5020_vm9 = vcmask 650752  }
 0x293   : > { %1789 = vst.msk [vmem:[#allocation5 + $0x70] sm:$0xf] %vm1760_vm11, %v1721_v39  ;;  %v3473_v23 = vrot.slane %v3459_v37, %v9341_v54  ;;  %v3474_v41 = vcombine.high %v3466_v38, %v3466_v38  ;;  %v3951_v44 = vmax.f32 %v3466_v38, %v3500_v25  ;;  %v3509_v32 = vcombine.high %v3507_v30, %v3507_v30 }
 0x294   : > { %v3510_v46 = vcombine.high %v3206_v40, %v3206_v40  ;;  %v3517_v7 = vrot.slane %v3206_v40, %v9341_v54  ;;  %v3204_v48 = vmax.f32 %v3116_v5, 0.0 }
 0x295   : > { %v1470_v14 = vpop.permute.xlu1 %1469  ;;  %v3475_v1 = vcombine.high %v3473_v23, %v3473_v23  ;;  %v3952_v49 = vmax.f32 %v3474_v41, %v3508_v6  ;;  %v3953_v36 = vmax.f32 %v3473_v23, %v3507_v30  ;;  %v7369_v42 = vrot.slane %v3951_v44, 9 }
 0x296   : > { %1535 = vst.msk [vmem:[#allocation5 + $0x7c] sm:$0xf] %vm10458_vm6, %v1470_v14  ;;  %v1725_v45 = vpop.permute.xlu0 %1724  ;;  %v3524_v53 = vrot.slane %v3510_v46, %v9341_v54  ;;  %v3476_v2 = vcombine.high %v3204_v48, %v3204_v48  ;;  %v3483_v51 = vrot.slane %v3204_v48, %v9341_v54  ;;  %v3525_v61 = vcombine.high %v3517_v7, %v3517_v7 }
 0x297   : > { %1791 = vst.msk [vmem:[#allocation5 + $0x78] sm:$0xf] %vm1760_vm11, %v1725_v45  ;;  %v3954_v56 = vmax.f32 %v3475_v1, %v3509_v32  ;;  %v7370_v33 = vrot.slane %v3952_v49, 9  ;;  %v7371_v58 = vrot.slane %v3953_v36, 9  ;;  %v4271_v59 = vmax.f32 %v3951_v44, %v7369_v42 }
 0x298   : > { %v3490_v62 = vrot.slane %v3476_v2, %v9341_v54  ;;  %v3491_v43 = vcombine.high %v3483_v51, %v3483_v51  ;;  %v3955_v57 = vmax.f32 %v3483_v51, %v3517_v7  ;;  %v3526_v63 = vcombine.high %v3524_v53, %v3524_v53 }
 0x299   : > { %v1723_v0 = vpop.permute.xlu1 %1722  ;;  %v7372_v3 = vrot.slane %v3954_v56, 9  ;;  %v4272_v4 = vmax.f32 %v3952_v49, %v7370_v33  ;;  %v4273_v60 = vmax.f32 %v3953_v36, %v7371_v58  ;;  %v4474_v15 = vrot.slane %v4271_v59, %v9357_v31 }
 0x29a   : > { %1790 = vst.msk [vmem:[#allocation5 + $0x74] sm:$0xf] %vm1760_vm11, %v1723_v0  ;;  %v1978_v8 = vpop.permute.xlu0 %1977  ;;  %v3492_v9 = vcombine.high %v3490_v62, %v3490_v62  ;;  %v3956_v19 = vmax.f32 %v3491_v43, %v3525_v61  ;;  %v3957_v11 = vmax.f32 %v3490_v62, %v3524_v53  ;;  %v7373_v26 = vrot.slane %v3955_v57, 9 }
 0x29b   : > { %2046 = vst.msk [vmem:[#allocation5 + $0x70] sm:$0xf] %vm2017_vm12, %v1978_v8  ;;  %v4274_v13 = vmax.f32 %v3954_v56, %v7372_v3  ;;  %v4478_v16 = vrot.slane %v4272_v4, %v9357_v31  ;;  %v4482_v34 = vrot.slane %v4273_v60, %v9357_v31  ;;  %vm5167_vm6 = vcmask 913152  }
 0x29c   : > { %v3958_v20 = vmax.f32 %v3492_v9, %v3526_v63  ;;  %v7374_v18 = vrot.slane %v3956_v19, 9  ;;  %v7375_v35 = vrot.slane %v3957_v11, 9  ;;  %v4275_v21 = vmax.f32 %v3955_v57, %v7373_v26 }
 0x29d   : > { %v1727_v22 = vpop.permute.xlu1 %1726  ;;  %v4486_v12 = vrot.slane %v4274_v13, %v9357_v31  ;;  %v4659_v52 = vsel %vm4631_vm1, %v4478_v16, %v4474_v15 }
 0x29e   : > { %1792 = vst.msk [vmem:[#allocation5 + $0x7c] sm:$0xf] %vm1760_vm11, %v1727_v22  ;;  %v1982_v24 = vpop.permute.xlu0 %1981  ;;  %v4660_v50 = vsel %vm10459_vm10, %v4482_v34, %v4659_v52  ;;  %v7376_v17 = vrot.slane %v3958_v20, 9  ;;  %v4276_v25 = vmax.f32 %v3956_v19, %v7374_v18  ;;  %v4277_v27 = vmax.f32 %v3957_v11, %v7375_v35 }
 0x29f   : > { %2048 = vst.msk [vmem:[#allocation5 + $0x78] sm:$0xf] %vm2017_vm12, %v1982_v24  ;;  %v4490_v29 = vrot.slane %v4275_v21, %v9357_v31  ;;  %v4661_v28 = vsel %vm10460_vm8, %v4486_v12, %v4660_v50  ;;  %vm10461_vm11 = vcmask 130048  }
 0x2a0   : > { %v4278_v55 = vmax.f32 %v3958_v20, %v7376_v17  ;;  %v4494_v30 = vrot.slane %v4276_v25, %v9357_v31  ;;  %v4498_v37 = vrot.slane %v4277_v27, %v9357_v31 }
 0x2a1   : > { %v1980_v38 = vpop.permute.xlu1 %1979  ;;  %v4662_v39 = vsel %vm4637_vm4, %v4490_v29, %v4661_v28 }
 0x2a2   : > { %2047 = vst.msk [vmem:[#allocation5 + $0x74] sm:$0xf] %vm2017_vm12, %v1980_v38  ;;  %v2236_v40 = vpop.permute.xlu0 %2235  ;;  %v4502_v5 = vrot.slane %v4278_v55, %v9357_v31  ;;  %v4663_v6 = vsel %vm4639_vm5, %v4494_v30, %v4662_v39 }
 0x2a3   : > { %2304 = vst.msk [vmem:[#allocation5 + $0x70] sm:$0xf] %vm2275_vm13, %v2236_v40  ;;  %v4664_v23 = vsel %vm4641_vm7, %v4498_v37, %v4663_v6 }
 0x2a4   : > { %v4665_v41 = vsel %vm4643_vm2, %v4502_v5, %v4664_v23 }
 0x2a5   : > { %v1984_v44 = vpop.permute.xlu1 %1983  ;;  %4707 = vst.msk [vmem:[#allocation3 + $0x41] sm:$0xff] %vm10461_vm11, %v4665_v41 }
 0x2a6   : > { %2049 = vst.msk [vmem:[#allocation5 + $0x7c] sm:$0xf] %vm2017_vm12, %v1984_v44  ;;  %v2240_v32 = vpop.permute.xlu0 %2239  ;;  %vm4801_vm12 = vcmask 257152  }
 0x2a7   : > { %2306 = vst.msk [vmem:[#allocation5 + $0x78] sm:$0xf] %vm2275_vm13, %v2240_v32 }
 0x2a9   : > { %v2238_v46 = vpop.permute.xlu1 %2237 }
 0x2aa   : > { %2305 = vst.msk [vmem:[#allocation5 + $0x74] sm:$0xf] %vm2275_vm13, %v2238_v46  ;;  %v2493_v7 = vpop.permute.xlu0 %2492 }
 0x2ab   : > { %2561 = vst.msk [vmem:[#allocation5 + $0x70] sm:$0xf] %vm2532_vm14, %v2493_v7 }
 0x2ac   : > { %v5105_v14 = vld [vmem:[#allocation3 + $0x40] sm:$0xff] }
 0x2ad   : > { %v2242_v48 = vpop.permute.xlu1 %2241  ;;  %v5032_v1 = vld [vmem:[#allocation3 + $0x42] sm:$0xff]  ;;  %v7886_v36 = vpack.c.bf16 %v5105_v14, %v5105_v14 }
 0x2ae   : > { %2307 = vst.msk [vmem:[#allocation5 + $0x7c] sm:$0xf] %vm2275_vm13, %v2242_v48  ;;  %v2497_v49 = vpop.permute.xlu0 %2496  ;;  %v7879_v42 = vpack.c.bf16 %v5032_v1, %v5032_v1  ;;  %v5178_v45 = vld [vmem:[#allocation3 + $0x41] sm:$0xff]  ;;  %vm4874_vm13 = vcmask 388352  }
 0x2af   : > { %2563 = vst.msk [vmem:[#allocation5 + $0x78] sm:$0xf] %vm2532_vm14, %v2497_v49  ;;  %5147 = vrot.lane.b32.xlu0 %v7886_v36, %s10429_s12  ;;  %4929 = vrot.lane.b32.xlu1 %v7886_v36, %s10442_s14  ;;  %v7894_v51 = vpack.c.bf16 %v5178_v45, %v5178_v45 }
 0x2b0   : > { %4733 = vst.msk [vmem:[#allocation6 + $0x20] sm:$0xf] %vm4728_vm3, %v7886_v36  ;;  %5267 = vst.msk [vmem:[#allocation6 + $0x14] sm:$0xf] %vm4728_vm3, %v7879_v42 }
 0x2b1   : > { %v2495_v53 = vpop.permute.xlu1 %2494 }
 0x2b2   : > { %2562 = vst.msk [vmem:[#allocation5 + $0x74] sm:$0xf] %vm2532_vm14, %v2495_v53  ;;  %v2750_v2 = vpop.permute.xlu0 %2749 }
 0x2b3   : > { %2818 = vst.msk [vmem:[#allocation5 + $0x70] sm:$0xf] %vm2789_vm15, %v2750_v2  ;;  %5220 = vrot.lane.b32.xlu0 %v7894_v51, %s8349_s15  ;;  %5002 = vrot.lane.b32.xlu1 %v7894_v51, %s10431_s30 }
 0x2b5   : > { %v2499_v56 = vpop.permute.xlu1 %2498 }
 0x2b6   : > { %2564 = vst.msk [vmem:[#allocation5 + $0x7c] sm:$0xf] %vm2532_vm14, %v2499_v56  ;;  %v2754_v33 = vpop.permute.xlu0 %2753  ;;  %vm4947_vm14 = vcmask 519552  }
 0x2b7   : > { %2820 = vst.msk [vmem:[#allocation5 + $0x78] sm:$0xf] %vm2789_vm15, %v2754_v33  ;;  %4785 = vrot.lane.b32.xlu0 %v7894_v51, %s10454_s13  ;;  %5075 = vrot.lane.b32.xlu1 %v7879_v42, %s10453_s24 }
 0x2b9   : > { %v2752_v58 = vpop.permute.xlu1 %2751 }
 0x2ba   : > { %2819 = vst.msk [vmem:[#allocation5 + $0x74] sm:$0xf] %vm2789_vm15, %v2752_v58  ;;  %v4778_v59 = vpop.permute.xlu0 %4777 }
 0x2bb   : > { %4802 = vst.msk [vmem:[#allocation6] sm:$0xf] %vm4801_vm12, %v4778_v59  ;;  %4858 = vrot.lane.b32.xlu0 %v7879_v42, %s10440_s29 }
 0x2bd   : > { %v2756_v61 = vpop.permute.xlu1 %2755 }
 0x2be   : > { %2821 = vst.msk [vmem:[#allocation5 + $0x7c] sm:$0xf] %vm2789_vm15, %v2756_v61  ;;  %v4851_v62 = vpop.permute.xlu0 %4850  ;;  %vm5093_vm15 = vcmask 781952  }
 0x2bf   : > { %4875 = vst.msk [vmem:[#allocation6] sm:$0xf] %vm4874_vm13, %v4851_v62 }
 0x2c1   : > { %v4780_v43 = vpop.permute.xlu1 %4779  ;;  %v8202_v57 = vld [vmem:[#allocation5 + $0x70] sm:$0xff]  }
 0x2c2   : > { %4803 = vst.msk [vmem:[#allocation6 + $0x8] sm:$0xf] %vm4801_vm12, %v4780_v43  ;;  %v4924_v0 = vpop.permute.xlu0 %4923  ;;  %8094 = vmatprep.mubr.msk.bf16.mxu0 %vm2977_vm0, %v8202_v57 }
 0x2c3   : > { %4948 = vst.msk [vmem:[#allocation6] sm:$0xf] %vm4947_vm14, %v4924_v0 }
 0x2c5   : > { %v4853_v3 = vpop.permute.xlu1 %4852  ;;  %v8203_v4 = vld [vmem:[#allocation5 + $0x78] sm:$0xff]  }
 0x2c6   : > { %4876 = vst.msk [vmem:[#allocation6 + $0x8] sm:$0xf] %vm4874_vm13, %v4853_v3  ;;  %v4997_v60 = vpop.permute.xlu0 %4996  ;;  %8095 = vmatmul.mubr.msk.bf16.gmra.mxu0 %vm2977_vm0, %v8203_v4  ;;  %vm5240_vm0 = vcmask 1044352  }
 0x2c7   : > { %5021 = vst.msk [vmem:[#allocation6] sm:$0xf] %vm5020_vm9, %v4997_v60 }
 0x2c9   : > { %v4926_v63 = vpop.permute.xlu1 %4925 }
 0x2ca   : > { %4949 = vst.msk [vmem:[#allocation6 + $0x8] sm:$0xf] %vm4947_vm14, %v4926_v63  ;;  %v5070_v8 = vpop.permute.xlu0 %5069  ;;  %v8084_v9 = vpop.f32.mrf.mxu0 }
 0x2cb   : > { %5094 = vst.msk [vmem:[#allocation6] sm:$0xf] %vm5093_vm15, %v5070_v8  ;;  %v3137_v19 = vadd.f32 %v9760_v47, %v8084_v9 }
 0x2cc   : > { %v3128_v26 = vpop.f32.mrf.mxu0 }
 0x2cd   : > { %v4999_v11 = vpop.permute.xlu1 %4998  ;;  %v3209_v13 = vmax.f32 %v3137_v19, 0.0  ;;  %v3129_v15 = vadd.f32 %v9760_v47, %v3128_v26 }
 0x2ce   : > { %5022 = vst.msk [vmem:[#allocation6 + $0x8] sm:$0xf] %vm5020_vm9, %v4999_v11  ;;  %v5144_v16 = vpop.permute.xlu0 %5143  ;;  %v8085_v34 = vpop.f32.mrf.mxu0 }
 0x2cf   : > { %5168 = vst.msk [vmem:[#allocation6] sm:$0xf] %vm5167_vm6, %v5144_v16  ;;  %v3561_v20 = vcombine.high %v3209_v13, %v3209_v13  ;;  %v3568_v18 = vrot.slane %v3209_v13, %v9341_v54  ;;  %v3207_v35 = vmax.f32 %v3129_v15, 0.0  ;;  %v3140_v21 = vadd.f32 %v9760_v47, %v8085_v34 }
 0x2d0   : > { %v3131_v12 = vpop.f32.mrf.mxu0 }
 0x2d1   : > { %v5072_v22 = vpop.permute.xlu1 %5071  ;;  %v3575_v52 = vrot.slane %v3561_v20, %v9341_v54  ;;  %v3527_v24 = vcombine.high %v3207_v35, %v3207_v35  ;;  %v3534_v50 = vrot.slane %v3207_v35, %v9341_v54  ;;  %v3210_v25 = vmax.f32 %v3140_v21, 0.0 }
 0x2d2   : > { %5095 = vst.msk [vmem:[#allocation6 + $0x8] sm:$0xf] %vm5093_vm15, %v5072_v22  ;;  %v5217_v17 = vpop.permute.xlu0 %5216  ;;  %v3132_v27 = vadd.f32 %v9760_v47, %v3131_v12  ;;  %v3576_v29 = vcombine.high %v3568_v18, %v3568_v18 }
 0x2d3   : > { %5241 = vst.msk [vmem:[#allocation6] sm:$0xf] %vm5240_vm0, %v5217_v17  ;;  %v3541_v28 = vrot.slane %v3527_v24, %v9341_v54  ;;  %v3542_v55 = vcombine.high %v3534_v50, %v3534_v50  ;;  %v3959_v30 = vmax.f32 %v3534_v50, %v3568_v18  ;;  %v3577_v37 = vcombine.high %v3575_v52, %v3575_v52 }
 0x2d4   : > { %v3578_v38 = vcombine.high %v3210_v25, %v3210_v25  ;;  %v3585_v39 = vrot.slane %v3210_v25, %v9341_v54  ;;  %v3208_v40 = vmax.f32 %v3132_v27, 0.0 }
 0x2d5   : > { %v3543_v5 = vcombine.high %v3541_v28, %v3541_v28  ;;  %v3960_v6 = vmax.f32 %v3542_v55, %v3576_v29  ;;  %v3961_v23 = vmax.f32 %v3541_v28, %v3575_v52  ;;  %v7377_v41 = vrot.slane %v3959_v30, 9 }
 0x2d6   : > { %v4782_v44 = vpop.permute.xlu0 %4781  ;;  %v3592_v32 = vrot.slane %v3578_v38, %v9341_v54  ;;  %v3544_v46 = vcombine.high %v3208_v40, %v3208_v40  ;;  %v3551_v7 = vrot.slane %v3208_v40, %v9341_v54  ;;  %v3593_v36 = vcombine.high %v3585_v39, %v3585_v39 }
 0x2d7   : > { %4804 = vst.msk [vmem:[#allocation6 + $0x10] sm:$0xf] %vm4801_vm12, %v4782_v44  ;;  %v3962_v48 = vmax.f32 %v3543_v5, %v3577_v37  ;;  %v7378_v14 = vrot.slane %v3960_v6, 9  ;;  %v7379_v1 = vrot.slane %v3961_v23, 9  ;;  %v4279_v49 = vmax.f32 %v3959_v30, %v7377_v41  ;;  %v8215_v5 = vld [vmem:[#allocation6 + $0x4] ss:$8 sps:$4 sm:$0xff]  }
 0x2d8   : > { %v3558_v42 = vrot.slane %v3544_v46, %v9341_v54  ;;  %v3559_v45 = vcombine.high %v3551_v7, %v3551_v7  ;;  %v3963_v53 = vmax.f32 %v3551_v7, %v3585_v39  ;;  %v3594_v33 = vcombine.high %v3592_v32, %v3592_v32 }
 0x2d9   : > { %v7380_v2 = vrot.slane %v3962_v48, 9  ;;  %v4280_v51 = vmax.f32 %v3960_v6, %v7378_v14  ;;  %v4281_v56 = vmax.f32 %v3961_v23, %v7379_v1  ;;  %v4506_v0 = vrot.slane %v4279_v49, %v9357_v31 }
 0x2da   : > { %v4855_v58 = vpop.permute.xlu0 %4854  ;;  %v3560_v59 = vcombine.high %v3558_v42, %v3558_v42  ;;  %v3964_v61 = vmax.f32 %v3559_v45, %v3593_v36  ;;  %v3965_v62 = vmax.f32 %v3558_v42, %v3592_v32  ;;  %v7381_v43 = vrot.slane %v3963_v53, 9 }
 0x2db   : > { %4877 = vst.msk [vmem:[#allocation6 + $0x10] sm:$0xf] %vm4874_vm13, %v4855_v58  ;;  %v4282_v57 = vmax.f32 %v3962_v48, %v7380_v2  ;;  %v4510_v3 = vrot.slane %v4280_v51, %v9357_v31  ;;  %v4514_v4 = vrot.slane %v4281_v56, %v9357_v31 }
 0x2dc   : > { %v3966_v60 = vmax.f32 %v3560_v59, %v3594_v33  ;;  %v7382_v63 = vrot.slane %v3964_v61, 9  ;;  %v7383_v8 = vrot.slane %v3965_v62, 9  ;;  %v4283_v9 = vmax.f32 %v3963_v53, %v7381_v43 }
 0x2dd   : > { %v4518_v19 = vrot.slane %v4282_v57, %v9357_v31  ;;  %v4666_v11 = vsel %vm4631_vm1, %v4510_v3, %v4506_v0 }
 0x2de   : > { %v4667_v26 = vsel %vm10459_vm10, %v4514_v4, %v4666_v11  ;;  %v7384_v13 = vrot.slane %v3966_v60, 9  ;;  %v4284_v15 = vmax.f32 %v3964_v61, %v7382_v63  ;;  %v4285_v16 = vmax.f32 %v3965_v62, %v7383_v8  ;;  %vm10462_vm10 = vmmov %vm10461_vm11 }
 0x2df   : > { %v4522_v34 = vrot.slane %v4283_v9, %v9357_v31  ;;  %v4668_v20 = vsel %vm10460_vm8, %v4518_v19, %v4667_v26  ;;  %7483 = vmatprep.mubr.msk.bf16.mxu1 %vm10462_vm10, %v8215_v5  ;;  %vm10463_vm8 = vcmask 1042434  }
 0x2e0   : > { %v4286_v18 = vmax.f32 %v3966_v60, %v7384_v13  ;;  %v4526_v35 = vrot.slane %v4284_v15, %v9357_v31  ;;  %v4530_v21 = vrot.slane %v4285_v16, %v9357_v31 }
 0x2e1   : > { %v4669_v22 = vsel %vm4637_vm4, %v4522_v34, %v4668_v20  ;;  %v4928_v12 = vpop.permute.xlu0 %4927  ;;  %v5146_v52 = vpop.permute.xlu1 %5145 }
 0x2e2   : > { %v4534_v24 = vrot.slane %v4286_v18, %v9357_v31  ;;  %v4670_v50 = vsel %vm4639_vm5, %v4526_v35, %v4669_v22  ;;  %4950 = vst.msk [vmem:[#allocation6 + $0x10] sm:$0xf] %vm4947_vm14, %v4928_v12 }
 0x2e3   : > { %5169 = vst.msk [vmem:[#allocation6 + $0x8] sm:$0xf] %vm5167_vm6, %v5146_v52  ;;  %v4671_v17 = vsel %vm4641_vm7, %v4530_v21, %v4670_v50 }
 0x2e4   : > { %v4672_v25 = vsel %vm4643_vm2, %v4534_v24, %v4671_v17 }
 0x2e5   : > { %4708 = vst.msk [vmem:[#allocation3 + $0x51] sm:$0xff] %vm10461_vm11, %v4672_v25  ;;  %v5001_v27 = vpop.permute.xlu0 %5000  ;;  %v5219_v29 = vpop.permute.xlu1 %5218  ;;  %vm10464_vm11 = vcmask 1043459  }
 0x2e6   : > { %5023 = vst.msk [vmem:[#allocation6 + $0x10] sm:$0xf] %vm5020_vm9, %v5001_v27 }
 0x2e7   : > { %5242 = vst.msk [vmem:[#allocation6 + $0x8] sm:$0xf] %vm5240_vm0, %v5219_v29 }
 0x2e9   : > { %v5074_v28 = vpop.permute.xlu0 %5073  ;;  %v4784_v55 = vpop.permute.xlu1 %4783 }
 0x2ea   : > { %5096 = vst.msk [vmem:[#allocation6 + $0x10] sm:$0xf] %vm5093_vm15, %v5074_v28 }
 0x2eb   : > { %4805 = vst.msk [vmem:[#allocation6 + $0x18] sm:$0xf] %vm4801_vm12, %v4784_v55 }
 0x2ec   : > { %v4887_v30 = vld [vmem:[#allocation3 + $0x50] sm:$0xff] }
 0x2ed   : > { %v5033_v37 = vld [vmem:[#allocation3 + $0x52] sm:$0xff]  ;;  %v4857_v38 = vpop.permute.xlu1 %4856  ;;  %v7864_v39 = vpack.c.bf16 %v4887_v30, %v4887_v30 }
 0x2ee   : > { %v8213_v40 = vld [vmem:[#allocation6] ss:$8 sps:$4 sm:$0xff]   ;;  %v7880_v6 = vpack.c.bf16 %v5033_v37, %v5033_v37  ;;  %4878 = vst.msk [vmem:[#allocation6 + $0x18] sm:$0xf] %vm4874_vm13, %v4857_v38 }
 0x2ef   : > { %v4960_v23 = vld [vmem:[#allocation3 + $0x51] sm:$0xff]  ;;  %4931 = vrot.lane.b32.xlu0 %v7864_v39, %s10442_s14  ;;  %5149 = vrot.lane.b32.xlu1 %v7864_v39, %s10429_s12  ;;  %4734 = vst.msk [vmem:[#allocation6 + $0x28] sm:$0xf] %vm4728_vm3, %v7864_v39 }
 0x2f0   : > { %5268 = vst.msk [vmem:[#allocation6 + $0x1c] sm:$0xf] %vm4728_vm3, %v7880_v6  ;;  %5441 = vmatmul.mubr.bf16.vlgmr.msra.gmra.mxu1 %v8213_v40  ;;  %v7872_v41 = vpack.c.bf16 %v4960_v23, %v4960_v23 }
 0x2f3   : > { %5004 = vrot.lane.b32.xlu0 %v7872_v41, %s10431_s30  ;;  %5222 = vrot.lane.b32.xlu1 %v7872_v41, %s8349_s15 }
 0x2f7   : > { %5077 = vrot.lane.b32.xlu0 %v7880_v6, %s10453_s24  ;;  %4787 = vrot.lane.b32.xlu1 %v7872_v41, %s10454_s13 }
 0x2fb   : > { %4860 = vrot.lane.b32.xlu1 %v7880_v6, %s10440_s29 }
 0x30a   : > { %v8088_v44 = vpop.f32.mrf.mxu0 }
 0x30b   : > { %v3153_v32 = vadd.f32 %v9760_v47, %v8088_v44 }
 0x30c   : > { %v3144_v46 = vpop.f32.mrf.mxu0 }
 0x30d   : > { %v3213_v7 = vmax.f32 %v3153_v32, 0.0  ;;  %v3145_v48 = vadd.f32 %v9760_v47, %v3144_v46 }
 0x30e   : > { %v8089_v14 = vpop.f32.mrf.mxu0 }
 0x30f   : > { %v3629_v1 = vcombine.high %v3213_v7, %v3213_v7  ;;  %v3636_v49 = vrot.slane %v3213_v7, %v9341_v54  ;;  %v3211_v36 = vmax.f32 %v3145_v48, 0.0  ;;  %v3156_v42 = vadd.f32 %v9760_v47, %v8089_v14 }
 0x310   : > { %v3147_v45 = vpop.f32.mrf.mxu0 }
 0x311   : > { %v3643_v53 = vrot.slane %v3629_v1, %v9341_v54  ;;  %v3595_v2 = vcombine.high %v3211_v36, %v3211_v36  ;;  %v3602_v51 = vrot.slane %v3211_v36, %v9341_v54  ;;  %v3214_v56 = vmax.f32 %v3156_v42, 0.0 }
 0x312   : > { %v3148_v33 = vadd.f32 %v9760_v47, %v3147_v45  ;;  %v3644_v58 = vcombine.high %v3636_v49, %v3636_v49 }
 0x313   : > { %v3609_v59 = vrot.slane %v3595_v2, %v9341_v54  ;;  %v3610_v61 = vcombine.high %v3602_v51, %v3602_v51  ;;  %v3967_v62 = vmax.f32 %v3602_v51, %v3636_v49  ;;  %v3645_v43 = vcombine.high %v3643_v53, %v3643_v53 }
 0x314   : > { %v3646_v57 = vcombine.high %v3214_v56, %v3214_v56  ;;  %v3653_v0 = vrot.slane %v3214_v56, %v9341_v54  ;;  %v3212_v3 = vmax.f32 %v3148_v33, 0.0 }
 0x315   : > { %v3611_v4 = vcombine.high %v3609_v59, %v3609_v59  ;;  %v3968_v60 = vmax.f32 %v3610_v61, %v3644_v58  ;;  %v3969_v63 = vmax.f32 %v3609_v59, %v3643_v53  ;;  %v7385_v8 = vrot.slane %v3967_v62, 9 }
 0x316   : > { %v3660_v9 = vrot.slane %v3646_v57, %v9341_v54  ;;  %v3612_v19 = vcombine.high %v3212_v3, %v3212_v3  ;;  %v3619_v11 = vrot.slane %v3212_v3, %v9341_v54  ;;  %v3661_v34 = vcombine.high %v3653_v0, %v3653_v0 }
 0x317   : > { %v3970_v26 = vmax.f32 %v3611_v4, %v3645_v43  ;;  %v7386_v13 = vrot.slane %v3968_v60, 9  ;;  %v7387_v15 = vrot.slane %v3969_v63, 9  ;;  %v4287_v16 = vmax.f32 %v3967_v62, %v7385_v8 }
 0x318   : > { %v3626_v20 = vrot.slane %v3612_v19, %v9341_v54  ;;  %v3627_v18 = vcombine.high %v3619_v11, %v3619_v11  ;;  %v3971_v35 = vmax.f32 %v3619_v11, %v3653_v0  ;;  %v3662_v52 = vcombine.high %v3660_v9, %v3660_v9 }
 0x319   : > { %v7388_v21 = vrot.slane %v3970_v26, 9  ;;  %v4288_v22 = vmax.f32 %v3968_v60, %v7386_v13  ;;  %v4289_v12 = vmax.f32 %v3969_v63, %v7387_v15  ;;  %v4538_v29 = vrot.slane %v4287_v16, %v9357_v31 }
 0x31a   : > { %v3628_v24 = vcombine.high %v3626_v20, %v3626_v20  ;;  %v3972_v50 = vmax.f32 %v3627_v18, %v3661_v34  ;;  %v3973_v17 = vmax.f32 %v3626_v20, %v3660_v9  ;;  %v7389_v25 = vrot.slane %v3971_v35, 9 }
 0x31b   : > { %v4290_v27 = vmax.f32 %v3970_v26, %v7388_v21  ;;  %v4542_v28 = vrot.slane %v4288_v22, %v9357_v31  ;;  %v4546_v55 = vrot.slane %v4289_v12, %v9357_v31 }
 0x31c   : > { %v3974_v30 = vmax.f32 %v3628_v24, %v3662_v52  ;;  %v7390_v37 = vrot.slane %v3972_v50, 9  ;;  %v7391_v38 = vrot.slane %v3973_v17, 9  ;;  %v4291_v39 = vmax.f32 %v3971_v35, %v7389_v25 }
 0x31d   : > { %v4550_v40 = vrot.slane %v4290_v27, %v9357_v31  ;;  %v4673_v5 = vsel %vm4631_vm1, %v4542_v28, %v4538_v29 }
 0x31e   : > { %v4674_v6 = vsel %vm10463_vm8, %v4546_v55, %v4673_v5  ;;  %v7392_v23 = vrot.slane %v3974_v30, 9  ;;  %v4292_v41 = vmax.f32 %v3972_v50, %v7390_v37  ;;  %v4293_v44 = vmax.f32 %v3973_v17, %v7391_v38 }
 0x31f   : > { %v4554_v32 = vrot.slane %v4291_v39, %v9357_v31  ;;  %v4675_v46 = vsel %vm10464_vm11, %v4550_v40, %v4674_v6 }
 0x320   : > { %v4294_v7 = vmax.f32 %v3974_v30, %v7392_v23  ;;  %v4558_v48 = vrot.slane %v4292_v41, %v9357_v31  ;;  %v4562_v14 = vrot.slane %v4293_v44, %v9357_v31 }
 0x321   : > { %v4676_v1 = vsel %vm4637_vm4, %v4554_v32, %v4675_v46  ;;  %v5148_v49 = vpop.permute.xlu0 %5147  ;;  %v4930_v36 = vpop.permute.xlu1 %4929 }
 0x322   : > { %v4566_v42 = vrot.slane %v4294_v7, %v9357_v31  ;;  %v4677_v45 = vsel %vm4639_vm5, %v4558_v48, %v4676_v1  ;;  %5170 = vst.msk [vmem:[#allocation6 + $0x10] sm:$0xf] %vm5167_vm6, %v5148_v49 }
 0x323   : > { %4951 = vst.msk [vmem:[#allocation6 + $0x18] sm:$0xf] %vm4947_vm14, %v4930_v36  ;;  %v4678_v53 = vsel %vm4641_vm7, %v4562_v14, %v4677_v45 }
 0x324   : > { %v4679_v2 = vsel %vm4643_vm2, %v4566_v42, %v4678_v53 }
 0x325   : > { %4709 = vst.msk [vmem:[#allocation3 + $0x61] sm:$0xff] %vm10462_vm10, %v4679_v2  ;;  %v5221_v51 = vpop.permute.xlu0 %5220  ;;  %v5003_v56 = vpop.permute.xlu1 %5002 }
 0x326   : > { %5243 = vst.msk [vmem:[#allocation6 + $0x10] sm:$0xf] %vm5240_vm0, %v5221_v51 }
 0x327   : > { %5024 = vst.msk [vmem:[#allocation6 + $0x18] sm:$0xf] %vm5020_vm9, %v5003_v56 }
 0x329   : > { %v4786_v33 = vpop.permute.xlu0 %4785  ;;  %v5076_v58 = vpop.permute.xlu1 %5075 }
 0x32a   : > { %4806 = vst.msk [vmem:[#allocation6 + $0x20] sm:$0xf] %vm4801_vm12, %v4786_v33 }
 0x32b   : > { %5097 = vst.msk [vmem:[#allocation6 + $0x18] sm:$0xf] %vm5093_vm15, %v5076_v58 }
 0x32c   : > { %v5107_v59 = vld [vmem:[#allocation3 + $0x60] sm:$0xff] }
 0x32d   : > { %v5034_v61 = vld [vmem:[#allocation3 + $0x62] sm:$0xff]  ;;  %v4859_v62 = vpop.permute.xlu0 %4858  ;;  %v7888_v43 = vpack.c.bf16 %v5107_v59, %v5107_v59 }
 0x32e   : > { %v7881_v57 = vpack.c.bf16 %v5034_v61, %v5034_v61  ;;  %4879 = vst.msk [vmem:[#allocation6 + $0x20] sm:$0xf] %vm4874_vm13, %v4859_v62  ;;  %v5180_v0 = vld [vmem:[#allocation3 + $0x61] sm:$0xff] }
 0x32f   : > { %5151 = vrot.lane.b32.xlu0 %v7888_v43, %s10429_s12  ;;  %4933 = vrot.lane.b32.xlu1 %v7888_v43, %s10442_s14  ;;  %4735 = vst.msk [vmem:[#allocation6 + $0x30] sm:$0xf] %vm4728_vm3, %v7888_v43  ;;  %v7896_v3 = vpack.c.bf16 %v5180_v0, %v5180_v0 }
 0x330   : > { %5269 = vst.msk [vmem:[#allocation6 + $0x24] sm:$0xf] %vm4728_vm3, %v7881_v57 }
 0x333   : > { %5224 = vrot.lane.b32.xlu0 %v7896_v3, %s8349_s15  ;;  %5006 = vrot.lane.b32.xlu1 %v7896_v3, %s10431_s30 }
 0x337   : > { %4789 = vrot.lane.b32.xlu0 %v7896_v3, %s10454_s13  ;;  %5079 = vrot.lane.b32.xlu1 %v7881_v57, %s10453_s24 }
 0x33b   : > { %4862 = vrot.lane.b32.xlu0 %v7881_v57, %s10440_s29 }
 0x34a   : > { %v8092_v4 = vpop.f32.mrf.mxu0 }
 0x34b   : > { %v3169_v60 = vadd.f32 %v9760_v47, %v8092_v4 }
 0x34c   : > { %v3160_v63 = vpop.f32.mrf.mxu0 }
 0x34d   : > { %v3217_v8 = vmax.f32 %v3169_v60, 0.0  ;;  %v3161_v9 = vadd.f32 %v9760_v47, %v3160_v63 }
 0x34e   : > { %v8093_v19 = vpop.f32.mrf.mxu0 }
 0x34f   : > { %v3697_v11 = vcombine.high %v3217_v8, %v3217_v8  ;;  %v3704_v26 = vrot.slane %v3217_v8, %v9341_v54  ;;  %v3215_v13 = vmax.f32 %v3161_v9, 0.0  ;;  %v3172_v15 = vadd.f32 %v9760_v47, %v8093_v19 }
 0x350   : > { %v3163_v16 = vpop.f32.mrf.mxu0 }
 0x351   : > { %v3711_v34 = vrot.slane %v3697_v11, %v9341_v54  ;;  %v3663_v20 = vcombine.high %v3215_v13, %v3215_v13  ;;  %v3670_v18 = vrot.slane %v3215_v13, %v9341_v54  ;;  %v3218_v35 = vmax.f32 %v3172_v15, 0.0 }
 0x352   : > { %v3164_v21 = vadd.f32 %v9760_v47, %v3163_v16  ;;  %v3712_v22 = vcombine.high %v3704_v26, %v3704_v26 }
 0x353   : > { %v3677_v12 = vrot.slane %v3663_v20, %v9341_v54  ;;  %v3678_v52 = vcombine.high %v3670_v18, %v3670_v18  ;;  %v3975_v24 = vmax.f32 %v3670_v18, %v3704_v26  ;;  %v3713_v50 = vcombine.high %v3711_v34, %v3711_v34 }
 0x354   : > { %v3714_v17 = vcombine.high %v3218_v35, %v3218_v35  ;;  %v3721_v25 = vrot.slane %v3218_v35, %v9341_v54  ;;  %v3216_v27 = vmax.f32 %v3164_v21, 0.0 }
 0x355   : > { %v3679_v29 = vcombine.high %v3677_v12, %v3677_v12  ;;  %v3976_v28 = vmax.f32 %v3678_v52, %v3712_v22  ;;  %v3977_v55 = vmax.f32 %v3677_v12, %v3711_v34  ;;  %v7393_v30 = vrot.slane %v3975_v24, 9 }
 0x356   : > { %v3728_v37 = vrot.slane %v3714_v17, %v9341_v54  ;;  %v3680_v38 = vcombine.high %v3216_v27, %v3216_v27  ;;  %v3687_v39 = vrot.slane %v3216_v27, %v9341_v54  ;;  %v3729_v41 = vcombine.high %v3721_v25, %v3721_v25  ;;  %v8216_v17 = vld [vmem:[#allocation6 + $0x14] ss:$8 sps:$4 sm:$0xff]  }
 0x357   : > { %v3978_v40 = vmax.f32 %v3679_v29, %v3713_v50  ;;  %v7394_v5 = vrot.slane %v3976_v28, 9  ;;  %v7395_v6 = vrot.slane %v3977_v55, 9  ;;  %v4295_v23 = vmax.f32 %v3975_v24, %v7393_v30 }
 0x358   : > { %v3694_v44 = vrot.slane %v3680_v38, %v9341_v54  ;;  %v3695_v32 = vcombine.high %v3687_v39, %v3687_v39  ;;  %v3979_v46 = vmax.f32 %v3687_v39, %v3721_v25  ;;  %v3730_v1 = vcombine.high %v3728_v37, %v3728_v37 }
 0x359   : > { %v7396_v7 = vrot.slane %v3978_v40, 9  ;;  %v4296_v48 = vmax.f32 %v3976_v28, %v7394_v5  ;;  %v4297_v14 = vmax.f32 %v3977_v55, %v7395_v6  ;;  %v4570_v2 = vrot.slane %v4295_v23, %v9357_v31 }
 0x35a   : > { %v3696_v49 = vcombine.high %v3694_v44, %v3694_v44  ;;  %v3980_v36 = vmax.f32 %v3695_v32, %v3729_v41  ;;  %v3981_v42 = vmax.f32 %v3694_v44, %v3728_v37  ;;  %v7397_v45 = vrot.slane %v3979_v46, 9 }
 0x35b   : > { %v4298_v53 = vmax.f32 %v3978_v40, %v7396_v7  ;;  %v4574_v51 = vrot.slane %v4296_v48, %v9357_v31  ;;  %v4578_v56 = vrot.slane %v4297_v14, %v9357_v31 }
 0x35c   : > { %v3982_v33 = vmax.f32 %v3696_v49, %v3730_v1  ;;  %v7398_v58 = vrot.slane %v3980_v36, 9  ;;  %v7399_v59 = vrot.slane %v3981_v42, 9  ;;  %v4299_v61 = vmax.f32 %v3979_v46, %v7397_v45 }
 0x35d   : > { %v4582_v62 = vrot.slane %v4298_v53, %v9357_v31  ;;  %v4680_v43 = vsel %vm4631_vm1, %v4574_v51, %v4570_v2 }
 0x35e   : > { %v4681_v57 = vsel %vm10463_vm8, %v4578_v56, %v4680_v43  ;;  %v7400_v0 = vrot.slane %v3982_v33, 9  ;;  %v4300_v3 = vmax.f32 %v3980_v36, %v7398_v58  ;;  %v4301_v4 = vmax.f32 %v3981_v42, %v7399_v59  ;;  %vm10465_vm8 = vmmov %vm10462_vm10 }
 0x35f   : > { %v4586_v60 = vrot.slane %v4299_v61, %v9357_v31  ;;  %v4682_v63 = vsel %vm10464_vm11, %v4582_v62, %v4681_v57  ;;  %7484 = vmatprep.mubr.msk.bf16.mxu1 %vm10465_vm8, %v8216_v17  ;;  %vm10466_vm11 = vcmask 1042434  }
 0x360   : > { %v4302_v8 = vmax.f32 %v3982_v33, %v7400_v0  ;;  %v4590_v9 = vrot.slane %v4300_v3, %v9357_v31  ;;  %v4594_v19 = vrot.slane %v4301_v4, %v9357_v31 }
 0x361   : > { %v4683_v11 = vsel %vm4637_vm4, %v4586_v60, %v4682_v63  ;;  %v4932_v26 = vpop.permute.xlu0 %4931  ;;  %v5150_v13 = vpop.permute.xlu1 %5149 }
 0x362   : > { %v4598_v15 = vrot.slane %v4302_v8, %v9357_v31  ;;  %v4684_v16 = vsel %vm4639_vm5, %v4590_v9, %v4683_v11  ;;  %4952 = vst.msk [vmem:[#allocation6 + $0x20] sm:$0xf] %vm4947_vm14, %v4932_v26 }
 0x363   : > { %5171 = vst.msk [vmem:[#allocation6 + $0x18] sm:$0xf] %vm5167_vm6, %v5150_v13  ;;  %v4685_v34 = vsel %vm4641_vm7, %v4594_v19, %v4684_v16 }
 0x364   : > { %v4686_v20 = vsel %vm4643_vm2, %v4598_v15, %v4685_v34 }
 0x365   : > { %4710 = vst.msk [vmem:[#allocation3 + $0x71] sm:$0xff] %vm10462_vm10, %v4686_v20  ;;  %v5005_v18 = vpop.permute.xlu0 %5004  ;;  %v5223_v35 = vpop.permute.xlu1 %5222  ;;  %vm10467_vm10 = vcmask 1043459  }
 0x366   : > { %5025 = vst.msk [vmem:[#allocation6 + $0x20] sm:$0xf] %vm5020_vm9, %v5005_v18 }
 0x367   : > { %5244 = vst.msk [vmem:[#allocation6 + $0x18] sm:$0xf] %vm5240_vm0, %v5223_v35 }
 0x369   : > { %v5078_v21 = vpop.permute.xlu0 %5077  ;;  %v4788_v22 = vpop.permute.xlu1 %4787 }
 0x36a   : > { %5098 = vst.msk [vmem:[#allocation6 + $0x20] sm:$0xf] %vm5093_vm15, %v5078_v21 }
 0x36b   : > { %4807 = vst.msk [vmem:[#allocation6 + $0x28] sm:$0xf] %vm4801_vm12, %v4788_v22 }
 0x36c   : > { %v4889_v12 = vld [vmem:[#allocation3 + $0x70] sm:$0xff] }
 0x36d   : > { %v5035_v52 = vld [vmem:[#allocation3 + $0x72] sm:$0xff]  ;;  %v4861_v24 = vpop.permute.xlu1 %4860  ;;  %v7866_v50 = vpack.c.bf16 %v4889_v12, %v4889_v12 }
 0x36e   : > { %v8218_v25 = vld [vmem:[#allocation6 + $0x10] ss:$8 sps:$4 sm:$0xff]   ;;  %v7882_v27 = vpack.c.bf16 %v5035_v52, %v5035_v52  ;;  %4880 = vst.msk [vmem:[#allocation6 + $0x28] sm:$0xf] %vm4874_vm13, %v4861_v24  ;;  %v4962_v29 = vld [vmem:[#allocation3 + $0x71] sm:$0xff] }
 0x36f   : > { %4935 = vrot.lane.b32.xlu0 %v7866_v50, %s10442_s14  ;;  %5153 = vrot.lane.b32.xlu1 %v7866_v50, %s10429_s12  ;;  %4736 = vst.msk [vmem:[#allocation6 + $0x38] sm:$0xf] %vm4728_vm3, %v7866_v50  ;;  %v7874_v28 = vpack.c.bf16 %v4962_v29, %v4962_v29 }
 0x370   : > { %5270 = vst.msk [vmem:[#allocation6 + $0x2c] sm:$0xf] %vm4728_vm3, %v7882_v27  ;;  %5449 = vmatmul.mubr.bf16.gmra.mxu1 %v8218_v25 }
 0x373   : > { %5008 = vrot.lane.b32.xlu0 %v7874_v28, %s10431_s30  ;;  %5226 = vrot.lane.b32.xlu1 %v7874_v28, %s8349_s15 }
 0x377   : > { %5081 = vrot.lane.b32.xlu0 %v7882_v27, %s10453_s24  ;;  %4791 = vrot.lane.b32.xlu1 %v7874_v28, %s10454_s13 }
 0x37b   : > { %4864 = vrot.lane.b32.xlu1 %v7882_v27, %s10440_s29 }
 0x386   : > { %v8096_v55 = vpop.f32.mrf.mxu0 }
 0x387   : > { %v3185_v30 = vadd.f32 %v9760_v47, %v8096_v55 }
 0x388   : > { %v3176_v37 = vpop.f32.mrf.mxu0 }
 0x389   : > { %v3221_v38 = vmax.f32 %v3185_v30, 0.0  ;;  %v3177_v39 = vadd.f32 %v9760_v47, %v3176_v37 }
 0x38a   : > { %v8097_v40 = vpop.f32.mrf.mxu0 }
 0x38b   : > { %v3765_v5 = vcombine.high %v3221_v38, %v3221_v38  ;;  %v3772_v6 = vrot.slane %v3221_v38, %v9341_v54  ;;  %v3219_v23 = vmax.f32 %v3177_v39, 0.0  ;;  %v3188_v41 = vadd.f32 %v9760_v47, %v8097_v40 }
 0x38c   : > { %v3179_v44 = vpop.f32.mrf.mxu0 }
 0x38d   : > { %v3779_v32 = vrot.slane %v3765_v5, %v9341_v54  ;;  %v3731_v46 = vcombine.high %v3219_v23, %v3219_v23  ;;  %v3738_v7 = vrot.slane %v3219_v23, %v9341_v54  ;;  %v3222_v48 = vmax.f32 %v3188_v41, 0.0 }
 0x38e   : > { %v3180_v14 = vadd.f32 %v9760_v47, %v3179_v44  ;;  %v3780_v1 = vcombine.high %v3772_v6, %v3772_v6 }
 0x38f   : > { %v3745_v49 = vrot.slane %v3731_v46, %v9341_v54  ;;  %v3746_v36 = vcombine.high %v3738_v7, %v3738_v7  ;;  %v3983_v42 = vmax.f32 %v3738_v7, %v3772_v6  ;;  %v3781_v45 = vcombine.high %v3779_v32, %v3779_v32 }
 0x390   : > { %v3782_v53 = vcombine.high %v3222_v48, %v3222_v48  ;;  %v3789_v2 = vrot.slane %v3222_v48, %v9341_v54  ;;  %v3220_v51 = vmax.f32 %v3180_v14, 0.0 }
 0x391   : > { %v3747_v56 = vcombine.high %v3745_v49, %v3745_v49  ;;  %v3984_v33 = vmax.f32 %v3746_v36, %v3780_v1  ;;  %v3985_v58 = vmax.f32 %v3745_v49, %v3779_v32  ;;  %v7401_v59 = vrot.slane %v3983_v42, 9  ;;  %v5868_v1 = vld [vmem:[#allocation4 + $0x1] sm:$0xf] }
 0x392   : > { %v3796_v61 = vrot.slane %v3782_v53, %v9341_v54  ;;  %v3748_v62 = vcombine.high %v3220_v51, %v3220_v51  ;;  %v3755_v43 = vrot.slane %v3220_v51, %v9341_v54  ;;  %v3797_v4 = vcombine.high %v3789_v2, %v3789_v2  ;;  %v5925_v51 = vld [vmem:[#allocation4 + $0x2] sm:$0xf] }
 0x393   : > { %v3986_v47 = vmax.f32 %v3747_v56, %v3781_v45  ;;  %v7402_v57 = vrot.slane %v3984_v33, 9  ;;  %v7403_v0 = vrot.slane %v3985_v58, 9  ;;  %v4303_v3 = vmax.f32 %v3983_v42, %v7401_v59 }
 0x394   : > { %v3762_v60 = vrot.slane %v3748_v62, %v9341_v54  ;;  %v3763_v63 = vcombine.high %v3755_v43, %v3755_v43  ;;  %v3987_v8 = vmax.f32 %v3755_v43, %v3789_v2  ;;  %v3798_v26 = vcombine.high %v3796_v61, %v3796_v61 }
 0x395   : > { %v7404_v9 = vrot.slane %v3986_v47, 9  ;;  %v4304_v19 = vmax.f32 %v3984_v33, %v7402_v57  ;;  %v4305_v11 = vmax.f32 %v3985_v58, %v7403_v0  ;;  %v4602_v18 = vrot.slane %v4303_v3, %v9357_v31  ;;  %v5256_v58 = vld [vmem:[#allocation3 + $0x92] sm:$0xff] }
 0x396   : > { %v3764_v13 = vcombine.high %v3762_v60, %v3762_v60  ;;  %v3988_v15 = vmax.f32 %v3763_v63, %v3797_v4  ;;  %v3989_v16 = vmax.f32 %v3762_v60, %v3796_v61  ;;  %v7405_v34 = vrot.slane %v3987_v8, 9  ;;  %v10016_v61 = vld [vmem:[%s10402_s4] ss:$0 sm:$0xff] }
 0x397   : > { %v4306_v20 = vmax.f32 %v3986_v47, %v7404_v9  ;;  %v4606_v35 = vrot.slane %v4304_v19, %v9357_v31  ;;  %v4610_v21 = vrot.slane %v4305_v11, %v9357_v31  ;;  %v5872_v2 = vpack.c.bf16 %v5868_v1, %v5868_v1  ;;  %v5110_v47 = vld [vmem:[#allocation3 + $0x90] sm:$0xff]  ;;  %v6111_v9 = vld [vmem:[#allocation4 + $0x28] sm:$0xf] }
 0x398   : > { %v3990_v22 = vmax.f32 %v3764_v13, %v3798_v26  ;;  %v7406_v12 = vrot.slane %v3988_v15, 9  ;;  %v7407_v52 = vrot.slane %v3989_v16, 9  ;;  %v4307_v24 = vmax.f32 %v3987_v8, %v7405_v34  ;;  %v5183_v8 = vld [vmem:[#allocation3 + $0x91] sm:$0xff] }
 0x399   : > { %v4614_v50 = vrot.slane %v4306_v20, %v9357_v31  ;;  %v4687_v17 = vsel %vm4631_vm1, %v4606_v35, %v4602_v18  ;;  %v5264_v59 = vpack.c.bf16 %v5256_v58, %v5256_v58  ;;  %v5886_v62 = vrot.slane %v5872_v2, %v9341_v54 }
 0x39a   : > { %v4688_v25 = vsel %vm10466_vm11, %v4610_v21, %v4687_v17  ;;  %v7408_v27 = vrot.slane %v3990_v22, 9  ;;  %v4308_v29 = vmax.f32 %v3988_v15, %v7406_v12  ;;  %v4309_v28 = vmax.f32 %v3989_v16, %v7407_v52 }
 0x39b   : > { %v4618_v55 = vrot.slane %v4307_v24, %v9357_v31  ;;  %v4689_v30 = vsel %vm10467_vm10, %v4614_v50, %v4688_v25  ;;  %v5929_v43 = vpack.c.bf16 %v5925_v51, %v5925_v51  ;;  %5272 = vst.msk [vmem:[#allocation6 + $0x3c] sm:$0xf] %vm4728_vm3, %v5264_v59  ;;  %v7891_v4 = vpack.c.bf16 %v5110_v47, %v5110_v47 }
 0x39c   : > { %v4310_v37 = vmax.f32 %v3990_v22, %v7408_v27  ;;  %v4622_v38 = vrot.slane %v4308_v29, %v9357_v31  ;;  %v4626_v39 = vrot.slane %v4309_v28, %v9357_v31  ;;  %v7899_v15 = vpack.c.bf16 %v5183_v8, %v5183_v8 }
 0x39d   : > { %v4690_v40 = vsel %vm4637_vm4, %v4618_v55, %v4689_v30  ;;  %v5943_v60 = vrot.slane %v5929_v43, %v9341_v54  ;;  %v6115_v16 = vpack.c.bf16 %v6111_v9, %v6111_v9  ;;  %vm10469_vm4 = vmmov %vm10467_vm10 }
 0x39e   : > { %v4630_v5 = vrot.slane %v4310_v37, %v9357_v31  ;;  %v4691_v6 = vsel %vm4639_vm5, %v4622_v38, %v4690_v40  ;;  %vm5863_vm5 = vcmask 254976  }
 0x39f   : > { %v4692_v23 = vsel %vm4641_vm7, %v4626_v39, %v4691_v6  ;;  %v6147_v22 = vrot.slane %v6115_v16, %v9341_v54  ;;  %vm10470_vm7 = vmmov %vm10465_vm8 }
 0x3a0   : > { %v4693_v41 = vsel %vm4643_vm2, %v4630_v5, %v4692_v23  ;;  %vm5850_vm2 = vcmask 257024  }
 0x3a1   : > { %4711 = vst.msk [vmem:[#allocation3 + $0x81] sm:$0xff] %vm10465_vm8, %v4693_v41  ;;  %v5152_v44 = vpop.permute.xlu0 %5151  ;;  %v4934_v32 = vpop.permute.xlu1 %4933  ;;  %vm10477_vm8 = vmmov %vm10469_vm4 }
 0x3a2   : > { %5172 = vst.msk [vmem:[#allocation6 + $0x20] sm:$0xf] %vm5167_vm6, %v5152_v44 }
 0x3a3   : > { %4953 = vst.msk [vmem:[#allocation6 + $0x28] sm:$0xf] %vm4947_vm14, %v4934_v32 }
 0x3a5   : > { %v5225_v46 = vpop.permute.xlu0 %5224  ;;  %v5007_v7 = vpop.permute.xlu1 %5006 }
 0x3a6   : > { %5245 = vst.msk [vmem:[#allocation6 + $0x20] sm:$0xf] %vm5240_vm0, %v5225_v46 }
 0x3a7   : > { %5026 = vst.msk [vmem:[#allocation6 + $0x28] sm:$0xf] %vm5020_vm9, %v5007_v7 }
 0x3a8   : > { %v5109_v48 = vld [vmem:[#allocation3 + $0x80] sm:$0xff] }
 0x3a9   : > { %v5036_v14 = vld [vmem:[#allocation3 + $0x82] sm:$0xff]  ;;  %v4790_v49 = vpop.permute.xlu0 %4789  ;;  %v5080_v36 = vpop.permute.xlu1 %5079  ;;  %v7890_v42 = vpack.c.bf16 %v5109_v48, %v5109_v48 }
 0x3aa   : > { %v7883_v45 = vpack.c.bf16 %v5036_v14, %v5036_v14  ;;  %4808 = vst.msk [vmem:[#allocation6 + $0x30] sm:$0xf] %vm4801_vm12, %v4790_v49  ;;  %v5182_v53 = vld [vmem:[#allocation3 + $0x81] sm:$0xff] }
 0x3ab   : > { %5099 = vst.msk [vmem:[#allocation6 + $0x28] sm:$0xf] %vm5093_vm15, %v5080_v36  ;;  %5155 = vrot.lane.b32.xlu0 %v7890_v42, %s10429_s12  ;;  %4937 = vrot.lane.b32.xlu1 %v7890_v42, %s10442_s14  ;;  %v7898_v33 = vpack.c.bf16 %v5182_v53, %v5182_v53  ;;  %v5855_v48 = vld [vmem:[#allocation4] sm:$0xf]  ;;  %s10478_s14 = smov 64  }
 0x3ac   : > { %5271 = vst.msk [vmem:[#allocation6 + $0x34] sm:$0xf] %vm4728_vm3, %v7883_v45  ;;  %vm10468_vm3 = vmmov %vm10466_vm11  ;;  %v5859_v1 = vpack.c.bf16 %v5855_v48, %v5855_v48 }
 0x3ad   : > { %v4863_v56 = vpop.permute.xlu0 %4862  ;;  %vm10475_vm11 = vmmov %vm10469_vm4 }
 0x3ae   : > { %4881 = vst.msk [vmem:[#allocation6 + $0x30] sm:$0xf] %vm4874_vm13, %v4863_v56 }
 0x3af   : > { %5228 = vrot.lane.b32.xlu0 %v7898_v33, %s8349_s15  ;;  %5010 = vrot.lane.b32.xlu1 %v7898_v33, %s10431_s30  ;;  %5864 = vst.msk [vmem:[#allocation7] sm:$0x3] %vm5863_vm5, %v5859_v1 }
 0x3b0   : > { %v5442_v57 = vpop.f32.mrf.mxu1 }
 0x3b1   : > { %v5443_v0 = vadd.f32 %v10016_v61, %v5442_v57 }
 0x3b2   : > { %v5444_v3 = vpop.f32.mrf.mxu1 }
 0x3b3   : > { %5083 = vrot.lane.b32.xlu1 %v7883_v45, %s10453_s24  ;;  %5908 = vrot.lane.b32.xlu0 %v5886_v62, %s10440_s29  ;;  %v5473_v63 = vmax.f32 %v5443_v0, 0.0 }
 0x3b4   : > { %v5445_v19 = vpop.f32.mrf.mxu1 }
 0x3b5   : > { %v5489_v11 = vcombine.high %v5473_v63, %v5473_v63  ;;  %v5446_v26 = vadd.f32 %v10016_v61, %v5445_v19  ;;  %v5496_v34 = vrot.slane %v5473_v63, %v9341_v54 }
 0x3b6   : > { %v5447_v13 = vpop.f32.mrf.mxu1 }
 0x3b7   : > { %5157 = vrot.lane.b32.xlu1 %v7891_v4, %s10429_s12  ;;  %5965 = vrot.lane.b32.xlu0 %v5943_v60, %s10431_s30  ;;  %v5474_v20 = vmax.f32 %v5446_v26, 0.0  ;;  %v5503_v18 = vrot.slane %v5489_v11, %v9341_v54  ;;  %v5504_v12 = vcombine.high %v5496_v34, %v5496_v34  ;;  %v8219_v11 = vld [vmem:[#allocation6 + $0x24] ss:$8 sps:$4 sm:$0xff]  }
 0x3b8   : > { %7485 = vmatprep.mubr.msk.bf16.mxu1 %vm10470_vm7, %v8219_v11 }
 0x3b9   : > { %v5506_v35 = vcombine.high %v5474_v20, %v5474_v20  ;;  %v5513_v21 = vrot.slane %v5474_v20, %v9341_v54  ;;  %v5505_v17 = vcombine.high %v5503_v18, %v5503_v18 }
 0x3bb   : > { %5230 = vrot.lane.b32.xlu1 %v7899_v15, %s8349_s15  ;;  %v5520_v52 = vrot.slane %v5506_v35, %v9341_v54  ;;  %v5521_v24 = vcombine.high %v5513_v21, %v5513_v21  ;;  %v5657_v50 = vmax.f32 %v5496_v34, %v5513_v21  ;;  %s10482_s15 = sand.u32 1, %s8326_s18  }
 0x3bc   : > { %s6945_s0 = scalar_lea.sflag [#allocation10], %s10482_s15 }
 0x3bd   : > { %v5522_v25 = vcombine.high %v5520_v52, %v5520_v52  ;;  %v5658_v27 = vmax.f32 %v5504_v12, %v5521_v24  ;;  %v5659_v29 = vmax.f32 %v5503_v18, %v5520_v52  ;;  %v7487_v28 = vrot.slane %v5657_v50, 9 }
 0x3bf   : > { %6154 = vrot.lane.b32.xlu1 %v6147_v22, %s10431_s30  ;;  %v5660_v55 = vmax.f32 %v5505_v17, %v5522_v25  ;;  %v7488_v30 = vrot.slane %v5658_v27, 9  ;;  %v7489_v37 = vrot.slane %v5659_v29, 9  ;;  %v5737_v38 = vmax.f32 %v5657_v50, %v7487_v28  ;;  %v8222_v25 = vld [vmem:[#allocation6 + $0x34] ss:$8 sps:$4 sm:$0xff]  }
 0x3c1   : > { %v7490_v39 = vrot.slane %v5660_v55, 9  ;;  %v5738_v40 = vmax.f32 %v5658_v27, %v7488_v30  ;;  %v5739_v5 = vmax.f32 %v5659_v29, %v7489_v37  ;;  %v5772_v23 = vrot.slane %v5737_v38, %v9357_v31 }
 0x3c3   : > { %v5740_v6 = vmax.f32 %v5660_v55, %v7490_v39  ;;  %v5776_v41 = vrot.slane %v5738_v40, %v9357_v31  ;;  %v5780_v44 = vrot.slane %v5739_v5, %v9357_v31 }
 0x3c5   : > { %v5784_v32 = vrot.slane %v5740_v6, %v9357_v31  ;;  %v5833_v46 = vsel %vm4631_vm1, %v5776_v41, %v5772_v23 }
 0x3c6   : > { %v5834_v7 = vsel %vm10468_vm3, %v5780_v44, %v5833_v46 }
 0x3c7   : > { %v5835_v14 = vsel %vm10469_vm4, %v5784_v32, %v5834_v7 }
 0x3c8   : > { %5851 = vst.msk [vmem:[#allocation4 + $0x9] sm:$0xf] %vm5850_vm2, %v5835_v14 }
 0x3cf   : > { %v6051_v49 = vld [vmem:[#allocation4 + $0xa] sm:$0xf] }
 0x3d0   : > { %v5869_v36 = vld [vmem:[#allocation4 + $0x9] sm:$0xf]  ;;  %v6055_v45 = vpack.c.bf16 %v6051_v49, %v6051_v49 }
 0x3d1   : > { %v5982_v42 = vld [vmem:[#allocation4 + $0x8] sm:$0xf]  ;;  %v5873_v53 = vpack.c.bf16 %v5869_v36, %v5869_v36 }
 0x3d2   : > { %v5926_v2 = vld [vmem:[#allocation4 + $0xa] sm:$0xf]  ;;  %v6069_v59 = vrot.slane %v6055_v45, %v9341_v54  ;;  %v5986_v43 = vpack.c.bf16 %v5982_v42, %v5982_v42 }
 0x3d3   : > { %v6039_v51 = vld [vmem:[#allocation4 + $0x9] sm:$0xf]  ;;  %v5893_v62 = vrot.slane %v5873_v53, %v9341_v54  ;;  %v5930_v47 = vpack.c.bf16 %v5926_v2, %v5926_v2 }
 0x3d4   : > { %v5856_v56 = vld [vmem:[#allocation4 + $0x8] sm:$0xf]  ;;  %v6043_v33 = vpack.c.bf16 %v6039_v51, %v6039_v51  ;;  %6091 = vrot.lane.b32.xlu0 %v6069_v59, %s10440_s29  ;;  %v6000_v57 = vrot.slane %v5986_v43, %v9341_v54 }
 0x3d5   : > { %v5860_v58 = vpack.c.bf16 %v5856_v56, %v5856_v56  ;;  %5910 = vrot.lane.b32.xlu1 %v5893_v62, %s10440_s29  ;;  %v5950_v0 = vrot.slane %v5930_v47, %v9341_v54 }
 0x3d6   : > { %6047 = vst.msk [vmem:[#allocation7 + $0x2] sm:$0x3] %vm5863_vm5, %v6043_v33 }
 0x3d7   : > { %5865 = vst.msk [vmem:[#allocation7 + $0x6] sm:$0x3] %vm5863_vm5, %v5860_v58 }
 0x3d8   : > { %6022 = vrot.lane.b32.xlu0 %v6000_v57, %s10429_s12 }
 0x3d9   : > { %5967 = vrot.lane.b32.xlu1 %v5950_v0, %s10431_s30 }
 0x3e1   : > { %v4936_v3 = vpop.permute.xlu0 %4935  ;;  %v5154_v4 = vpop.permute.xlu1 %5153 }
 0x3e2   : > { %4954 = vst.msk [vmem:[#allocation6 + $0x30] sm:$0xf] %vm4947_vm14, %v4936_v3 }
 0x3e3   : > { %5173 = vst.msk [vmem:[#allocation6 + $0x28] sm:$0xf] %vm5167_vm6, %v5154_v4 }
 0x3e5   : > { %v5009_v60 = vpop.permute.xlu0 %5008  ;;  %v5227_v63 = vpop.permute.xlu1 %5226 }
 0x3e6   : > { %5027 = vst.msk [vmem:[#allocation6 + $0x30] sm:$0xf] %vm5020_vm9, %v5009_v60 }
 0x3e7   : > { %5246 = vst.msk [vmem:[#allocation6 + $0x28] sm:$0xf] %vm5240_vm0, %v5227_v63 }
 0x3e9   : > { %v5082_v8 = vpop.permute.xlu0 %5081  ;;  %v4792_v9 = vpop.permute.xlu1 %4791 }
 0x3ea   : > { %5100 = vst.msk [vmem:[#allocation6 + $0x30] sm:$0xf] %vm5093_vm15, %v5082_v8 }
 0x3eb   : > { %4809 = vst.msk [vmem:[#allocation6 + $0x38] sm:$0xf] %vm4801_vm12, %v4792_v9  ;;  %vm5920_vm12 = vcmask 517376  }
 0x3ed   : > { %v4865_v19 = vpop.permute.xlu1 %4864 }
 0x3ee   : > { %v8221_v26 = vld [vmem:[#allocation6 + $0x20] ss:$8 sps:$4 sm:$0xff]   ;;  %4882 = vst.msk [vmem:[#allocation6 + $0x38] sm:$0xf] %vm4874_vm13, %v4865_v19  ;;  %vm5977_vm13 = vcmask 779776  }
 0x3ef   : > { %5457 = vmatmul.mubr.bf16.gmra.mxu1 %v8221_v26 }
 0x41d   : > { %v5156_v13 = vpop.permute.xlu0 %5155  ;;  %v4938_v15 = vpop.permute.xlu1 %4937 }
 0x41e   : > { %5174 = vst.msk [vmem:[#allocation6 + $0x30] sm:$0xf] %vm5167_vm6, %v5156_v13 }
 0x41f   : > { %4955 = vst.msk [vmem:[#allocation6 + $0x38] sm:$0xf] %vm4947_vm14, %v4938_v15  ;;  %vm10471_vm14 = vmmov %vm10470_vm7  ;;  %vm6610_vm7 = vcmask 1040896  }
 0x420   : > { %7486 = vmatprep.mubr.msk.bf16.mxu1 %vm10471_vm14, %v8222_v25 }
 0x421   : > { %v5229_v16 = vpop.permute.xlu0 %5228  ;;  %v5011_v34 = vpop.permute.xlu1 %5010 }
 0x422   : > { %5247 = vst.msk [vmem:[#allocation6 + $0x30] sm:$0xf] %vm5240_vm0, %v5229_v16 }
 0x423   : > { %5028 = vst.msk [vmem:[#allocation6 + $0x38] sm:$0xf] %vm5020_vm9, %v5011_v34  ;;  %vm10472_vm9 = vmmov %vm10468_vm3 }
 0x425   : > { %v5084_v20 = vpop.permute.xlu1 %5083  ;;  %v5909_v18 = vpop.permute.xlu0 %5908 }
 0x426   : > { %5101 = vst.msk [vmem:[#allocation6 + $0x38] sm:$0xf] %vm5093_vm15, %v5084_v20  ;;  %vm10473_vm15 = vmmov %vm10469_vm4  ;;  %vm6586_vm4 = vsmask.f32 256 }
 0x427   : > { %5921 = vst.msk [vmem:[#allocation7] sm:$0x3] %vm5920_vm12, %v5909_v18 }
 0x429   : > { %v5158_v35 = vpop.permute.xlu1 %5157  ;;  %v5966_v21 = vpop.permute.xlu0 %5965 }
 0x42a   : > { %5175 = vst.msk [vmem:[#allocation6 + $0x38] sm:$0xf] %vm5167_vm6, %v5158_v35  ;;  %vm6034_vm6 = vcmask 1042176  }
 0x42b   : > { %5978 = vst.msk [vmem:[#allocation7] sm:$0x3] %vm5977_vm13, %v5966_v21 }
 0x42d   : > { %v5231_v22 = vpop.permute.xlu1 %5230 }
 0x42e   : > { %5248 = vst.msk [vmem:[#allocation6 + $0x38] sm:$0xf] %vm5240_vm0, %v5231_v22  ;;  %vm10474_vm0 = vmmov %vm10468_vm3  ;;  %vm6585_vm3 = vcmask 516096  }
 0x42f   : > { %vm10476_vm10 = vmmov %vm10474_vm0 }
 0x430   : > { %v5450_v12 = vpop.f32.mrf.mxu1 }
 0x431   : > { %v5451_v52 = vadd.f32 %v10016_v61, %v5450_v12  ;;  %v10077_v42 = vpop.permute.xlu1 %6154 }
 0x432   : > { %v5452_v24 = vpop.f32.mrf.mxu1 }
 0x433   : > { %v5475_v50 = vmax.f32 %v5451_v52, 0.0 }
 0x434   : > { %v5453_v17 = vpop.f32.mrf.mxu1 }
 0x435   : > { %v8224_v27 = vld [vmem:[#allocation6 + $0x30] ss:$8 sps:$4 sm:$0xff]   ;;  %v5523_v29 = vcombine.high %v5475_v50, %v5475_v50  ;;  %v5454_v28 = vadd.f32 %v10016_v61, %v5453_v17  ;;  %v5530_v30 = vrot.slane %v5475_v50, %v9341_v54 }
 0x436   : > { %v5455_v55 = vpop.f32.mrf.mxu1  ;;  %5465 = vmatmul.mubr.bf16.gmra.mxu1 %v8224_v27 }
 0x437   : > { %v5476_v37 = vmax.f32 %v5454_v28, 0.0  ;;  %v5537_v38 = vrot.slane %v5523_v29, %v9341_v54  ;;  %v5538_v5 = vcombine.high %v5530_v30, %v5530_v30 }
 0x439   : > { %v5540_v39 = vcombine.high %v5476_v37, %v5476_v37  ;;  %v5547_v40 = vrot.slane %v5476_v37, %v9341_v54  ;;  %v5539_v44 = vcombine.high %v5537_v38, %v5537_v38 }
 0x43b   : > { %v5554_v6 = vrot.slane %v5540_v39, %v9341_v54  ;;  %v5555_v23 = vcombine.high %v5547_v40, %v5547_v40  ;;  %v5661_v41 = vmax.f32 %v5530_v30, %v5547_v40 }
 0x43d   : > { %v5556_v32 = vcombine.high %v5554_v6, %v5554_v6  ;;  %v5662_v46 = vmax.f32 %v5538_v5, %v5555_v23  ;;  %v5663_v7 = vmax.f32 %v5537_v38, %v5554_v6  ;;  %v7491_v48 = vrot.slane %v5661_v41, 9 }
 0x43f   : > { %v5664_v14 = vmax.f32 %v5539_v44, %v5556_v32  ;;  %v7492_v1 = vrot.slane %v5662_v46, 9  ;;  %v7493_v49 = vrot.slane %v5663_v7, 9  ;;  %v5741_v36 = vmax.f32 %v5661_v41, %v7491_v48 }
 0x441   : > { %v7494_v45 = vrot.slane %v5664_v14, 9  ;;  %v5742_v53 = vmax.f32 %v5662_v46, %v7492_v1  ;;  %v5743_v2 = vmax.f32 %v5663_v7, %v7493_v49  ;;  %v5788_v56 = vrot.slane %v5741_v36, %v9357_v31 }
 0x443   : > { %v5744_v51 = vmax.f32 %v5664_v14, %v7494_v45  ;;  %v5792_v33 = vrot.slane %v5742_v53, %v9357_v31  ;;  %v5796_v58 = vrot.slane %v5743_v2, %v9357_v31 }
 0x445   : > { %v5800_v59 = vrot.slane %v5744_v51, %v9357_v31  ;;  %v5836_v62 = vsel %vm4631_vm1, %v5792_v33, %v5788_v56 }
 0x446   : > { %v5837_v43 = vsel %vm10472_vm9, %v5796_v58, %v5836_v62  ;;  %v6092_v47 = vpop.permute.xlu0 %6091 }
 0x447   : > { %v5911_v57 = vpop.permute.xlu1 %5910  ;;  %v5838_v0 = vsel %vm10473_vm15, %v5800_v59, %v5837_v43  ;;  %6103 = vst.msk [vmem:[#allocation7 + $0x2] sm:$0x3] %vm5920_vm12, %v6092_v47 }
 0x448   : > { %5922 = vst.msk [vmem:[#allocation7 + $0x6] sm:$0x3] %vm5920_vm12, %v5911_v57 }
 0x449   : > { %5852 = vst.msk [vmem:[#allocation4 + $0x11] sm:$0xf] %vm5850_vm2, %v5838_v0 }
 0x44a   : > { %v6023_v3 = vpop.permute.xlu0 %6022 }
 0x44b   : > { %v5968_v4 = vpop.permute.xlu1 %5967  ;;  %6035 = vst.msk [vmem:[#allocation7] sm:$0x3] %vm6034_vm6, %v6023_v3 }
 0x44c   : > { %5979 = vst.msk [vmem:[#allocation7 + $0x6] sm:$0x3] %vm5977_vm13, %v5968_v4 }
 0x450   : > { %v5870_v60 = vld [vmem:[#allocation4 + $0x11] sm:$0xf] }
 0x451   : > { %v6052_v63 = vld [vmem:[#allocation4 + $0x12] sm:$0xf]  ;;  %v5874_v9 = vpack.c.bf16 %v5870_v60, %v5870_v60 }
 0x452   : > { %v5927_v8 = vld [vmem:[#allocation4 + $0x12] sm:$0xf]  ;;  %v6056_v19 = vpack.c.bf16 %v6052_v63, %v6052_v63 }
 0x453   : > { %v5983_v11 = vld [vmem:[#allocation4 + $0x10] sm:$0xf]  ;;  %v5931_v26 = vpack.c.bf16 %v5927_v8, %v5927_v8  ;;  %v5900_v34 = vrot.slane %v5874_v9, %v9341_v54 }
 0x454   : > { %v5857_v13 = vld [vmem:[#allocation4 + $0x10] sm:$0xf]  ;;  %v6076_v20 = vrot.slane %v6056_v19, %v9341_v54  ;;  %v5987_v18 = vpack.c.bf16 %v5983_v11, %v5983_v11 }
 0x455   : > { %v6040_v15 = vld [vmem:[#allocation4 + $0x11] sm:$0xf]  ;;  %v5861_v35 = vpack.c.bf16 %v5857_v13, %v5857_v13  ;;  %5912 = vrot.lane.b32.xlu0 %v5900_v34, %s10440_s29  ;;  %v5957_v52 = vrot.slane %v5931_v26, %v9341_v54 }
 0x456   : > { %v6220_v16 = vld [vmem:[#allocation4 + $0x12] sm:$0xf]  ;;  %v6044_v22 = vpack.c.bf16 %v6040_v15, %v6040_v15  ;;  %6093 = vrot.lane.b32.xlu1 %v6076_v20, %s10440_s29  ;;  %v6007_v24 = vrot.slane %v5987_v18, %v9341_v54 }
 0x457   : > { %v6108_v21 = vld [vmem:[#allocation4 + $0x10] sm:$0xf]  ;;  %5866 = vst.msk [vmem:[#allocation7 + $0xc] sm:$0x3] %vm5863_vm5, %v5861_v35  ;;  %v6224_v12 = vpack.c.bf16 %v6220_v16, %v6220_v16 }
 0x458   : > { %6048 = vst.msk [vmem:[#allocation7 + $0x8] sm:$0x3] %vm5863_vm5, %v6044_v22  ;;  %v6112_v50 = vpack.c.bf16 %v6108_v21, %v6108_v21  ;;  %v6164_v17 = vld [vmem:[#allocation4 + $0x11] sm:$0xf] }
 0x459   : > { %6228 = vst.msk [vmem:[#allocation7 + $0x4] sm:$0x3] %vm5863_vm5, %v6224_v12  ;;  %5969 = vrot.lane.b32.xlu0 %v5957_v52, %s10431_s30  ;;  %v6168_v27 = vpack.c.bf16 %v6164_v17, %v6164_v17 }
 0x45a   : > { %6024 = vrot.lane.b32.xlu1 %v6007_v24, %s10429_s12  ;;  %v6126_v25 = vrot.slane %v6112_v50, %v9341_v54 }
 0x45b   : > { %v6182_v29 = vrot.slane %v6168_v27, %v9341_v54 }
 0x45d   : > { %6148 = vrot.lane.b32.xlu0 %v6126_v25, %s10431_s30 }
 0x461   : > { %6204 = vrot.lane.b32.xlu0 %v6182_v29, %s10429_s12 }
 0x4af   : > { %v5458_v28 = vpop.f32.mrf.mxu1 }
 0x4b0   : > { %v5459_v55 = vadd.f32 %v10016_v61, %v5458_v28  ;;  %v8225_v28 = vld [vmem:[%s10403_s5 + $0x78] sm:$0xff]  }
 0x4b1   : > { %v5460_v30 = vpop.f32.mrf.mxu1  ;;  %8000 = vmatprep.subr.bf16.mxu1 %v8225_v28 }
 0x4b2   : > { %v5477_v37 = vmax.f32 %v5459_v55, 0.0  ;;  %v8226_v55 = vld [vmem:[%s10403_s5 + $0x38] sm:$0xff]   ;;  %v8227_v30 = vld [vmem:[%s10403_s5 + $0x70] sm:$0xff]  }
 0x4b3   : > { %v5461_v38 = vpop.f32.mrf.mxu1  ;;  %8001 = vmatpush3.bf16.msra.mxu1 %v8226_v55  ;;  %v8235_v55 = vld [vmem:[%s10403_s5 + $0x50] sm:$0xff]  }
 0x4b4   : > { %v5557_v39 = vcombine.high %v5477_v37, %v5477_v37  ;;  %v5462_v40 = vadd.f32 %v10016_v61, %v5461_v38  ;;  %v5564_v6 = vrot.slane %v5477_v37, %v9341_v54  ;;  %8002 = vmatprep.subr.bf16.mxu1 %v8227_v30  ;;  %v6167_v30 = vld [vmem:[#allocation4 + $0x29] sm:$0xf] }
 0x4b5   : > { %v5463_v5 = vpop.f32.mrf.mxu1 }
 0x4b6   : > { %v5478_v23 = vmax.f32 %v5462_v40, 0.0  ;;  %v5571_v41 = vrot.slane %v5557_v39, %v9341_v54  ;;  %v5572_v46 = vcombine.high %v5564_v6, %v5564_v6  ;;  %v8228_v5 = vld [vmem:[%s10403_s5 + $0x30] sm:$0xff]  }
 0x4b7   : > { %8003 = vmatpush3.bf16.msra.mxu1 %v8228_v5 }
 0x4b8   : > { %v5574_v44 = vcombine.high %v5478_v23, %v5478_v23  ;;  %v5581_v32 = vrot.slane %v5478_v23, %v9341_v54  ;;  %v5573_v1 = vcombine.high %v5571_v41, %v5571_v41  ;;  %v8229_v23 = vld [vmem:[%s10403_s5 + $0x68] sm:$0xff]  }
 0x4b9   : > { %8004 = vmatprep.subr.bf16.mxu1 %v8229_v23 }
 0x4ba   : > { %v5588_v7 = vrot.slane %v5574_v44, %v9341_v54  ;;  %v5589_v48 = vcombine.high %v5581_v32, %v5581_v32  ;;  %v5665_v14 = vmax.f32 %v5564_v6, %v5581_v32  ;;  %v8230_v32 = vld [vmem:[%s10403_s5 + $0x28] sm:$0xff]  }
 0x4bb   : > { %8005 = vmatpush3.bf16.msra.mxu1 %v8230_v32  ;;  %v6223_v32 = vld [vmem:[#allocation4 + $0x2a] sm:$0xf] }
 0x4bc   : > { %v5590_v49 = vcombine.high %v5588_v7, %v5588_v7  ;;  %v5666_v36 = vmax.f32 %v5572_v46, %v5589_v48  ;;  %v5667_v45 = vmax.f32 %v5571_v41, %v5588_v7  ;;  %v7495_v53 = vrot.slane %v5665_v14, 9 }
 0x4be   : > { %v5668_v2 = vmax.f32 %v5573_v1, %v5590_v49  ;;  %v7496_v51 = vrot.slane %v5666_v36, 9  ;;  %v7497_v56 = vrot.slane %v5667_v45, 9  ;;  %v5745_v33 = vmax.f32 %v5665_v14, %v7495_v53 }
 0x4c0   : > { %v7498_v58 = vrot.slane %v5668_v2, 9  ;;  %v5746_v59 = vmax.f32 %v5666_v36, %v7496_v51  ;;  %v5747_v62 = vmax.f32 %v5667_v45, %v7497_v56  ;;  %v5804_v47 = vrot.slane %v5745_v33, %v9357_v31 }
 0x4c2   : > { %v5748_v43 = vmax.f32 %v5668_v2, %v7498_v58  ;;  %v5808_v57 = vrot.slane %v5746_v59, %v9357_v31  ;;  %v5812_v0 = vrot.slane %v5747_v62, %v9357_v31 }
 0x4c4   : > { %v5816_v3 = vrot.slane %v5748_v43, %v9357_v31  ;;  %v5839_v4 = vsel %vm4631_vm1, %v5808_v57, %v5804_v47 }
 0x4c5   : > { %v5840_v60 = vsel %vm10474_vm0, %v5812_v0, %v5839_v4 }
 0x4c6   : > { %v5841_v63 = vsel %vm10475_vm11, %v5816_v3, %v5840_v60 }
 0x4c7   : > { %v5913_v8 = vpop.permute.xlu0 %5912  ;;  %5853 = vst.msk [vmem:[#allocation4 + $0x19] sm:$0xf] %vm5850_vm2, %v5841_v63 }
 0x4c8   : > { %v6094_v9 = vpop.permute.xlu1 %6093  ;;  %5923 = vst.msk [vmem:[#allocation7 + $0xc] sm:$0x3] %vm5920_vm12, %v5913_v8 }
 0x4c9   : > { %6104 = vst.msk [vmem:[#allocation7 + $0x8] sm:$0x3] %vm5920_vm12, %v6094_v9 }
 0x4cb   : > { %v5970_v19 = vpop.permute.xlu0 %5969 }
 0x4cc   : > { %v6025_v11 = vpop.permute.xlu1 %6024  ;;  %5980 = vst.msk [vmem:[#allocation7 + $0xc] sm:$0x3] %vm5977_vm13, %v5970_v19 }
 0x4cd   : > { %6036 = vst.msk [vmem:[#allocation7 + $0x6] sm:$0x3] %vm6034_vm6, %v6025_v11 }
 0x4ce   : > { %v6053_v13 = vld [vmem:[#allocation4 + $0x1a] sm:$0xf] }
 0x4cf   : > { %v6149_v26 = vpop.permute.xlu0 %6148  ;;  %v5871_v15 = vld [vmem:[#allocation4 + $0x19] sm:$0xf]  ;;  %v6057_v34 = vpack.c.bf16 %v6053_v13, %v6053_v13 }
 0x4d0   : > { %v5984_v16 = vld [vmem:[#allocation4 + $0x18] sm:$0xf]  ;;  %6160 = vst.msk [vmem:[#allocation7 + $0x2] sm:$0x3] %vm5977_vm13, %v6149_v26  ;;  %v5875_v20 = vpack.c.bf16 %v5871_v15, %v5871_v15 }
 0x4d1   : > { %v5928_v18 = vld [vmem:[#allocation4 + $0x1a] sm:$0xf]  ;;  %v5988_v35 = vpack.c.bf16 %v5984_v16, %v5984_v16  ;;  %v6083_v52 = vrot.slane %v6057_v34, %v9341_v54 }
 0x4d2   : > { %v6041_v21 = vld [vmem:[#allocation4 + $0x19] sm:$0xf]  ;;  %v5907_v24 = vrot.slane %v5875_v20, %v9341_v54  ;;  %v5932_v50 = vpack.c.bf16 %v5928_v18, %v5928_v18 }
 0x4d3   : > { %v5858_v22 = vld [vmem:[#allocation4 + $0x18] sm:$0xf]  ;;  %v6045_v25 = vpack.c.bf16 %v6041_v21, %v6041_v21  ;;  %v6205_v27 = vpop.permute.xlu0 %6204  ;;  %6095 = vrot.lane.b32.xlu0 %v6083_v52, %s10440_s29  ;;  %v6014_v38 = vrot.slane %v5988_v35, %v9341_v54  ;;  %v8234_v52 = vld [vmem:[%s10403_s5 + $0x18] sm:$0xff]  }
 0x4d4   : > { %v6221_v12 = vld [vmem:[#allocation4 + $0x1a] sm:$0xf]  ;;  %v5862_v29 = vpack.c.bf16 %v5858_v22, %v5858_v22  ;;  %6216 = vst.msk [vmem:[#allocation7 + $0x2] sm:$0x3] %vm6034_vm6, %v6205_v27  ;;  %5914 = vrot.lane.b32.xlu1 %v5907_v24, %s10440_s29  ;;  %v5964_v39 = vrot.slane %v5932_v50, %v9341_v54  ;;  %v8231_v22 = vld [vmem:[%s10403_s5 + $0x60] sm:$0xff]  }
 0x4d5   : > { %v6109_v17 = vld [vmem:[#allocation4 + $0x18] sm:$0xf]  ;;  %6049 = vst.msk [vmem:[#allocation7 + $0xe] sm:$0x3] %vm5863_vm5, %v6045_v25  ;;  %v6225_v37 = vpack.c.bf16 %v6221_v12, %v6221_v12  ;;  %v8232_v12 = vld [vmem:[%s10403_s5 + $0x20] sm:$0xff]   ;;  %8006 = vmatprep.subr.bf16.mxu1 %v8231_v22 }
 0x4d6   : > { %5867 = vst.msk [vmem:[#allocation7 + $0x12] sm:$0x3] %vm5863_vm5, %v5862_v29  ;;  %v6113_v40 = vpack.c.bf16 %v6109_v17, %v6109_v17  ;;  %v6165_v6 = vld [vmem:[#allocation4 + $0x19] sm:$0xf]  ;;  %8007 = vmatpush3.bf16.msra.mxu1 %v8232_v12  ;;  %v8255_v22 = vld [vmem:[%s10405_s7 + $0x60] sm:$0xff]  }
 0x4d7   : > { %6229 = vst.msk [vmem:[#allocation7 + $0xa] sm:$0x3] %vm5863_vm5, %v6225_v37  ;;  %6026 = vrot.lane.b32.xlu0 %v6014_v38, %s10429_s12  ;;  %v6169_v44 = vpack.c.bf16 %v6165_v6, %v6165_v6  ;;  %v8236_v38 = vld [vmem:[%s10403_s5 + $0x10] sm:$0xff]   ;;  %v8256_v12 = vld [vmem:[%s10405_s7 + $0x20] sm:$0xff]  }
 0x4d8   : > { %5971 = vrot.lane.b32.xlu1 %v5964_v39, %s10431_s30  ;;  %v6133_v41 = vrot.slane %v6113_v40, %v9341_v54  ;;  %v8237_v39 = vld [vmem:[%s10403_s5 + $0x48] sm:$0xff]  }
 0x4d9   : > { %v6189_v46 = vrot.slane %v6169_v44, %v9341_v54  ;;  %v8238_v44 = vld [vmem:[%s10403_s5 + $0x8] sm:$0xff]  }
 0x4dc   : > { %6150 = vrot.lane.b32.xlu1 %v6133_v41, %s10431_s30  ;;  %s7552_s30 = sshll.u32 %s8435_s21, 4  ;;  %s8353_s21 = smov [#allocation9]  }
 0x4dd   : > { %s10354_s22 = scalar_lea.hbm %s10409_s11, %s7552_s30 }
 0x4e0   : > { %6206 = vrot.lane.b32.xlu1 %v6189_v46, %s10429_s12 }
 0x4f6   : > { %v5466_v7 = vpop.f32.mrf.mxu1 }
 0x4f7   : > { %v5467_v48 = vadd.f32 %v10016_v61, %v5466_v7  ;;  %v6171_v7 = vpack.c.bf16 %v6167_v30, %v6167_v30 }
 0x4f8   : > { %v5468_v14 = vpop.f32.mrf.mxu1 }
 0x4f9   : > { %v5479_v1 = vmax.f32 %v5467_v48, 0.0  ;;  %v6227_v48 = vpack.c.bf16 %v6223_v32, %v6223_v32  ;;  %v8239_v14 = vld [vmem:[%s10403_s5 + $0x40] sm:$0xff]  }
 0x4fa   : > { %v5469_v49 = vpop.f32.mrf.mxu1 }
 0x4fb   : > { %v5591_v36 = vcombine.high %v5479_v1, %v5479_v1  ;;  %v5470_v45 = vadd.f32 %v10016_v61, %v5469_v49  ;;  %v5598_v2 = vrot.slane %v5479_v1, %v9341_v54  ;;  %6231 = vst.msk [vmem:[#allocation7 + $0x16] sm:$0x3] %vm5863_vm5, %v6227_v48 }
 0x4fc   : > { %v5471_v53 = vpop.f32.mrf.mxu1 }
 0x4fd   : > { %v5480_v51 = vmax.f32 %v5470_v45, 0.0  ;;  %v5605_v56 = vrot.slane %v5591_v36, %v9341_v54  ;;  %v5606_v59 = vcombine.high %v5598_v2, %v5598_v2  ;;  %v8240_v36 = vld [vmem:[%s10403_s5] sm:$0xff]   ;;  %v6203_v45 = vrot.slane %v6171_v7, %v9341_v54 }
 0x4fe   : > { %v8350_v53 = vmov 0.0   ;;  %v8352_v7 = vmov 1966171168  }
 0x4ff   : > { %v5608_v33 = vcombine.high %v5480_v51, %v5480_v51  ;;  %v5615_v58 = vrot.slane %v5480_v51, %v9341_v54  ;;  %v5607_v57 = vcombine.high %v5605_v56, %v5605_v56  ;;  %v6594_v48 = vunpack.c.l.s4 %v8352_v7 }
 0x501   : > { %v5622_v62 = vrot.slane %v5608_v33, %v9341_v54  ;;  %v5623_v43 = vcombine.high %v5615_v58, %v5615_v58  ;;  %v5669_v47 = vmax.f32 %v5598_v2, %v5615_v58 }
 0x503   : > { %v5624_v0 = vcombine.high %v5622_v62, %v5622_v62  ;;  %v5670_v3 = vmax.f32 %v5606_v59, %v5623_v43  ;;  %v5671_v4 = vmax.f32 %v5605_v56, %v5622_v62  ;;  %v7499_v60 = vrot.slane %v5669_v47, 9 }
 0x505   : > { %v5672_v61 = vmax.f32 %v5607_v57, %v5624_v0  ;;  %v7500_v63 = vrot.slane %v5670_v3, 9  ;;  %v7501_v8 = vrot.slane %v5671_v4, 9  ;;  %v5749_v9 = vmax.f32 %v5669_v47, %v7499_v60 }
 0x507   : > { %v7502_v19 = vrot.slane %v5672_v61, 9  ;;  %v5750_v11 = vmax.f32 %v5670_v3, %v7500_v63  ;;  %v5751_v26 = vmax.f32 %v5671_v4, %v7501_v8  ;;  %v5820_v15 = vrot.slane %v5749_v9, %v9357_v31 }
 0x509   : > { %v5752_v13 = vmax.f32 %v5672_v61, %v7502_v19  ;;  %v5824_v16 = vrot.slane %v5750_v11, %v9357_v31  ;;  %v5828_v34 = vrot.slane %v5751_v26, %v9357_v31  ;;  %v8243_v19 = vld [vmem:[#allocation7 + $0x4] ss:$6 sps:$4 sm:$0x33]  }
 0x50a   : > { %v8248_v11 = vld [vmem:[%s10403_s5 + $0x80] sm:$0xff]  }
 0x50b   : > { %v5832_v20 = vrot.slane %v5752_v13, %v9357_v31  ;;  %v5842_v18 = vsel %vm4631_vm1, %v5824_v16, %v5820_v15  ;;  %v8233_v31 = vld [vmem:[%s10403_s5 + $0x58] sm:$0xff]   ;;  %vm8351_vm1 = vmmov 0   ;;  %v6300_v13 = vrot.slane %v8243_v19, %v9341_v54  ;;  %v8263_v19 = vld [vmem:[%s10405_s7 + $0x40] sm:$0xff]  }
 0x50c   : > { %v5843_v35 = vsel %vm10476_vm10, %v5828_v34, %v5842_v18  ;;  %8008 = vmatprep.subr.bf16.mxu1 %v8233_v31  ;;  %v8249_v16 = vld [vmem:[%s10405_s7 + $0x78] sm:$0xff]   ;;  %v8252_v18 = vld [vmem:[%s10405_s7 + $0x30] sm:$0xff]  }
 0x50d   : > { %v5844_v21 = vsel %vm10477_vm8, %v5832_v20, %v5843_v35  ;;  %8009 = vmatpush3.bf16.msra.mxu1 %v8234_v52  ;;  %v8250_v34 = vld [vmem:[%s10405_s7 + $0x38] sm:$0xff]   ;;  %v8251_v20 = vld [vmem:[%s10405_s7 + $0x70] sm:$0xff]   ;;  %8025 = vmatprep.subr.bf16.mxu0 %v8249_v16  ;;  %v8253_v35 = vld [vmem:[%s10405_s7 + $0x68] sm:$0xff]  }
 0x50e   : > { %5854 = vst.msk [vmem:[#allocation4 + $0x21] sm:$0xf] %vm5850_vm2, %v5844_v21  ;;  %8010 = vmatprep.subr.bf16.mxu1 %v8235_v55  ;;  %vm6428_vm2 = vcmask 261120   ;;  %8026 = vmatpush3.bf16.msra.mxu0 %v8250_v34  ;;  %v8254_v21 = vld [vmem:[%s10405_s7 + $0x28] sm:$0xff]   ;;  %v8257_v31 = vld [vmem:[%s10405_s7 + $0x58] sm:$0xff]  }
 0x50f   : > { %8027 = vmatprep.subr.bf16.mxu0 %v8251_v20  ;;  %v8258_v52 = vld [vmem:[%s10405_s7 + $0x18] sm:$0xff]  }
 0x510   : > { %v6616_v16 = vld [vmem:[#allocation8 + $0x1] sm:$0x1] }
 0x511   : > { %8011 = vmatpush3.bf16.msra.mxu1 %v8236_v38 }
 0x512   : > { %8012 = vmatprep.subr.bf16.mxu1 %v8237_v39  ;;  %8028 = vmatpush3.bf16.msra.mxu0 %v8252_v18 }
 0x513   : > { %8029 = vmatprep.subr.bf16.mxu0 %v8253_v35 }
 0x515   : > { %v6110_v24 = vld [vmem:[#allocation4 + $0x20] sm:$0xf]  ;;  %8013 = vmatpush3.bf16.msra.mxu1 %v8238_v44 }
 0x516   : > { %v6054_v50 = vld [vmem:[#allocation4 + $0x22] sm:$0xf]  ;;  %v6114_v25 = vpack.c.bf16 %v6110_v24, %v6110_v24  ;;  %8014 = vmatprep.subr.bf16.mxu1 %v8239_v14  ;;  %8030 = vmatpush3.bf16.msra.mxu0 %v8254_v21 }
 0x517   : > { %v6166_v17 = vld [vmem:[#allocation4 + $0x21] sm:$0xf]  ;;  %v6058_v27 = vpack.c.bf16 %v6054_v50, %v6054_v50  ;;  %8031 = vmatprep.subr.bf16.mxu0 %v8255_v22 }
 0x518   : > { %v5985_v29 = vld [vmem:[#allocation4 + $0x20] sm:$0xf]  ;;  %v6140_v40 = vrot.slane %v6114_v25, %v9341_v54  ;;  %v6170_v6 = vpack.c.bf16 %v6166_v17, %v6166_v17 }
 0x519   : > { %v6042_v28 = vld [vmem:[#allocation4 + $0x21] sm:$0xf]  ;;  %v6090_v5 = vrot.slane %v6058_v27, %v9341_v54  ;;  %v5989_v23 = vpack.c.bf16 %v5985_v29, %v5985_v29  ;;  %8015 = vmatpush3.bf16.msra.mxu1 %v8240_v36 }
 0x51a   : > { %v6046_v37 = vpack.c.bf16 %v6042_v28, %v6042_v28  ;;  %v6222_v41 = vld [vmem:[#allocation4 + $0x22] sm:$0xf]  ;;  %6152 = vrot.lane.b32.xlu0 %v6140_v40, %s10478_s14  ;;  %v6196_v1 = vrot.slane %v6170_v6, %v9341_v54  ;;  %8098 = vmatprep.subr.bf16.mxu1 %v8350_v53  ;;  %v7503_v28 = vld [vmem:[%s10404_s6] ss:$0 sm:$0xff] }
 0x51b   : > { %v6226_v46 = vpack.c.bf16 %v6222_v41, %v6222_v41  ;;  %6097 = vrot.lane.b32.xlu1 %v6090_v5, %s10440_s29  ;;  %v6021_v49 = vrot.slane %v5989_v23, %v9341_v54  ;;  %s10479_s29 = smov 96   ;;  %8032 = vmatpush3.bf16.msra.mxu0 %v8256_v12  ;;  %v8259_v24 = vld [vmem:[%s10405_s7 + $0x50] sm:$0xff]  }
 0x51c   : > { %6050 = vst.msk [vmem:[#allocation7 + $0x14] sm:$0x3] %vm5863_vm5, %v6046_v37  ;;  %8033 = vmatprep.subr.bf16.mxu0 %v8257_v31  ;;  %v8260_v50 = vld [vmem:[%s10405_s7 + $0x10] sm:$0xff]  }
 0x51d   : > { %6230 = vst.msk [vmem:[#allocation7 + $0x10] sm:$0x3] %vm5863_vm5, %v6226_v46  ;;  %vm10295_vm5 = vmand %vm6585_vm3, %vm6586_vm4 }
 0x51e   : > { %6208 = vrot.lane.b32.xlu0 %v6196_v1, %s10479_s29 }
 0x51f   : > { %6028 = vrot.lane.b32.xlu1 %v6021_v49, %s10479_s29  ;;  %8034 = vmatpush3.bf16.msra.mxu0 %v8258_v52  ;;  %v8265_v52 = vld [vmem:[%s10407_s9 + $0x38] sm:$0xff]  }
 0x520   : > { %8035 = vmatprep.subr.bf16.mxu0 %v8259_v24  ;;  %v8266_v24 = vld [vmem:[%s10407_s9 + $0x30] sm:$0xff]  }
 0x523   : > { %6210 = vrot.lane.b32.xlu1 %v6203_v45, %s10479_s29  ;;  %8036 = vmatpush3.bf16.msra.mxu0 %v8260_v50  ;;  %v8267_v50 = vld [vmem:[%s10407_s9 + $0x28] sm:$0xff]   ;;  %s6957_s29 = sshll.u32 %s8472_s16, 4  ;;  %s10356_s29 = int_to_ptr.vmem [resolvable:$true] %s6957_s29 }
 0x524   : > { %v8246_v9 = vld [vmem:[#allocation7 + $0x10] ss:$6 sps:$4 sm:$0x33]   ;;  %s8274_s1 = scalar_lea.vmem %s10356_s29, 16 }
 0x525   : > { %v6314_v26 = vrot.slane %v8246_v9, %v9341_v54  ;;  %p8275_p12 = scmp.ne.s32.totalorder %s10356_s29, %s8274_s1 }
 0x527   : > { %v6317_v15 = vcombine.low %v6300_v13, %v6314_v26  ;;  %p8276_p13 = pnand %p8275_p12, %p8452_p5 }
 0x529   : > { %p8277_p0 = pneg %p8276_p13 }
 0x545   : > { %v6096_v2 = vpop.permute.xlu0 %6095 }
 0x546   : > { %v5915_v51 = vpop.permute.xlu1 %5914  ;;  %6105 = vst.msk [vmem:[#allocation7 + $0xe] sm:$0x3] %vm5920_vm12, %v6096_v2 }
 0x547   : > { %5924 = vst.msk [vmem:[#allocation7 + $0x12] sm:$0x3] %vm5920_vm12, %v5915_v51 }
 0x549   : > { %v6027_v56 = vpop.permute.xlu0 %6026 }
 0x54a   : > { %v5972_v33 = vpop.permute.xlu1 %5971  ;;  %6037 = vst.msk [vmem:[#allocation7 + $0xc] sm:$0x3] %vm6034_vm6, %v6027_v56  ;;  %v6595_v56 = vunpack.c.0.s8 %v6594_v48 }
 0x54b   : > { %5981 = vst.msk [vmem:[#allocation7 + $0x12] sm:$0x3] %vm5977_vm13, %v5972_v33 }
 0x54e   : > { %v6151_v58 = vpop.permute.xlu1 %6150 }
 0x54f   : > { %6161 = vst.msk [vmem:[#allocation7 + $0x8] sm:$0x3] %vm5977_vm13, %v6151_v58 }
 0x552   : > { %v6207_v59 = vpop.permute.xlu1 %6206 }
 0x553   : > { %6217 = vst.msk [vmem:[#allocation7 + $0x8] sm:$0x3] %vm6034_vm6, %v6207_v59 }
 0x55a   : > { %v8241_v3 = vld [vmem:[#allocation7] ss:$6 sps:$4 sm:$0xff]  }
 0x55b   : > { %v6293_v60 = vrot.slane %v8241_v3, %v9341_v54 }
 0x58c   : > { %v6153_v62 = vpop.permute.xlu0 %6152 }
 0x58d   : > { %v6098_v43 = vpop.permute.xlu1 %6097  ;;  %6162 = vst.msk [vmem:[#allocation7 + $0xe] sm:$0x3] %vm5977_vm13, %v6153_v62  ;;  %v8261_v62 = vld [vmem:[%s10405_s7 + $0x48] sm:$0xff]  }
 0x58e   : > { %6106 = vst.msk [vmem:[#allocation7 + $0x14] sm:$0x3] %vm5920_vm12, %v6098_v43  ;;  %v8262_v43 = vld [vmem:[%s10405_s7 + $0x8] sm:$0xff]   ;;  %8037 = vmatprep.subr.bf16.mxu0 %v8261_v62  ;;  %vm6611_vm12 = vmand %vm6610_vm7, %vm6586_vm4 }
 0x58f   : > { %6163 = vst.msk [vmem:[#allocation7 + $0x14] sm:$0x3] %vm5977_vm13, %v10077_v42  ;;  %v8247_v42 = vld [vmem:[%s10403_s5 + $0x88] sm:$0xff]   ;;  %8038 = vmatpush3.bf16.msra.mxu0 %v8262_v43 }
 0x590   : > { %v6209_v47 = vpop.permute.xlu0 %6208  ;;  %8039 = vmatprep.subr.bf16.mxu0 %v8263_v19 }
 0x591   : > { %v6029_v57 = vpop.permute.xlu1 %6028  ;;  %6218 = vst.msk [vmem:[#allocation7 + $0xe] sm:$0x3] %vm6034_vm6, %v6209_v47 }
 0x592   : > { %6038 = vst.msk [vmem:[#allocation7 + $0x12] sm:$0x3] %vm6034_vm6, %v6029_v57 }
 0x595   : > { %v6211_v0 = vpop.permute.xlu1 %6210 }
 0x596   : > { %6219 = vst.msk [vmem:[#allocation7 + $0x14] sm:$0x3] %vm6034_vm6, %v6211_v0 }
 0x59d   : > { %v8244_v4 = vld [vmem:[#allocation7 + $0xc] ss:$6 sps:$4 sm:$0xff]  }
 0x59e   : > { %v6307_v61 = vrot.slane %v8244_v4, %v9341_v54 }
 0x5a0   : > { %v6315_v63 = vcombine.low %v6293_v60, %v6307_v61  ;;  %v6316_v8 = vcombine.high %v6293_v60, %v6307_v61  ;;  %v6598_v60 = vsub.s32 %v6595_v56, %v9325_v10  ;;  %v6588_v61 = vld [vmem:[#allocation8] sm:$0x1] }
 0x5a2   : > { %6464 = vmatprep.mubr.bf16.mxu1 %v6316_v8 }
 0x5a3   : > { %6465 = vmatmul.mubr.bf16.vlgmr.msra.gmra.mxu1 %v6315_v63 }
 0x5a4   : > { %8099 = vmatpush3.bf16.msra.mxu1 %v8247_v42  ;;  %8102 = vmatprep.mubr.msk.bf16.mxu1 %vm8351_vm1, %v8350_v53 }
 0x5a5   : > { %8100 = vmatprep.subr.bf16.mxu1 %v8350_v53 }
 0x5a8   : > { %8101 = vmatpush3.bf16.msra.mxu1 %v8248_v11  ;;  %v8264_v11 = vld [vmem:[%s10405_s7] sm:$0xff]  }
 0x5a9   : > { %8106 = vmatprep.subr.bf16.mxu1 %v8350_v53  ;;  %8040 = vmatpush3.bf16.msra.mxu0 %v8264_v11 }
 0x5ab   : > { %8103 = vmatmul.mubr.msk.bf16.vlgmr.msra.gmra.mxu1 %vm6428_vm2, %v6317_v15 }
 0x5ac   : > { %8122 = vmatprep.mubr.msk.bf16.mxu1 %vm8351_vm1, %v8350_v53  ;;  %8107 = vmatpush3.bf16.msra.mxu1 %v8265_v52 }
 0x5ad   : > { %8108 = vmatprep.subr.bf16.mxu1 %v8350_v53 }
 0x5b0   : > { %8109 = vmatpush3.bf16.msra.mxu1 %v8266_v24 }
 0x5b1   : > { %8110 = vmatprep.subr.bf16.mxu1 %v8350_v53 }
 0x5b4   : > { %8111 = vmatpush3.bf16.msra.mxu1 %v8267_v50 }
 0x5b5   : > { %8112 = vmatprep.subr.bf16.mxu1 %v8350_v53 }
 0x663   : > { %v8016_v17 = vpop.f32.mrf.mxu1 }
 0x665   : > { %v8017_v25 = vpop.f32.mrf.mxu1 }
 0x666   : > { %v8018_v27 = vadd.f32 %v8017_v25, %v8016_v17  ;;  %v8268_v17 = vld [vmem:[%s10407_s9 + $0x20] sm:$0xff]   ;;  %v8269_v25 = vld [vmem:[%s10407_s9 + $0x18] sm:$0xff]  }
 0x667   : > { %v8019_v29 = vpop.f32.mrf.mxu1  ;;  %8113 = vmatpush3.bf16.msra.mxu1 %v8268_v17 }
 0x668   : > { %v6467_v37 = vadd.f32 %v8018_v27, %v7503_v28  ;;  %8114 = vmatprep.subr.bf16.mxu1 %v8350_v53 }
 0x669   : > { %v8020_v55 = vpop.f32.mrf.mxu1 }
 0x66a   : > { %v8021_v30 = vadd.f32 %v8020_v55, %v8019_v29 }
 0x66b   : > { %v6507_v38 = vpop.f32.mrf.mxu1  ;;  %8115 = vmatpush3.bf16.msra.mxu1 %v8269_v25 }
 0x66c   : > { %v6508_v39 = vadd.f32 %v6507_v38, %v6467_v37  ;;  %v6470_v6 = vadd.f32 %v8021_v30, %v7503_v28  ;;  %8116 = vmatprep.subr.bf16.mxu1 %v8350_v53 }
 0x66d   : > { %v8104_v40 = vpop.f32.mrf.mxu1 }
 0x66e   : > { %v6514_v5 = vmax.f32 %v6508_v39, 0.0 }
 0x66f   : > { %v6510_v23 = vpop.f32.mrf.mxu1 }
 0x670   : > { %v6518_v41 = vcombine.high %v6514_v5, %v6514_v5  ;;  %v6525_v44 = vrot.slane %v6514_v5, %v9341_v54  ;;  %v6511_v32 = vadd.f32 %v6510_v23, %v6470_v6  ;;  %v8270_v6 = vld [vmem:[%s10407_s9 + $0x10] sm:$0xff]   ;;  %v8271_v23 = vld [vmem:[%s10407_s9 + $0x8] sm:$0xff]  }
 0x671   : > { %v8105_v46 = vpop.f32.mrf.mxu1  ;;  %8117 = vmatpush3.bf16.msra.mxu1 %v8270_v6 }
 0x672   : > { %v6532_v14 = vrot.slane %v6518_v41, %v9341_v54  ;;  %v6515_v1 = vmax.f32 %v6511_v32, 0.0  ;;  %v6533_v49 = vcombine.high %v6525_v44, %v6525_v44  ;;  %8118 = vmatprep.subr.bf16.mxu1 %v8350_v53  ;;  %v8272_v41 = vld [vmem:[%s10407_s9] sm:$0xff]  }
 0x673   : > { %v6674_v32 = vld [vmem:[%s10406_s8] sm:$0x1] }
 0x674   : > { %v6534_v36 = vcombine.high %v6532_v14, %v6532_v14  ;;  %v6560_v45 = vmax.f32 %v6525_v44, %v6532_v14  ;;  %v6535_v2 = vcombine.high %v6515_v1, %v6515_v1  ;;  %v6542_v51 = vrot.slane %v6515_v1, %v9341_v54 }
 0x675   : > { %8119 = vmatpush3.bf16.msra.mxu1 %v8271_v23 }
 0x676   : > { %v6561_v33 = vmax.f32 %v6533_v49, %v6534_v36  ;;  %v7523_v58 = vrot.slane %v6560_v45, 9  ;;  %v6549_v59 = vrot.slane %v6535_v2, %v9341_v54  ;;  %v6550_v47 = vcombine.high %v6542_v51, %v6542_v51  ;;  %8120 = vmatprep.subr.bf16.mxu1 %v8350_v53  ;;  %v6854_v53 = vld [vmem:[%s10408_s10] sm:$0x1] }
 0x678   : > { %v7524_v57 = vrot.slane %v6561_v33, 9  ;;  %v6580_v0 = vmax.f32 %v6560_v45, %v7523_v58  ;;  %v6551_v3 = vcombine.high %v6549_v59, %v6549_v59  ;;  %v6562_v4 = vmax.f32 %v6542_v51, %v6549_v59 }
 0x679   : > { %8121 = vmatpush3.bf16.msra.mxu1 %v8272_v41 }
 0x67a   : > { %v6581_v63 = vmax.f32 %v6561_v33, %v7524_v57  ;;  %v6584_v8 = vpack.c.bf16 %v6580_v0, %v6580_v0  ;;  %v6563_v42 = vmax.f32 %v6550_v47, %v6551_v3  ;;  %v7525_v9 = vrot.slane %v6562_v4, 9 }
 0x67c   : > { %v6591_v10 = vpack.c.bf16 %v6581_v63, %v6581_v63  ;;  %v7526_v26 = vrot.slane %v6563_v42, 9  ;;  %v6582_v13 = vmax.f32 %v6562_v4, %v7525_v9  ;;  %v6589_v15 = vsel %vm10295_vm5, %v6584_v8, %v6588_v61 }
 0x67d   : > { %6590 = vst [vmem:[#allocation8] sm:$0x1] %v6589_v15 }
 0x67e   : > { %v6583_v34 = vmax.f32 %v6563_v42, %v7526_v26  ;;  %v6615_v20 = vpack.c.bf16 %v6582_v13, %v6582_v13  ;;  %v6599_v18 = vrot.slane %v6591_v10, %v6598_v60 }
 0x680   : > { %v6619_v35 = vpack.c.bf16 %v6583_v34, %v6583_v34  ;;  %v6606_v21 = vrot.slane %v6599_v18, %v6598_v60  ;;  %v6617_v22 = vsel %vm10295_vm5, %v6615_v20, %v6616_v16 }
 0x681   : > { %6618 = vst [vmem:[#allocation8 + $0x1] sm:$0x1] %v6617_v22 }
 0x682   : > { %6607 = vrot.lane.b32.xlu0 %v6606_v21, %s10478_s14  ;;  %v6627_v12 = vrot.slane %v6619_v35, %v6598_v60 }
 0x684   : > { %v6634_v31 = vrot.slane %v6627_v12, %v6598_v60  ;;  %v6612_v27 = vld [vmem:[#allocation8] sm:$0x1] }
 0x686   : > { %6635 = vrot.lane.b32.xlu1 %v6634_v31, %s10478_s14  ;;  %s8278_s14 = sshll.u32 %s8353_s21, 4  ;;  %s8279_s14 = int_to_ptr.vmem [resolvable:$false] %s8278_s14 }
 0x687   : > { %s8280_s24 = scalar_lea.vmem %s8279_s14, 32  ;;  %p8281_p1 = scmp.lt.s32.totalorder %s10356_s29, %s8279_s14 }
 0x688   : > { %v6638_v55 = vld [vmem:[#allocation8 + $0x1] sm:$0x1]  ;;  %p8282_p2 = scmp.lt.s32.totalorder %s8280_s24, %s8274_s1 }
 0x68a   : > { %p8283_p3 = por %p8282_p2, %p8281_p1 }
 0x68c   : > { %p8284_p4 = pnand %p8283_p3, %p8277_p0 }
 0x6f4   : > { %v6608_v29 = vpop.permute.xlu0 %6607 }
 0x6f5   : > { %v6613_v28 = vsel %vm6611_vm12, %v6608_v29, %v6612_v27 }
 0x6f6   : > { %6614 = vst [vmem:[#allocation8] sm:$0x1] %v6613_v28 }
 0x6f8   : > { %v6636_v30 = vpop.permute.xlu1 %6635 }
 0x6f9   : > { %v6639_v37 = vsel %vm6611_vm12, %v6636_v30, %v6638_v55 }
 0x6fa   : > { %6640 = vst [vmem:[#allocation8 + $0x1] sm:$0x1] %v6639_v37 }
 0x701   : > { %v7527_v38 = vld.sshfl [vmem:[#allocation8] sm:$0x11 pattern:$0x75316420] }
 0x702   : > { %v6683_v39 = vcombine.high %v7527_v38, %v7527_v38  ;;  %v6690_v5 = vrot.slane %v7527_v38, %v6598_v60 }
 0x704   : > { %v6697_v40 = vrot.slane %v6683_v39, %v6598_v60 }
 0x706   : > { %6828 = vmatprep.mubr.bf16.mxu0 %v6697_v40 }
 0x707   : > { %6829 = vmatmul.mubr.bf16.vlgmr.msra.gmra.mxu0 %v6690_v5 }
 0x7c7   : > { %v8041_v44 = vpop.f32.mrf.mxu0 }
 0x7c9   : > { %v8042_v46 = vpop.f32.mrf.mxu0 }
 0x7ca   : > { %v8043_v7 = vadd.f32 %v8042_v46, %v8041_v44 }
 0x7cb   : > { %v8044_v48 = vpop.f32.mrf.mxu0 }
 0x7cc   : > { %v6831_v14 = vadd.f32 %v8043_v7, %v6674_v32 }
 0x7cd   : > { %v8045_v1 = vpop.f32.mrf.mxu0 }
 0x7ce   : > { %v6836_v49 = vmax.f32 %v6831_v14, 0.0 }
 0x7d0   : > { %v6837_v36 = vpack.c.bf16 %v6836_v49, %v6836_v49 }
 0x7d2   : > { %8123 = vmatmul.mubr.bf16.vlgmr.msra.gmra.mxu1 %v6837_v36 }
 0x892   : > { %v6937_v45 = vpop.f32.mrf.mxu1 }
 0x893   : > { %v6938_v2 = vadd.f32 %v6937_v45, %v6854_v53 }
 0x894   : > { %v8124_v51 = vpop.f32.mrf.mxu1 }
 0x895   : > { %6943 = vst [vmem:[%s8472_s16] sm:$0x1] %v6938_v2 }
 0x896   : > { %v6940_v56 = vpop.f32.mrf.mxu1 }
 0x897   : > { %8287 = shalt.err (!%p8284_p4)
}
 0x898   : > { %s8288_s16 = scalar_lea.hbm %s10354_s22, 16  ;;  %s8292_s12 = scalar_lea.hbm %s10409_s11, 32 }
 0x899   : > { %p8289_p7 = scmp.ne.s32.totalorder %s10354_s22, %s8288_s16  ;;  %p8293_p10 = scmp.lt.s32.totalorder %s10354_s22, %s10409_s11 }
 0x89a   : > { %p8294_p11 = scmp.lt.s32.totalorder %s8292_s12, %s8288_s16 }
 0x89b   : > { %p8290_p8 = pnand %p8289_p7, %p8452_p5 }
 0x89c   : > { %p8295_p12 = por %p8294_p11, %p8293_p10 }
 0x89d   : > { %p8291_p9 = pneg %p8290_p8 }
 0x89f   : > { %p8296_p13 = pnand %p8295_p12, %p8291_p9 }
 0x8a1   : > { %8299 = shalt.err (!%p8296_p13)
}
 0x8a2   : > { %8127 = dma.vmem_to_hbm [thread:$0]  (%p8452_p5), %s10356_s29, 16, %s10354_s22, %s6945_s0   ;;  %v8125_v33 = vpop.f32.mrf.mxu1 }
 0x8a3 PF: > { %p8133_p0 = scmp.ge.s32.totalorder %s8334_s20, 2  ;;  %s6969_s1 = sand.u32 1, %s8322_s17  }
 0x8a4   : > { %s6970_s21 = scalar_lea.sflag [#allocation10], %s6969_s1 }
 0x8a5   : > { %p8130_p1 = pnand %p8133_p0, %p8456_p6 }
 0x8a7   : > { %p8131_p2 = pneg %p8130_p1 }
 0x8a9   : > { %8317 = dma.done.wait (%p8131_p2), %s6970_s21, 16  }
 0x8aa   : > { %8319 = vsyncadd (%p8131_p2), %s6970_s21, 4294967280  ;;  %p21_p3 = scmp.ge.s32.totalorder %s8439_s23, 4   ;;  %s10483_s17 = smov %s8326_s18 }
 0x8ab   : > { %s10484_s18 = smov %s8330_s19  ;;  %s10485_s19 = smov %s8450_s26 }
 0x8ac   : > { %s10486_s20 = smov %s8439_s23  ;;  %23 = sbr.rel (!%p21_p3) target bundleno = 6 (0x6), region = 109 }
 0x8b1   :  { %6974 = vsyncpa [#allocation10], 1 }
 0x8b2   :  { %6976 = vsyncpa [#allocation10 + $0x1], 1 }

</bundles_post_ra>
